<compile_context>
chip_gen: v7x
topology: tpu7x:2x2x1
jax: 0.10.0
libtpu: 0.0.40
codegen_flags: <defaults>
</compile_context>

<pallas_src>
import jax
import jax.numpy as jnp
from jax.experimental import pallas as pl
from jax.experimental.pallas import tpu as pltpu


# ---------------- static geometry ----------------
# stage 1: conv1 on 16x16 (pad 1) -> pool to 8x8
H1 = W1 = 16
WP1 = W1 + 2                      # padded width (18)
SP1 = (H1 + 2) * WP1              # padded flat size (324)
S1 = 328                          # per-image row stride, stage 1 (>= SP1, multiple of 8)
SLACK1 = 48                       # tap slack rows (>= max tap offset 2*WP1+2 = 38)
CIN1, COUT1 = 8, 16               # Cin zero-padded 3 -> 8

# stage 2: conv2 on 8x8 (pad 1) -> pool to 4x4
H2 = W2 = 8
WP2 = W2 + 2                      # 10
SP2 = (H2 + 2) * WP2              # 100
S2 = 104                          # per-image row stride, stage 2
SLACK2 = 24                       # >= max tap offset 2*WP2+2 = 22
CIN2, COUT2 = 16, 32

HO2 = WO2 = 4                     # final spatial dims


# ---------------- fused Pallas kernel (nb images per grid step) ----------------

def _make_kernel(nb):
    M1 = nb * S1                  # conv1 matmul M (all images stacked)
    M2 = nb * S2                  # conv2 matmul M

    def kernel(x_ref, w1_ref, b1_ref, w2_ref, b2_ref, o_ref,
               y1_ref, x2_ref, y2_ref):
        # x_ref : (M1+SLACK1, CIN1)  stacked zero-padded, row-flattened images (channels last)
        # w1_ref: (9*CIN1, COUT1)    conv1 taps stacked (kh, kw, cin)
        # w2_ref: (9*CIN2, COUT2)
        # o_ref : (nb*16, COUT2)     final 4x4 spatial per image, row-major
        # scratch: y1 (M1, COUT1), x2 (M2+SLACK2, CIN2), y2 (M2, COUT2)

        # ----- conv1 + bias + ReLU: 9 shifted-slice matmuls, register accumulation, one store -----
        acc = None
        for k in range(9):
            kh, kw = divmod(k, 3)
            t = jnp.dot(x_ref[pl.ds(kh * WP1 + kw, M1), :],
                        w1_ref[pl.ds(k * CIN1, CIN1), :],
                        preferred_element_type=jnp.float32)
            acc = t if acc is None else acc + t
        y1_ref[...] = jnp.maximum(acc + b1_ref[...], 0.0)

        # ----- maxpool1 (2x2, stride 2), VPU only: strided sublane slices + max -----
        # Pooled interior rows land in the once-zeroed x2 scratch, giving conv2's zero
        # padding for free.
        x2_ref[...] = jnp.zeros_like(x2_ref)
        for n in range(nb):
            for ho in range(H2):
                best = None
                for i in range(2):
                    for j in range(2):
                        start = n * S1 + (2 * ho + i) * WP1 + j
                        v = y1_ref[pl.ds(start, W2, stride=2), :]
                        best = v if best is None else jnp.maximum(best, v)
                x2_ref[pl.ds(n * S2 + (ho + 1) * WP2 + 1, W2), :] = best

        # ----- conv2 + bias + ReLU -----
        acc = None
        for k in range(9):
            kh, kw = divmod(k, 3)
            t = jnp.dot(x2_ref[pl.ds(kh * WP2 + kw, M2), :],
                        w2_ref[pl.ds(k * CIN2, CIN2), :],
                        preferred_element_type=jnp.float32)
            acc = t if acc is None else acc + t
        y2_ref[...] = jnp.maximum(acc + b2_ref[...], 0.0)

        # ----- maxpool2 (2x2, stride 2) -> final rows -----
        for n in range(nb):
            for ho in range(HO2):
                best = None
                for i in range(2):
                    for j in range(2):
                        start = n * S2 + (2 * ho + i) * WP2 + j
                        v = y2_ref[pl.ds(start, WO2, stride=2), :]
                        best = v if best is None else jnp.maximum(best, v)
                o_ref[pl.ds(n * HO2 * WO2 + ho * WO2, WO2), :] = best.astype(o_ref.dtype)

    return kernel


# ---------------- wrapper ----------------

def simple_cnn_forward(x_nchw, params):
    N = x_nchw.shape[0]
    nb = min(N, 8)                          # images folded into one grid step (matmul M dim)
    num_chunks = -(-N // nb)
    n_pad = num_chunks * nb
    M1, M2 = nb * S1, nb * S2

    # NCHW -> NHWC, zero-pad batch / spatial (+1 each side) / channels 3 -> 8
    x = jnp.transpose(x_nchw, (0, 2, 3, 1))
    x = jnp.pad(x, ((0, n_pad - N), (1, 1), (1, 1), (0, CIN1 - 3)))   # (n_pad, 18, 18, 8)
    x = x.reshape(n_pad, SP1, CIN1)
    x = jnp.pad(x, ((0, 0), (0, S1 - SP1), (0, 0)))                   # per-image stride S1
    x = x.reshape(num_chunks, nb * S1, CIN1)
    x = jnp.pad(x, ((0, 0), (0, SLACK1), (0, 0)))                     # tap slack rows

    w1 = jnp.pad(params["w1"], ((0, 0), (0, 0), (0, CIN1 - 3), (0, 0)))
    w1 = w1.reshape(9 * CIN1, COUT1)                                  # (72, 16)
    b1 = params["b1"].reshape(1, COUT1)
    w2 = params["w2"].reshape(9 * CIN2, COUT2)                        # (144, 32)
    b2 = params["b2"].reshape(1, COUT2)

    flops = num_chunks * 2 * (M1 * 9 * CIN1 * COUT1 + M2 * 9 * CIN2 * COUT2)
    bytes_accessed = 4 * (x.size + w1.size + b1.size + w2.size + b2.size
                          + num_chunks * nb * HO2 * WO2 * COUT2)

    out = pl.pallas_call(
        _make_kernel(nb),
        out_shape=jax.ShapeDtypeStruct((num_chunks, nb * HO2 * WO2, COUT2), jnp.float32),
        grid=(num_chunks,),
        in_specs=[
            pl.BlockSpec((None, M1 + SLACK1, CIN1), lambda c: (c, 0, 0)),   # stacked images
            pl.BlockSpec((9 * CIN1, COUT1), lambda c: (0, 0)),              # w1
            pl.BlockSpec((1, COUT1), lambda c: (0, 0)),                     # b1
            pl.BlockSpec((9 * CIN2, COUT2), lambda c: (0, 0)),              # w2
            pl.BlockSpec((1, COUT2), lambda c: (0, 0)),                     # b2
        ],
        out_specs=pl.BlockSpec((None, nb * HO2 * WO2, COUT2), lambda c: (c, 0, 0)),
        scratch_shapes=[
            pltpu.VMEM((M1, COUT1), jnp.float32),            # conv1 output (padded-flat grid)
            pltpu.VMEM((M2 + SLACK2, CIN2), jnp.float32),    # pooled + zero-padded conv2 input
            pltpu.VMEM((M2, COUT2), jnp.float32),            # conv2 output (padded-flat grid)
        ],
        compiler_params=pltpu.CompilerParams(dimension_semantics=("parallel",)),
        cost_estimate=pl.CostEstimate(flops=flops, transcendentals=0,
                                      bytes_accessed=bytes_accessed),
    )(x, w1, b1, w2, b2)

    out = out.reshape(n_pad, HO2, WO2, COUT2)[:N]            # (N, 4, 4, 32)
    return jnp.transpose(out, (0, 3, 1, 2))                  # NHWC -> NCHW (N, 32, 4, 4)


# ---------------- deterministic parameter init (synthetic) ----------------

def init_params(key):
    k1, k2, k3, k4 = jax.random.split(key, 4)
    fan1 = 3 * 3 * 3
    fan2 = 3 * 3 * 16
    w1 = jax.random.uniform(k1, (3, 3, 3, 16), jnp.float32, -1.0, 1.0) / jnp.sqrt(fan1)
    b1 = jax.random.uniform(k2, (16,), jnp.float32, -1.0, 1.0) / jnp.sqrt(fan1)
    w2 = jax.random.uniform(k3, (3, 3, 16, 32), jnp.float32, -1.0, 1.0) / jnp.sqrt(fan2)
    b2 = jax.random.uniform(k4, (32,), jnp.float32, -1.0, 1.0) / jnp.sqrt(fan2)
    return dict(w1=w1, b1=b1, w2=w2, b2=b2)


# ---------------- pure-JAX reference for correctness ----------------

def reference_forward(x, params):
    def conv(x, w, b):
        y = jax.lax.conv_general_dilated(
            x, w, window_strides=(1, 1), padding=((1, 1), (1, 1)),
            dimension_numbers=("NCHW", "HWIO", "NCHW"))
        return jax.nn.relu(y + b[None, :, None, None])

    def pool(x):
        return jax.lax.reduce_window(x, -jnp.inf, jax.lax.max,
                                     (1, 1, 2, 2), (1, 1, 2, 2), "VALID")

    y = pool(conv(x, params["w1"], params["b1"]))
    y = pool(conv(y, params["w2"], params["b2"]))
    return y


if __name__ == "__main__":
    key = jax.random.PRNGKey(0)
    kx, kp = jax.random.split(key)
    x = jax.random.normal(kx, (2, 3, 16, 16), jnp.float32)   # NCHW like torch
    params = init_params(kp)

    out = jax.block_until_ready(jax.jit(simple_cnn_forward)(x, params))
    assert out.shape == (2, 32, 4, 4), out.shape

    ref = jax.block_until_ready(reference_forward(x, params))
    assert jnp.allclose(out, ref, atol=1e-4, rtol=1e-4), "mismatch vs reference"

    print("KERNEL_OK")
</pallas_src>

<mosaic_0001>
module attributes {stable_mosaic.version = 11 : i64} {
  func.func @kernel(%arg0: i32, %arg1: memref<1x704x8xf32, #tpu.memory_space<vmem>>, %arg2: memref<72x16xf32, #tpu.memory_space<vmem>>, %arg3: memref<1x16xf32, #tpu.memory_space<vmem>>, %arg4: memref<144x32xf32, #tpu.memory_space<vmem>>, %arg5: memref<1x32xf32, #tpu.memory_space<vmem>>, %arg6: memref<1x32x32xf32, #tpu.memory_space<vmem>>, %arg7: memref<656x16xf32, #tpu.memory_space<vmem>>, %arg8: memref<232x16xf32, #tpu.memory_space<vmem>>, %arg9: memref<208x32xf32, #tpu.memory_space<vmem>>) attributes {dimension_semantics = [#tpu.dimension_semantics<parallel>], iteration_bounds = array<i64: 1>, scalar_prefetch = 0 : i64, scratch_operands = 3 : i64, tpu.core_type = #tpu.core_type<tc>, window_params = [{transform_indices = @transform_0, window_bounds = array<i64: 1, 704, 8>}, {pipeline_mode = #tpu.pipeline_mode<synchronous>, transform_indices = @transform_1, window_bounds = array<i64: 72, 16>}, {pipeline_mode = #tpu.pipeline_mode<synchronous>, transform_indices = @transform_2, window_bounds = array<i64: 1, 16>}, {pipeline_mode = #tpu.pipeline_mode<synchronous>, transform_indices = @transform_3, window_bounds = array<i64: 144, 32>}, {pipeline_mode = #tpu.pipeline_mode<synchronous>, transform_indices = @transform_4, window_bounds = array<i64: 1, 32>}, {transform_indices = @transform_5, window_bounds = array<i64: 1, 32, 32>}]} {
    %c0 = arith.constant 0 : index
    %c0_0 = arith.constant 0 : index
    %c0_1 = arith.constant 0 : index
    %0 = vector.load %arg1[%c0, %c0_0, %c0_1] : memref<1x704x8xf32, #tpu.memory_space<vmem>>, vector<1x656x8xf32>
    %1 = vector.shape_cast %0 : vector<1x656x8xf32> to vector<656x8xf32>
    %c0_2 = arith.constant 0 : index
    %c0_3 = arith.constant 0 : index
    %2 = vector.load %arg2[%c0_2, %c0_3] : memref<72x16xf32, #tpu.memory_space<vmem>>, vector<8x16xf32>
    %cst = arith.constant dense<0.000000e+00> : vector<656x16xf32>
    %3 = tpu.matmul %1, %2, %cst {dimension_numbers = #tpu.dot_dimension_numbers<[1], [0], [0], [1], [0, 0, 1, 1], [], []>} : vector<656x8xf32>, vector<8x16xf32>, vector<656x16xf32> -> vector<656x16xf32>
    %c0_4 = arith.constant 0 : index
    %c1 = arith.constant 1 : index
    %c0_5 = arith.constant 0 : index
    %4 = vector.load %arg1[%c0_4, %c1, %c0_5] : memref<1x704x8xf32, #tpu.memory_space<vmem>>, vector<1x656x8xf32>
    %5 = vector.shape_cast %4 : vector<1x656x8xf32> to vector<656x8xf32>
    %c8 = arith.constant 8 : index
    %c0_6 = arith.constant 0 : index
    %6 = vector.load %arg2[%c8, %c0_6] : memref<72x16xf32, #tpu.memory_space<vmem>>, vector<8x16xf32>
    %cst_7 = arith.constant dense<0.000000e+00> : vector<656x16xf32>
    %7 = tpu.matmul %5, %6, %cst_7 {dimension_numbers = #tpu.dot_dimension_numbers<[1], [0], [0], [1], [0, 0, 1, 1], [], []>} : vector<656x8xf32>, vector<8x16xf32>, vector<656x16xf32> -> vector<656x16xf32>
    %8 = arith.addf %3, %7 : vector<656x16xf32>
    %c0_8 = arith.constant 0 : index
    %c2 = arith.constant 2 : index
    %c0_9 = arith.constant 0 : index
    %9 = vector.load %arg1[%c0_8, %c2, %c0_9] : memref<1x704x8xf32, #tpu.memory_space<vmem>>, vector<1x656x8xf32>
    %10 = vector.shape_cast %9 : vector<1x656x8xf32> to vector<656x8xf32>
    %c16 = arith.constant 16 : index
    %c0_10 = arith.constant 0 : index
    %11 = vector.load %arg2[%c16, %c0_10] : memref<72x16xf32, #tpu.memory_space<vmem>>, vector<8x16xf32>
    %cst_11 = arith.constant dense<0.000000e+00> : vector<656x16xf32>
    %12 = tpu.matmul %10, %11, %cst_11 {dimension_numbers = #tpu.dot_dimension_numbers<[1], [0], [0], [1], [0, 0, 1, 1], [], []>} : vector<656x8xf32>, vector<8x16xf32>, vector<656x16xf32> -> vector<656x16xf32>
    %13 = arith.addf %8, %12 : vector<656x16xf32>
    %c0_12 = arith.constant 0 : index
    %c18 = arith.constant 18 : index
    %c0_13 = arith.constant 0 : index
    %14 = vector.load %arg1[%c0_12, %c18, %c0_13] : memref<1x704x8xf32, #tpu.memory_space<vmem>>, vector<1x656x8xf32>
    %15 = vector.shape_cast %14 : vector<1x656x8xf32> to vector<656x8xf32>
    %c24 = arith.constant 24 : index
    %c0_14 = arith.constant 0 : index
    %16 = vector.load %arg2[%c24, %c0_14] : memref<72x16xf32, #tpu.memory_space<vmem>>, vector<8x16xf32>
    %cst_15 = arith.constant dense<0.000000e+00> : vector<656x16xf32>
    %17 = tpu.matmul %15, %16, %cst_15 {dimension_numbers = #tpu.dot_dimension_numbers<[1], [0], [0], [1], [0, 0, 1, 1], [], []>} : vector<656x8xf32>, vector<8x16xf32>, vector<656x16xf32> -> vector<656x16xf32>
    %18 = arith.addf %13, %17 : vector<656x16xf32>
    %c0_16 = arith.constant 0 : index
    %c19 = arith.constant 19 : index
    %c0_17 = arith.constant 0 : index
    %19 = vector.load %arg1[%c0_16, %c19, %c0_17] : memref<1x704x8xf32, #tpu.memory_space<vmem>>, vector<1x656x8xf32>
    %20 = vector.shape_cast %19 : vector<1x656x8xf32> to vector<656x8xf32>
    %c32 = arith.constant 32 : index
    %c0_18 = arith.constant 0 : index
    %21 = vector.load %arg2[%c32, %c0_18] : memref<72x16xf32, #tpu.memory_space<vmem>>, vector<8x16xf32>
    %cst_19 = arith.constant dense<0.000000e+00> : vector<656x16xf32>
    %22 = tpu.matmul %20, %21, %cst_19 {dimension_numbers = #tpu.dot_dimension_numbers<[1], [0], [0], [1], [0, 0, 1, 1], [], []>} : vector<656x8xf32>, vector<8x16xf32>, vector<656x16xf32> -> vector<656x16xf32>
    %23 = arith.addf %18, %22 : vector<656x16xf32>
    %c0_20 = arith.constant 0 : index
    %c20 = arith.constant 20 : index
    %c0_21 = arith.constant 0 : index
    %24 = vector.load %arg1[%c0_20, %c20, %c0_21] : memref<1x704x8xf32, #tpu.memory_space<vmem>>, vector<1x656x8xf32>
    %25 = vector.shape_cast %24 : vector<1x656x8xf32> to vector<656x8xf32>
    %c40 = arith.constant 40 : index
    %c0_22 = arith.constant 0 : index
    %26 = vector.load %arg2[%c40, %c0_22] : memref<72x16xf32, #tpu.memory_space<vmem>>, vector<8x16xf32>
    %cst_23 = arith.constant dense<0.000000e+00> : vector<656x16xf32>
    %27 = tpu.matmul %25, %26, %cst_23 {dimension_numbers = #tpu.dot_dimension_numbers<[1], [0], [0], [1], [0, 0, 1, 1], [], []>} : vector<656x8xf32>, vector<8x16xf32>, vector<656x16xf32> -> vector<656x16xf32>
    %28 = arith.addf %23, %27 : vector<656x16xf32>
    %c0_24 = arith.constant 0 : index
    %c36 = arith.constant 36 : index
    %c0_25 = arith.constant 0 : index
    %29 = vector.load %arg1[%c0_24, %c36, %c0_25] : memref<1x704x8xf32, #tpu.memory_space<vmem>>, vector<1x656x8xf32>
    %30 = vector.shape_cast %29 : vector<1x656x8xf32> to vector<656x8xf32>
    %c48 = arith.constant 48 : index
    %c0_26 = arith.constant 0 : index
    %31 = vector.load %arg2[%c48, %c0_26] : memref<72x16xf32, #tpu.memory_space<vmem>>, vector<8x16xf32>
    %cst_27 = arith.constant dense<0.000000e+00> : vector<656x16xf32>
    %32 = tpu.matmul %30, %31, %cst_27 {dimension_numbers = #tpu.dot_dimension_numbers<[1], [0], [0], [1], [0, 0, 1, 1], [], []>} : vector<656x8xf32>, vector<8x16xf32>, vector<656x16xf32> -> vector<656x16xf32>
    %33 = arith.addf %28, %32 : vector<656x16xf32>
    %c0_28 = arith.constant 0 : index
    %c37 = arith.constant 37 : index
    %c0_29 = arith.constant 0 : index
    %34 = vector.load %arg1[%c0_28, %c37, %c0_29] : memref<1x704x8xf32, #tpu.memory_space<vmem>>, vector<1x656x8xf32>
    %35 = vector.shape_cast %34 : vector<1x656x8xf32> to vector<656x8xf32>
    %c56 = arith.constant 56 : index
    %c0_30 = arith.constant 0 : index
    %36 = vector.load %arg2[%c56, %c0_30] : memref<72x16xf32, #tpu.memory_space<vmem>>, vector<8x16xf32>
    %cst_31 = arith.constant dense<0.000000e+00> : vector<656x16xf32>
    %37 = tpu.matmul %35, %36, %cst_31 {dimension_numbers = #tpu.dot_dimension_numbers<[1], [0], [0], [1], [0, 0, 1, 1], [], []>} : vector<656x8xf32>, vector<8x16xf32>, vector<656x16xf32> -> vector<656x16xf32>
    %38 = arith.addf %33, %37 : vector<656x16xf32>
    %c0_32 = arith.constant 0 : index
    %c38 = arith.constant 38 : index
    %c0_33 = arith.constant 0 : index
    %39 = vector.load %arg1[%c0_32, %c38, %c0_33] : memref<1x704x8xf32, #tpu.memory_space<vmem>>, vector<1x656x8xf32>
    %40 = vector.shape_cast %39 : vector<1x656x8xf32> to vector<656x8xf32>
    %c64 = arith.constant 64 : index
    %c0_34 = arith.constant 0 : index
    %41 = vector.load %arg2[%c64, %c0_34] : memref<72x16xf32, #tpu.memory_space<vmem>>, vector<8x16xf32>
    %cst_35 = arith.constant dense<0.000000e+00> : vector<656x16xf32>
    %42 = tpu.matmul %40, %41, %cst_35 {dimension_numbers = #tpu.dot_dimension_numbers<[1], [0], [0], [1], [0, 0, 1, 1], [], []>} : vector<656x8xf32>, vector<8x16xf32>, vector<656x16xf32> -> vector<656x16xf32>
    %43 = arith.addf %38, %42 : vector<656x16xf32>
    %c0_36 = arith.constant 0 : index
    %c0_37 = arith.constant 0 : index
    %44 = vector.load %arg3[%c0_36, %c0_37] : memref<1x16xf32, #tpu.memory_space<vmem>>, vector<1x16xf32>
    %45 = vector.broadcast %44 : vector<1x16xf32> to vector<656x16xf32>
    %46 = arith.addf %43, %45 : vector<656x16xf32>
    %cst_38 = arith.constant 0.000000e+00 : f32
    %47 = vector.broadcast %cst_38 : f32 to vector<656x16xf32>
    %48 = arith.maximumf %46, %47 : vector<656x16xf32>
    %c0_39 = arith.constant 0 : index
    %c0_40 = arith.constant 0 : index
    %49 = vector.load %arg7[%c0_39, %c0_40] : memref<656x16xf32, #tpu.memory_space<vmem>>, vector<656x16xf32>
    tpu.vector_store %arg7[%c0_39, %c0_40], %48 {strides = array<i32>} : memref<656x16xf32, #tpu.memory_space<vmem>>, vector<656x16xf32>,
    %cst_41 = arith.constant 0.000000e+00 : f32
    %50 = vector.broadcast %cst_41 : f32 to vector<232x16xf32>
    %c0_42 = arith.constant 0 : index
    %c0_43 = arith.constant 0 : index
    %51 = vector.load %arg8[%c0_42, %c0_43] : memref<232x16xf32, #tpu.memory_space<vmem>>, vector<232x16xf32>
    tpu.vector_store %arg8[%c0_42, %c0_43], %50 {strides = array<i32>} : memref<232x16xf32, #tpu.memory_space<vmem>>, vector<232x16xf32>,
    %c0_44 = arith.constant 0 : index
    %c0_45 = arith.constant 0 : index
    %52 = tpu.strided_load %arg7[%c0_44, %c0_45] {strides = array<i32: 2, 1>} : memref<656x16xf32, #tpu.memory_space<vmem>>, vector<8x16xf32>
    %c1_46 = arith.constant 1 : index
    %c0_47 = arith.constant 0 : index
    %53 = tpu.strided_load %arg7[%c1_46, %c0_47] {strides = array<i32: 2, 1>} : memref<656x16xf32, #tpu.memory_space<vmem>>, vector<8x16xf32>
    %54 = arith.maximumf %52, %53 : vector<8x16xf32>
    %c18_48 = arith.constant 18 : index
    %c0_49 = arith.constant 0 : index
    %55 = tpu.strided_load %arg7[%c18_48, %c0_49] {strides = array<i32: 2, 1>} : memref<656x16xf32, #tpu.memory_space<vmem>>, vector<8x16xf32>
    %56 = arith.maximumf %54, %55 : vector<8x16xf32>
    %c19_50 = arith.constant 19 : index
    %c0_51 = arith.constant 0 : index
    %57 = tpu.strided_load %arg7[%c19_50, %c0_51] {strides = array<i32: 2, 1>} : memref<656x16xf32, #tpu.memory_space<vmem>>, vector<8x16xf32>
    %58 = arith.maximumf %56, %57 : vector<8x16xf32>
    %c11 = arith.constant 11 : index
    %c0_52 = arith.constant 0 : index
    %59 = vector.load %arg8[%c11, %c0_52] : memref<232x16xf32, #tpu.memory_space<vmem>>, vector<8x16xf32>
    tpu.vector_store %arg8[%c11, %c0_52], %58 {strides = array<i32>} : memref<232x16xf32, #tpu.memory_space<vmem>>, vector<8x16xf32>,
    %c36_53 = arith.constant 36 : index
    %c0_54 = arith.constant 0 : index
    %60 = tpu.strided_load %arg7[%c36_53, %c0_54] {strides = array<i32: 2, 1>} : memref<656x16xf32, #tpu.memory_space<vmem>>, vector<8x16xf32>
    %c37_55 = arith.constant 37 : index
    %c0_56 = arith.constant 0 : index
    %61 = tpu.strided_load %arg7[%c37_55, %c0_56] {strides = array<i32: 2, 1>} : memref<656x16xf32, #tpu.memory_space<vmem>>, vector<8x16xf32>
    %62 = arith.maximumf %60, %61 : vector<8x16xf32>
    %c54 = arith.constant 54 : index
    %c0_57 = arith.constant 0 : index
    %63 = tpu.strided_load %arg7[%c54, %c0_57] {strides = array<i32: 2, 1>} : memref<656x16xf32, #tpu.memory_space<vmem>>, vector<8x16xf32>
    %64 = arith.maximumf %62, %63 : vector<8x16xf32>
    %c55 = arith.constant 55 : index
    %c0_58 = arith.constant 0 : index
    %65 = tpu.strided_load %arg7[%c55, %c0_58] {strides = array<i32: 2, 1>} : memref<656x16xf32, #tpu.memory_space<vmem>>, vector<8x16xf32>
    %66 = arith.maximumf %64, %65 : vector<8x16xf32>
    %c21 = arith.constant 21 : index
    %c0_59 = arith.constant 0 : index
    %67 = vector.load %arg8[%c21, %c0_59] : memref<232x16xf32, #tpu.memory_space<vmem>>, vector<8x16xf32>
    tpu.vector_store %arg8[%c21, %c0_59], %66 {strides = array<i32>} : memref<232x16xf32, #tpu.memory_space<vmem>>, vector<8x16xf32>,
    %c72 = arith.constant 72 : index
    %c0_60 = arith.constant 0 : index
    %68 = tpu.strided_load %arg7[%c72, %c0_60] {strides = array<i32: 2, 1>} : memref<656x16xf32, #tpu.memory_space<vmem>>, vector<8x16xf32>
    %c73 = arith.constant 73 : index
    %c0_61 = arith.constant 0 : index
    %69 = tpu.strided_load %arg7[%c73, %c0_61] {strides = array<i32: 2, 1>} : memref<656x16xf32, #tpu.memory_space<vmem>>, vector<8x16xf32>
    %70 = arith.maximumf %68, %69 : vector<8x16xf32>
    %c90 = arith.constant 90 : index
    %c0_62 = arith.constant 0 : index
    %71 = tpu.strided_load %arg7[%c90, %c0_62] {strides = array<i32: 2, 1>} : memref<656x16xf32, #tpu.memory_space<vmem>>, vector<8x16xf32>
    %72 = arith.maximumf %70, %71 : vector<8x16xf32>
    %c91 = arith.constant 91 : index
    %c0_63 = arith.constant 0 : index
    %73 = tpu.strided_load %arg7[%c91, %c0_63] {strides = array<i32: 2, 1>} : memref<656x16xf32, #tpu.memory_space<vmem>>, vector<8x16xf32>
    %74 = arith.maximumf %72, %73 : vector<8x16xf32>
    %c31 = arith.constant 31 : index
    %c0_64 = arith.constant 0 : index
    %75 = vector.load %arg8[%c31, %c0_64] : memref<232x16xf32, #tpu.memory_space<vmem>>, vector<8x16xf32>
    tpu.vector_store %arg8[%c31, %c0_64], %74 {strides = array<i32>} : memref<232x16xf32, #tpu.memory_space<vmem>>, vector<8x16xf32>,
    %c108 = arith.constant 108 : index
    %c0_65 = arith.constant 0 : index
    %76 = tpu.strided_load %arg7[%c108, %c0_65] {strides = array<i32: 2, 1>} : memref<656x16xf32, #tpu.memory_space<vmem>>, vector<8x16xf32>
    %c109 = arith.constant 109 : index
    %c0_66 = arith.constant 0 : index
    %77 = tpu.strided_load %arg7[%c109, %c0_66] {strides = array<i32: 2, 1>} : memref<656x16xf32, #tpu.memory_space<vmem>>, vector<8x16xf32>
    %78 = arith.maximumf %76, %77 : vector<8x16xf32>
    %c126 = arith.constant 126 : index
    %c0_67 = arith.constant 0 : index
    %79 = tpu.strided_load %arg7[%c126, %c0_67] {strides = array<i32: 2, 1>} : memref<656x16xf32, #tpu.memory_space<vmem>>, vector<8x16xf32>
    %80 = arith.maximumf %78, %79 : vector<8x16xf32>
    %c127 = arith.constant 127 : index
    %c0_68 = arith.constant 0 : index
    %81 = tpu.strided_load %arg7[%c127, %c0_68] {strides = array<i32: 2, 1>} : memref<656x16xf32, #tpu.memory_space<vmem>>, vector<8x16xf32>
    %82 = arith.maximumf %80, %81 : vector<8x16xf32>
    %c41 = arith.constant 41 : index
    %c0_69 = arith.constant 0 : index
    %83 = vector.load %arg8[%c41, %c0_69] : memref<232x16xf32, #tpu.memory_space<vmem>>, vector<8x16xf32>
    tpu.vector_store %arg8[%c41, %c0_69], %82 {strides = array<i32>} : memref<232x16xf32, #tpu.memory_space<vmem>>, vector<8x16xf32>,
    %c144 = arith.constant 144 : index
    %c0_70 = arith.constant 0 : index
    %84 = tpu.strided_load %arg7[%c144, %c0_70] {strides = array<i32: 2, 1>} : memref<656x16xf32, #tpu.memory_space<vmem>>, vector<8x16xf32>
    %c145 = arith.constant 145 : index
    %c0_71 = arith.constant 0 : index
    %85 = tpu.strided_load %arg7[%c145, %c0_71] {strides = array<i32: 2, 1>} : memref<656x16xf32, #tpu.memory_space<vmem>>, vector<8x16xf32>
    %86 = arith.maximumf %84, %85 : vector<8x16xf32>
    %c162 = arith.constant 162 : index
    %c0_72 = arith.constant 0 : index
    %87 = tpu.strided_load %arg7[%c162, %c0_72] {strides = array<i32: 2, 1>} : memref<656x16xf32, #tpu.memory_space<vmem>>, vector<8x16xf32>
    %88 = arith.maximumf %86, %87 : vector<8x16xf32>
    %c163 = arith.constant 163 : index
    %c0_73 = arith.constant 0 : index
    %89 = tpu.strided_load %arg7[%c163, %c0_73] {strides = array<i32: 2, 1>} : memref<656x16xf32, #tpu.memory_space<vmem>>, vector<8x16xf32>
    %90 = arith.maximumf %88, %89 : vector<8x16xf32>
    %c51 = arith.constant 51 : index
    %c0_74 = arith.constant 0 : index
    %91 = vector.load %arg8[%c51, %c0_74] : memref<232x16xf32, #tpu.memory_space<vmem>>, vector<8x16xf32>
    tpu.vector_store %arg8[%c51, %c0_74], %90 {strides = array<i32>} : memref<232x16xf32, #tpu.memory_space<vmem>>, vector<8x16xf32>,
    %c180 = arith.constant 180 : index
    %c0_75 = arith.constant 0 : index
    %92 = tpu.strided_load %arg7[%c180, %c0_75] {strides = array<i32: 2, 1>} : memref<656x16xf32, #tpu.memory_space<vmem>>, vector<8x16xf32>
    %c181 = arith.constant 181 : index
    %c0_76 = arith.constant 0 : index
    %93 = tpu.strided_load %arg7[%c181, %c0_76] {strides = array<i32: 2, 1>} : memref<656x16xf32, #tpu.memory_space<vmem>>, vector<8x16xf32>
    %94 = arith.maximumf %92, %93 : vector<8x16xf32>
    %c198 = arith.constant 198 : index
    %c0_77 = arith.constant 0 : index
    %95 = tpu.strided_load %arg7[%c198, %c0_77] {strides = array<i32: 2, 1>} : memref<656x16xf32, #tpu.memory_space<vmem>>, vector<8x16xf32>
    %96 = arith.maximumf %94, %95 : vector<8x16xf32>
    %c199 = arith.constant 199 : index
    %c0_78 = arith.constant 0 : index
    %97 = tpu.strided_load %arg7[%c199, %c0_78] {strides = array<i32: 2, 1>} : memref<656x16xf32, #tpu.memory_space<vmem>>, vector<8x16xf32>
    %98 = arith.maximumf %96, %97 : vector<8x16xf32>
    %c61 = arith.constant 61 : index
    %c0_79 = arith.constant 0 : index
    %99 = vector.load %arg8[%c61, %c0_79] : memref<232x16xf32, #tpu.memory_space<vmem>>, vector<8x16xf32>
    tpu.vector_store %arg8[%c61, %c0_79], %98 {strides = array<i32>} : memref<232x16xf32, #tpu.memory_space<vmem>>, vector<8x16xf32>,
    %c216 = arith.constant 216 : index
    %c0_80 = arith.constant 0 : index
    %100 = tpu.strided_load %arg7[%c216, %c0_80] {strides = array<i32: 2, 1>} : memref<656x16xf32, #tpu.memory_space<vmem>>, vector<8x16xf32>
    %c217 = arith.constant 217 : index
    %c0_81 = arith.constant 0 : index
    %101 = tpu.strided_load %arg7[%c217, %c0_81] {strides = array<i32: 2, 1>} : memref<656x16xf32, #tpu.memory_space<vmem>>, vector<8x16xf32>
    %102 = arith.maximumf %100, %101 : vector<8x16xf32>
    %c234 = arith.constant 234 : index
    %c0_82 = arith.constant 0 : index
    %103 = tpu.strided_load %arg7[%c234, %c0_82] {strides = array<i32: 2, 1>} : memref<656x16xf32, #tpu.memory_space<vmem>>, vector<8x16xf32>
    %104 = arith.maximumf %102, %103 : vector<8x16xf32>
    %c235 = arith.constant 235 : index
    %c0_83 = arith.constant 0 : index
    %105 = tpu.strided_load %arg7[%c235, %c0_83] {strides = array<i32: 2, 1>} : memref<656x16xf32, #tpu.memory_space<vmem>>, vector<8x16xf32>
    %106 = arith.maximumf %104, %105 : vector<8x16xf32>
    %c71 = arith.constant 71 : index
    %c0_84 = arith.constant 0 : index
    %107 = vector.load %arg8[%c71, %c0_84] : memref<232x16xf32, #tpu.memory_space<vmem>>, vector<8x16xf32>
    tpu.vector_store %arg8[%c71, %c0_84], %106 {strides = array<i32>} : memref<232x16xf32, #tpu.memory_space<vmem>>, vector<8x16xf32>,
    %c252 = arith.constant 252 : index
    %c0_85 = arith.constant 0 : index
    %108 = tpu.strided_load %arg7[%c252, %c0_85] {strides = array<i32: 2, 1>} : memref<656x16xf32, #tpu.memory_space<vmem>>, vector<8x16xf32>
    %c253 = arith.constant 253 : index
    %c0_86 = arith.constant 0 : index
    %109 = tpu.strided_load %arg7[%c253, %c0_86] {strides = array<i32: 2, 1>} : memref<656x16xf32, #tpu.memory_space<vmem>>, vector<8x16xf32>
    %110 = arith.maximumf %108, %109 : vector<8x16xf32>
    %c270 = arith.constant 270 : index
    %c0_87 = arith.constant 0 : index
    %111 = tpu.strided_load %arg7[%c270, %c0_87] {strides = array<i32: 2, 1>} : memref<656x16xf32, #tpu.memory_space<vmem>>, vector<8x16xf32>
    %112 = arith.maximumf %110, %111 : vector<8x16xf32>
    %c271 = arith.constant 271 : index
    %c0_88 = arith.constant 0 : index
    %113 = tpu.strided_load %arg7[%c271, %c0_88] {strides = array<i32: 2, 1>} : memref<656x16xf32, #tpu.memory_space<vmem>>, vector<8x16xf32>
    %114 = arith.maximumf %112, %113 : vector<8x16xf32>
    %c81 = arith.constant 81 : index
    %c0_89 = arith.constant 0 : index
    %115 = vector.load %arg8[%c81, %c0_89] : memref<232x16xf32, #tpu.memory_space<vmem>>, vector<8x16xf32>
    tpu.vector_store %arg8[%c81, %c0_89], %114 {strides = array<i32>} : memref<232x16xf32, #tpu.memory_space<vmem>>, vector<8x16xf32>,
    %c328 = arith.constant 328 : index
    %c0_90 = arith.constant 0 : index
    %116 = tpu.strided_load %arg7[%c328, %c0_90] {strides = array<i32: 2, 1>} : memref<656x16xf32, #tpu.memory_space<vmem>>, vector<8x16xf32>
    %c329 = arith.constant 329 : index
    %c0_91 = arith.constant 0 : index
    %117 = tpu.strided_load %arg7[%c329, %c0_91] {strides = array<i32: 2, 1>} : memref<656x16xf32, #tpu.memory_space<vmem>>, vector<8x16xf32>
    %118 = arith.maximumf %116, %117 : vector<8x16xf32>
    %c346 = arith.constant 346 : index
    %c0_92 = arith.constant 0 : index
    %119 = tpu.strided_load %arg7[%c346, %c0_92] {strides = array<i32: 2, 1>} : memref<656x16xf32, #tpu.memory_space<vmem>>, vector<8x16xf32>
    %120 = arith.maximumf %118, %119 : vector<8x16xf32>
    %c347 = arith.constant 347 : index
    %c0_93 = arith.constant 0 : index
    %121 = tpu.strided_load %arg7[%c347, %c0_93] {strides = array<i32: 2, 1>} : memref<656x16xf32, #tpu.memory_space<vmem>>, vector<8x16xf32>
    %122 = arith.maximumf %120, %121 : vector<8x16xf32>
    %c115 = arith.constant 115 : index
    %c0_94 = arith.constant 0 : index
    %123 = vector.load %arg8[%c115, %c0_94] : memref<232x16xf32, #tpu.memory_space<vmem>>, vector<8x16xf32>
    tpu.vector_store %arg8[%c115, %c0_94], %122 {strides = array<i32>} : memref<232x16xf32, #tpu.memory_space<vmem>>, vector<8x16xf32>,
    %c364 = arith.constant 364 : index
    %c0_95 = arith.constant 0 : index
    %124 = tpu.strided_load %arg7[%c364, %c0_95] {strides = array<i32: 2, 1>} : memref<656x16xf32, #tpu.memory_space<vmem>>, vector<8x16xf32>
    %c365 = arith.constant 365 : index
    %c0_96 = arith.constant 0 : index
    %125 = tpu.strided_load %arg7[%c365, %c0_96] {strides = array<i32: 2, 1>} : memref<656x16xf32, #tpu.memory_space<vmem>>, vector<8x16xf32>
    %126 = arith.maximumf %124, %125 : vector<8x16xf32>
    %c382 = arith.constant 382 : index
    %c0_97 = arith.constant 0 : index
    %127 = tpu.strided_load %arg7[%c382, %c0_97] {strides = array<i32: 2, 1>} : memref<656x16xf32, #tpu.memory_space<vmem>>, vector<8x16xf32>
    %128 = arith.maximumf %126, %127 : vector<8x16xf32>
    %c383 = arith.constant 383 : index
    %c0_98 = arith.constant 0 : index
    %129 = tpu.strided_load %arg7[%c383, %c0_98] {strides = array<i32: 2, 1>} : memref<656x16xf32, #tpu.memory_space<vmem>>, vector<8x16xf32>
    %130 = arith.maximumf %128, %129 : vector<8x16xf32>
    %c125 = arith.constant 125 : index
    %c0_99 = arith.constant 0 : index
    %131 = vector.load %arg8[%c125, %c0_99] : memref<232x16xf32, #tpu.memory_space<vmem>>, vector<8x16xf32>
    tpu.vector_store %arg8[%c125, %c0_99], %130 {strides = array<i32>} : memref<232x16xf32, #tpu.memory_space<vmem>>, vector<8x16xf32>,
    %c400 = arith.constant 400 : index
    %c0_100 = arith.constant 0 : index
    %132 = tpu.strided_load %arg7[%c400, %c0_100] {strides = array<i32: 2, 1>} : memref<656x16xf32, #tpu.memory_space<vmem>>, vector<8x16xf32>
    %c401 = arith.constant 401 : index
    %c0_101 = arith.constant 0 : index
    %133 = tpu.strided_load %arg7[%c401, %c0_101] {strides = array<i32: 2, 1>} : memref<656x16xf32, #tpu.memory_space<vmem>>, vector<8x16xf32>
    %134 = arith.maximumf %132, %133 : vector<8x16xf32>
    %c418 = arith.constant 418 : index
    %c0_102 = arith.constant 0 : index
    %135 = tpu.strided_load %arg7[%c418, %c0_102] {strides = array<i32: 2, 1>} : memref<656x16xf32, #tpu.memory_space<vmem>>, vector<8x16xf32>
    %136 = arith.maximumf %134, %135 : vector<8x16xf32>
    %c419 = arith.constant 419 : index
    %c0_103 = arith.constant 0 : index
    %137 = tpu.strided_load %arg7[%c419, %c0_103] {strides = array<i32: 2, 1>} : memref<656x16xf32, #tpu.memory_space<vmem>>, vector<8x16xf32>
    %138 = arith.maximumf %136, %137 : vector<8x16xf32>
    %c135 = arith.constant 135 : index
    %c0_104 = arith.constant 0 : index
    %139 = vector.load %arg8[%c135, %c0_104] : memref<232x16xf32, #tpu.memory_space<vmem>>, vector<8x16xf32>
    tpu.vector_store %arg8[%c135, %c0_104], %138 {strides = array<i32>} : memref<232x16xf32, #tpu.memory_space<vmem>>, vector<8x16xf32>,
    %c436 = arith.constant 436 : index
    %c0_105 = arith.constant 0 : index
    %140 = tpu.strided_load %arg7[%c436, %c0_105] {strides = array<i32: 2, 1>} : memref<656x16xf32, #tpu.memory_space<vmem>>, vector<8x16xf32>
    %c437 = arith.constant 437 : index
    %c0_106 = arith.constant 0 : index
    %141 = tpu.strided_load %arg7[%c437, %c0_106] {strides = array<i32: 2, 1>} : memref<656x16xf32, #tpu.memory_space<vmem>>, vector<8x16xf32>
    %142 = arith.maximumf %140, %141 : vector<8x16xf32>
    %c454 = arith.constant 454 : index
    %c0_107 = arith.constant 0 : index
    %143 = tpu.strided_load %arg7[%c454, %c0_107] {strides = array<i32: 2, 1>} : memref<656x16xf32, #tpu.memory_space<vmem>>, vector<8x16xf32>
    %144 = arith.maximumf %142, %143 : vector<8x16xf32>
    %c455 = arith.constant 455 : index
    %c0_108 = arith.constant 0 : index
    %145 = tpu.strided_load %arg7[%c455, %c0_108] {strides = array<i32: 2, 1>} : memref<656x16xf32, #tpu.memory_space<vmem>>, vector<8x16xf32>
    %146 = arith.maximumf %144, %145 : vector<8x16xf32>
    %c145_109 = arith.constant 145 : index
    %c0_110 = arith.constant 0 : index
    %147 = vector.load %arg8[%c145_109, %c0_110] : memref<232x16xf32, #tpu.memory_space<vmem>>, vector<8x16xf32>
    tpu.vector_store %arg8[%c145_109, %c0_110], %146 {strides = array<i32>} : memref<232x16xf32, #tpu.memory_space<vmem>>, vector<8x16xf32>,
    %c472 = arith.constant 472 : index
    %c0_111 = arith.constant 0 : index
    %148 = tpu.strided_load %arg7[%c472, %c0_111] {strides = array<i32: 2, 1>} : memref<656x16xf32, #tpu.memory_space<vmem>>, vector<8x16xf32>
    %c473 = arith.constant 473 : index
    %c0_112 = arith.constant 0 : index
    %149 = tpu.strided_load %arg7[%c473, %c0_112] {strides = array<i32: 2, 1>} : memref<656x16xf32, #tpu.memory_space<vmem>>, vector<8x16xf32>
    %150 = arith.maximumf %148, %149 : vector<8x16xf32>
    %c490 = arith.constant 490 : index
    %c0_113 = arith.constant 0 : index
    %151 = tpu.strided_load %arg7[%c490, %c0_113] {strides = array<i32: 2, 1>} : memref<656x16xf32, #tpu.memory_space<vmem>>, vector<8x16xf32>
    %152 = arith.maximumf %150, %151 : vector<8x16xf32>
    %c491 = arith.constant 491 : index
    %c0_114 = arith.constant 0 : index
    %153 = tpu.strided_load %arg7[%c491, %c0_114] {strides = array<i32: 2, 1>} : memref<656x16xf32, #tpu.memory_space<vmem>>, vector<8x16xf32>
    %154 = arith.maximumf %152, %153 : vector<8x16xf32>
    %c155 = arith.constant 155 : index
    %c0_115 = arith.constant 0 : index
    %155 = vector.load %arg8[%c155, %c0_115] : memref<232x16xf32, #tpu.memory_space<vmem>>, vector<8x16xf32>
    tpu.vector_store %arg8[%c155, %c0_115], %154 {strides = array<i32>} : memref<232x16xf32, #tpu.memory_space<vmem>>, vector<8x16xf32>,
    %c508 = arith.constant 508 : index
    %c0_116 = arith.constant 0 : index
    %156 = tpu.strided_load %arg7[%c508, %c0_116] {strides = array<i32: 2, 1>} : memref<656x16xf32, #tpu.memory_space<vmem>>, vector<8x16xf32>
    %c509 = arith.constant 509 : index
    %c0_117 = arith.constant 0 : index
    %157 = tpu.strided_load %arg7[%c509, %c0_117] {strides = array<i32: 2, 1>} : memref<656x16xf32, #tpu.memory_space<vmem>>, vector<8x16xf32>
    %158 = arith.maximumf %156, %157 : vector<8x16xf32>
    %c526 = arith.constant 526 : index
    %c0_118 = arith.constant 0 : index
    %159 = tpu.strided_load %arg7[%c526, %c0_118] {strides = array<i32: 2, 1>} : memref<656x16xf32, #tpu.memory_space<vmem>>, vector<8x16xf32>
    %160 = arith.maximumf %158, %159 : vector<8x16xf32>
    %c527 = arith.constant 527 : index
    %c0_119 = arith.constant 0 : index
    %161 = tpu.strided_load %arg7[%c527, %c0_119] {strides = array<i32: 2, 1>} : memref<656x16xf32, #tpu.memory_space<vmem>>, vector<8x16xf32>
    %162 = arith.maximumf %160, %161 : vector<8x16xf32>
    %c165 = arith.constant 165 : index
    %c0_120 = arith.constant 0 : index
    %163 = vector.load %arg8[%c165, %c0_120] : memref<232x16xf32, #tpu.memory_space<vmem>>, vector<8x16xf32>
    tpu.vector_store %arg8[%c165, %c0_120], %162 {strides = array<i32>} : memref<232x16xf32, #tpu.memory_space<vmem>>, vector<8x16xf32>,
    %c544 = arith.constant 544 : index
    %c0_121 = arith.constant 0 : index
    %164 = tpu.strided_load %arg7[%c544, %c0_121] {strides = array<i32: 2, 1>} : memref<656x16xf32, #tpu.memory_space<vmem>>, vector<8x16xf32>
    %c545 = arith.constant 545 : index
    %c0_122 = arith.constant 0 : index
    %165 = tpu.strided_load %arg7[%c545, %c0_122] {strides = array<i32: 2, 1>} : memref<656x16xf32, #tpu.memory_space<vmem>>, vector<8x16xf32>
    %166 = arith.maximumf %164, %165 : vector<8x16xf32>
    %c562 = arith.constant 562 : index
    %c0_123 = arith.constant 0 : index
    %167 = tpu.strided_load %arg7[%c562, %c0_123] {strides = array<i32: 2, 1>} : memref<656x16xf32, #tpu.memory_space<vmem>>, vector<8x16xf32>
    %168 = arith.maximumf %166, %167 : vector<8x16xf32>
    %c563 = arith.constant 563 : index
    %c0_124 = arith.constant 0 : index
    %169 = tpu.strided_load %arg7[%c563, %c0_124] {strides = array<i32: 2, 1>} : memref<656x16xf32, #tpu.memory_space<vmem>>, vector<8x16xf32>
    %170 = arith.maximumf %168, %169 : vector<8x16xf32>
    %c175 = arith.constant 175 : index
    %c0_125 = arith.constant 0 : index
    %171 = vector.load %arg8[%c175, %c0_125] : memref<232x16xf32, #tpu.memory_space<vmem>>, vector<8x16xf32>
    tpu.vector_store %arg8[%c175, %c0_125], %170 {strides = array<i32>} : memref<232x16xf32, #tpu.memory_space<vmem>>, vector<8x16xf32>,
    %c580 = arith.constant 580 : index
    %c0_126 = arith.constant 0 : index
    %172 = tpu.strided_load %arg7[%c580, %c0_126] {strides = array<i32: 2, 1>} : memref<656x16xf32, #tpu.memory_space<vmem>>, vector<8x16xf32>
    %c581 = arith.constant 581 : index
    %c0_127 = arith.constant 0 : index
    %173 = tpu.strided_load %arg7[%c581, %c0_127] {strides = array<i32: 2, 1>} : memref<656x16xf32, #tpu.memory_space<vmem>>, vector<8x16xf32>
    %174 = arith.maximumf %172, %173 : vector<8x16xf32>
    %c598 = arith.constant 598 : index
    %c0_128 = arith.constant 0 : index
    %175 = tpu.strided_load %arg7[%c598, %c0_128] {strides = array<i32: 2, 1>} : memref<656x16xf32, #tpu.memory_space<vmem>>, vector<8x16xf32>
    %176 = arith.maximumf %174, %175 : vector<8x16xf32>
    %c599 = arith.constant 599 : index
    %c0_129 = arith.constant 0 : index
    %177 = tpu.strided_load %arg7[%c599, %c0_129] {strides = array<i32: 2, 1>} : memref<656x16xf32, #tpu.memory_space<vmem>>, vector<8x16xf32>
    %178 = arith.maximumf %176, %177 : vector<8x16xf32>
    %c185 = arith.constant 185 : index
    %c0_130 = arith.constant 0 : index
    %179 = vector.load %arg8[%c185, %c0_130] : memref<232x16xf32, #tpu.memory_space<vmem>>, vector<8x16xf32>
    tpu.vector_store %arg8[%c185, %c0_130], %178 {strides = array<i32>} : memref<232x16xf32, #tpu.memory_space<vmem>>, vector<8x16xf32>,
    %c0_131 = arith.constant 0 : index
    %c0_132 = arith.constant 0 : index
    %180 = vector.load %arg8[%c0_131, %c0_132] : memref<232x16xf32, #tpu.memory_space<vmem>>, vector<208x16xf32>
    %c0_133 = arith.constant 0 : index
    %c0_134 = arith.constant 0 : index
    %181 = vector.load %arg4[%c0_133, %c0_134] : memref<144x32xf32, #tpu.memory_space<vmem>>, vector<16x32xf32>
    %cst_135 = arith.constant dense<0.000000e+00> : vector<208x32xf32>
    %182 = tpu.matmul %180, %181, %cst_135 {dimension_numbers = #tpu.dot_dimension_numbers<[1], [0], [0], [1], [0, 0, 1, 1], [], []>} : vector<208x16xf32>, vector<16x32xf32>, vector<208x32xf32> -> vector<208x32xf32>
    %c1_136 = arith.constant 1 : index
    %c0_137 = arith.constant 0 : index
    %183 = vector.load %arg8[%c1_136, %c0_137] : memref<232x16xf32, #tpu.memory_space<vmem>>, vector<208x16xf32>
    %c16_138 = arith.constant 16 : index
    %c0_139 = arith.constant 0 : index
    %184 = vector.load %arg4[%c16_138, %c0_139] : memref<144x32xf32, #tpu.memory_space<vmem>>, vector<16x32xf32>
    %cst_140 = arith.constant dense<0.000000e+00> : vector<208x32xf32>
    %185 = tpu.matmul %183, %184, %cst_140 {dimension_numbers = #tpu.dot_dimension_numbers<[1], [0], [0], [1], [0, 0, 1, 1], [], []>} : vector<208x16xf32>, vector<16x32xf32>, vector<208x32xf32> -> vector<208x32xf32>
    %186 = arith.addf %182, %185 : vector<208x32xf32>
    %c2_141 = arith.constant 2 : index
    %c0_142 = arith.constant 0 : index
    %187 = vector.load %arg8[%c2_141, %c0_142] : memref<232x16xf32, #tpu.memory_space<vmem>>, vector<208x16xf32>
    %c32_143 = arith.constant 32 : index
    %c0_144 = arith.constant 0 : index
    %188 = vector.load %arg4[%c32_143, %c0_144] : memref<144x32xf32, #tpu.memory_space<vmem>>, vector<16x32xf32>
    %cst_145 = arith.constant dense<0.000000e+00> : vector<208x32xf32>
    %189 = tpu.matmul %187, %188, %cst_145 {dimension_numbers = #tpu.dot_dimension_numbers<[1], [0], [0], [1], [0, 0, 1, 1], [], []>} : vector<208x16xf32>, vector<16x32xf32>, vector<208x32xf32> -> vector<208x32xf32>
    %190 = arith.addf %186, %189 : vector<208x32xf32>
    %c10 = arith.constant 10 : index
    %c0_146 = arith.constant 0 : index
    %191 = vector.load %arg8[%c10, %c0_146] : memref<232x16xf32, #tpu.memory_space<vmem>>, vector<208x16xf32>
    %c48_147 = arith.constant 48 : index
    %c0_148 = arith.constant 0 : index
    %192 = vector.load %arg4[%c48_147, %c0_148] : memref<144x32xf32, #tpu.memory_space<vmem>>, vector<16x32xf32>
    %cst_149 = arith.constant dense<0.000000e+00> : vector<208x32xf32>
    %193 = tpu.matmul %191, %192, %cst_149 {dimension_numbers = #tpu.dot_dimension_numbers<[1], [0], [0], [1], [0, 0, 1, 1], [], []>} : vector<208x16xf32>, vector<16x32xf32>, vector<208x32xf32> -> vector<208x32xf32>
    %194 = arith.addf %190, %193 : vector<208x32xf32>
    %c11_150 = arith.constant 11 : index
    %c0_151 = arith.constant 0 : index
    %195 = vector.load %arg8[%c11_150, %c0_151] : memref<232x16xf32, #tpu.memory_space<vmem>>, vector<208x16xf32>
    %c64_152 = arith.constant 64 : index
    %c0_153 = arith.constant 0 : index
    %196 = vector.load %arg4[%c64_152, %c0_153] : memref<144x32xf32, #tpu.memory_space<vmem>>, vector<16x32xf32>
    %cst_154 = arith.constant dense<0.000000e+00> : vector<208x32xf32>
    %197 = tpu.matmul %195, %196, %cst_154 {dimension_numbers = #tpu.dot_dimension_numbers<[1], [0], [0], [1], [0, 0, 1, 1], [], []>} : vector<208x16xf32>, vector<16x32xf32>, vector<208x32xf32> -> vector<208x32xf32>
    %198 = arith.addf %194, %197 : vector<208x32xf32>
    %c12 = arith.constant 12 : index
    %c0_155 = arith.constant 0 : index
    %199 = vector.load %arg8[%c12, %c0_155] : memref<232x16xf32, #tpu.memory_space<vmem>>, vector<208x16xf32>
    %c80 = arith.constant 80 : index
    %c0_156 = arith.constant 0 : index
    %200 = vector.load %arg4[%c80, %c0_156] : memref<144x32xf32, #tpu.memory_space<vmem>>, vector<16x32xf32>
    %cst_157 = arith.constant dense<0.000000e+00> : vector<208x32xf32>
    %201 = tpu.matmul %199, %200, %cst_157 {dimension_numbers = #tpu.dot_dimension_numbers<[1], [0], [0], [1], [0, 0, 1, 1], [], []>} : vector<208x16xf32>, vector<16x32xf32>, vector<208x32xf32> -> vector<208x32xf32>
    %202 = arith.addf %198, %201 : vector<208x32xf32>
    %c20_158 = arith.constant 20 : index
    %c0_159 = arith.constant 0 : index
    %203 = vector.load %arg8[%c20_158, %c0_159] : memref<232x16xf32, #tpu.memory_space<vmem>>, vector<208x16xf32>
    %c96 = arith.constant 96 : index
    %c0_160 = arith.constant 0 : index
    %204 = vector.load %arg4[%c96, %c0_160] : memref<144x32xf32, #tpu.memory_space<vmem>>, vector<16x32xf32>
    %cst_161 = arith.constant dense<0.000000e+00> : vector<208x32xf32>
    %205 = tpu.matmul %203, %204, %cst_161 {dimension_numbers = #tpu.dot_dimension_numbers<[1], [0], [0], [1], [0, 0, 1, 1], [], []>} : vector<208x16xf32>, vector<16x32xf32>, vector<208x32xf32> -> vector<208x32xf32>
    %206 = arith.addf %202, %205 : vector<208x32xf32>
    %c21_162 = arith.constant 21 : index
    %c0_163 = arith.constant 0 : index
    %207 = vector.load %arg8[%c21_162, %c0_163] : memref<232x16xf32, #tpu.memory_space<vmem>>, vector<208x16xf32>
    %c112 = arith.constant 112 : index
    %c0_164 = arith.constant 0 : index
    %208 = vector.load %arg4[%c112, %c0_164] : memref<144x32xf32, #tpu.memory_space<vmem>>, vector<16x32xf32>
    %cst_165 = arith.constant dense<0.000000e+00> : vector<208x32xf32>
    %209 = tpu.matmul %207, %208, %cst_165 {dimension_numbers = #tpu.dot_dimension_numbers<[1], [0], [0], [1], [0, 0, 1, 1], [], []>} : vector<208x16xf32>, vector<16x32xf32>, vector<208x32xf32> -> vector<208x32xf32>
    %210 = arith.addf %206, %209 : vector<208x32xf32>
    %c22 = arith.constant 22 : index
    %c0_166 = arith.constant 0 : index
    %211 = vector.load %arg8[%c22, %c0_166] : memref<232x16xf32, #tpu.memory_space<vmem>>, vector<208x16xf32>
    %c128 = arith.constant 128 : index
    %c0_167 = arith.constant 0 : index
    %212 = vector.load %arg4[%c128, %c0_167] : memref<144x32xf32, #tpu.memory_space<vmem>>, vector<16x32xf32>
    %cst_168 = arith.constant dense<0.000000e+00> : vector<208x32xf32>
    %213 = tpu.matmul %211, %212, %cst_168 {dimension_numbers = #tpu.dot_dimension_numbers<[1], [0], [0], [1], [0, 0, 1, 1], [], []>} : vector<208x16xf32>, vector<16x32xf32>, vector<208x32xf32> -> vector<208x32xf32>
    %214 = arith.addf %210, %213 : vector<208x32xf32>
    %c0_169 = arith.constant 0 : index
    %c0_170 = arith.constant 0 : index
    %215 = vector.load %arg5[%c0_169, %c0_170] : memref<1x32xf32, #tpu.memory_space<vmem>>, vector<1x32xf32>
    %216 = vector.broadcast %215 : vector<1x32xf32> to vector<208x32xf32>
    %217 = arith.addf %214, %216 : vector<208x32xf32>
    %cst_171 = arith.constant 0.000000e+00 : f32
    %218 = vector.broadcast %cst_171 : f32 to vector<208x32xf32>
    %219 = arith.maximumf %217, %218 : vector<208x32xf32>
    %c0_172 = arith.constant 0 : index
    %c0_173 = arith.constant 0 : index
    %220 = vector.load %arg9[%c0_172, %c0_173] : memref<208x32xf32, #tpu.memory_space<vmem>>, vector<208x32xf32>
    tpu.vector_store %arg9[%c0_172, %c0_173], %219 {strides = array<i32>} : memref<208x32xf32, #tpu.memory_space<vmem>>, vector<208x32xf32>,
    %c0_174 = arith.constant 0 : index
    %c0_175 = arith.constant 0 : index
    %221 = tpu.strided_load %arg9[%c0_174, %c0_175] {strides = array<i32: 2, 1>} : memref<208x32xf32, #tpu.memory_space<vmem>>, vector<4x32xf32>
    %c1_176 = arith.constant 1 : index
    %c0_177 = arith.constant 0 : index
    %222 = tpu.strided_load %arg9[%c1_176, %c0_177] {strides = array<i32: 2, 1>} : memref<208x32xf32, #tpu.memory_space<vmem>>, vector<4x32xf32>
    %223 = arith.maximumf %221, %222 : vector<4x32xf32>
    %c10_178 = arith.constant 10 : index
    %c0_179 = arith.constant 0 : index
    %224 = tpu.strided_load %arg9[%c10_178, %c0_179] {strides = array<i32: 2, 1>} : memref<208x32xf32, #tpu.memory_space<vmem>>, vector<4x32xf32>
    %225 = arith.maximumf %223, %224 : vector<4x32xf32>
    %c11_180 = arith.constant 11 : index
    %c0_181 = arith.constant 0 : index
    %226 = tpu.strided_load %arg9[%c11_180, %c0_181] {strides = array<i32: 2, 1>} : memref<208x32xf32, #tpu.memory_space<vmem>>, vector<4x32xf32>
    %227 = arith.maximumf %225, %226 : vector<4x32xf32>
    %c0_182 = arith.constant 0 : index
    %c0_183 = arith.constant 0 : index
    %c0_184 = arith.constant 0 : index
    %228 = vector.load %arg6[%c0_182, %c0_183, %c0_184] : memref<1x32x32xf32, #tpu.memory_space<vmem>>, vector<1x4x32xf32>
    %229 = vector.shape_cast %228 : vector<1x4x32xf32> to vector<4x32xf32>
    %230 = vector.shape_cast %227 : vector<4x32xf32> to vector<1x4x32xf32>
    tpu.vector_store %arg6[%c0_182, %c0_183, %c0_184], %230 {strides = array<i32>} : memref<1x32x32xf32, #tpu.memory_space<vmem>>, vector<1x4x32xf32>,
    %c20_185 = arith.constant 20 : index
    %c0_186 = arith.constant 0 : index
    %231 = tpu.strided_load %arg9[%c20_185, %c0_186] {strides = array<i32: 2, 1>} : memref<208x32xf32, #tpu.memory_space<vmem>>, vector<4x32xf32>
    %c21_187 = arith.constant 21 : index
    %c0_188 = arith.constant 0 : index
    %232 = tpu.strided_load %arg9[%c21_187, %c0_188] {strides = array<i32: 2, 1>} : memref<208x32xf32, #tpu.memory_space<vmem>>, vector<4x32xf32>
    %233 = arith.maximumf %231, %232 : vector<4x32xf32>
    %c30 = arith.constant 30 : index
    %c0_189 = arith.constant 0 : index
    %234 = tpu.strided_load %arg9[%c30, %c0_189] {strides = array<i32: 2, 1>} : memref<208x32xf32, #tpu.memory_space<vmem>>, vector<4x32xf32>
    %235 = arith.maximumf %233, %234 : vector<4x32xf32>
    %c31_190 = arith.constant 31 : index
    %c0_191 = arith.constant 0 : index
    %236 = tpu.strided_load %arg9[%c31_190, %c0_191] {strides = array<i32: 2, 1>} : memref<208x32xf32, #tpu.memory_space<vmem>>, vector<4x32xf32>
    %237 = arith.maximumf %235, %236 : vector<4x32xf32>
    %c0_192 = arith.constant 0 : index
    %c4 = arith.constant 4 : index
    %c0_193 = arith.constant 0 : index
    %238 = vector.load %arg6[%c0_192, %c4, %c0_193] : memref<1x32x32xf32, #tpu.memory_space<vmem>>, vector<1x4x32xf32>
    %239 = vector.shape_cast %238 : vector<1x4x32xf32> to vector<4x32xf32>
    %240 = vector.shape_cast %237 : vector<4x32xf32> to vector<1x4x32xf32>
    tpu.vector_store %arg6[%c0_192, %c4, %c0_193], %240 {strides = array<i32>} : memref<1x32x32xf32, #tpu.memory_space<vmem>>, vector<1x4x32xf32>,
    %c40_194 = arith.constant 40 : index
    %c0_195 = arith.constant 0 : index
    %241 = tpu.strided_load %arg9[%c40_194, %c0_195] {strides = array<i32: 2, 1>} : memref<208x32xf32, #tpu.memory_space<vmem>>, vector<4x32xf32>
    %c41_196 = arith.constant 41 : index
    %c0_197 = arith.constant 0 : index
    %242 = tpu.strided_load %arg9[%c41_196, %c0_197] {strides = array<i32: 2, 1>} : memref<208x32xf32, #tpu.memory_space<vmem>>, vector<4x32xf32>
    %243 = arith.maximumf %241, %242 : vector<4x32xf32>
    %c50 = arith.constant 50 : index
    %c0_198 = arith.constant 0 : index
    %244 = tpu.strided_load %arg9[%c50, %c0_198] {strides = array<i32: 2, 1>} : memref<208x32xf32, #tpu.memory_space<vmem>>, vector<4x32xf32>
    %245 = arith.maximumf %243, %244 : vector<4x32xf32>
    %c51_199 = arith.constant 51 : index
    %c0_200 = arith.constant 0 : index
    %246 = tpu.strided_load %arg9[%c51_199, %c0_200] {strides = array<i32: 2, 1>} : memref<208x32xf32, #tpu.memory_space<vmem>>, vector<4x32xf32>
    %247 = arith.maximumf %245, %246 : vector<4x32xf32>
    %c0_201 = arith.constant 0 : index
    %c8_202 = arith.constant 8 : index
    %c0_203 = arith.constant 0 : index
    %248 = vector.load %arg6[%c0_201, %c8_202, %c0_203] : memref<1x32x32xf32, #tpu.memory_space<vmem>>, vector<1x4x32xf32>
    %249 = vector.shape_cast %248 : vector<1x4x32xf32> to vector<4x32xf32>
    %250 = vector.shape_cast %247 : vector<4x32xf32> to vector<1x4x32xf32>
    tpu.vector_store %arg6[%c0_201, %c8_202, %c0_203], %250 {strides = array<i32>} : memref<1x32x32xf32, #tpu.memory_space<vmem>>, vector<1x4x32xf32>,
    %c60 = arith.constant 60 : index
    %c0_204 = arith.constant 0 : index
    %251 = tpu.strided_load %arg9[%c60, %c0_204] {strides = array<i32: 2, 1>} : memref<208x32xf32, #tpu.memory_space<vmem>>, vector<4x32xf32>
    %c61_205 = arith.constant 61 : index
    %c0_206 = arith.constant 0 : index
    %252 = tpu.strided_load %arg9[%c61_205, %c0_206] {strides = array<i32: 2, 1>} : memref<208x32xf32, #tpu.memory_space<vmem>>, vector<4x32xf32>
    %253 = arith.maximumf %251, %252 : vector<4x32xf32>
    %c70 = arith.constant 70 : index
    %c0_207 = arith.constant 0 : index
    %254 = tpu.strided_load %arg9[%c70, %c0_207] {strides = array<i32: 2, 1>} : memref<208x32xf32, #tpu.memory_space<vmem>>, vector<4x32xf32>
    %255 = arith.maximumf %253, %254 : vector<4x32xf32>
    %c71_208 = arith.constant 71 : index
    %c0_209 = arith.constant 0 : index
    %256 = tpu.strided_load %arg9[%c71_208, %c0_209] {strides = array<i32: 2, 1>} : memref<208x32xf32, #tpu.memory_space<vmem>>, vector<4x32xf32>
    %257 = arith.maximumf %255, %256 : vector<4x32xf32>
    %c0_210 = arith.constant 0 : index
    %c12_211 = arith.constant 12 : index
    %c0_212 = arith.constant 0 : index
    %258 = vector.load %arg6[%c0_210, %c12_211, %c0_212] : memref<1x32x32xf32, #tpu.memory_space<vmem>>, vector<1x4x32xf32>
    %259 = vector.shape_cast %258 : vector<1x4x32xf32> to vector<4x32xf32>
    %260 = vector.shape_cast %257 : vector<4x32xf32> to vector<1x4x32xf32>
    tpu.vector_store %arg6[%c0_210, %c12_211, %c0_212], %260 {strides = array<i32>} : memref<1x32x32xf32, #tpu.memory_space<vmem>>, vector<1x4x32xf32>,
    %c104 = arith.constant 104 : index
    %c0_213 = arith.constant 0 : index
    %261 = tpu.strided_load %arg9[%c104, %c0_213] {strides = array<i32: 2, 1>} : memref<208x32xf32, #tpu.memory_space<vmem>>, vector<4x32xf32>
    %c105 = arith.constant 105 : index
    %c0_214 = arith.constant 0 : index
    %262 = tpu.strided_load %arg9[%c105, %c0_214] {strides = array<i32: 2, 1>} : memref<208x32xf32, #tpu.memory_space<vmem>>, vector<4x32xf32>
    %263 = arith.maximumf %261, %262 : vector<4x32xf32>
    %c114 = arith.constant 114 : index
    %c0_215 = arith.constant 0 : index
    %264 = tpu.strided_load %arg9[%c114, %c0_215] {strides = array<i32: 2, 1>} : memref<208x32xf32, #tpu.memory_space<vmem>>, vector<4x32xf32>
    %265 = arith.maximumf %263, %264 : vector<4x32xf32>
    %c115_216 = arith.constant 115 : index
    %c0_217 = arith.constant 0 : index
    %266 = tpu.strided_load %arg9[%c115_216, %c0_217] {strides = array<i32: 2, 1>} : memref<208x32xf32, #tpu.memory_space<vmem>>, vector<4x32xf32>
    %267 = arith.maximumf %265, %266 : vector<4x32xf32>
    %c0_218 = arith.constant 0 : index
    %c16_219 = arith.constant 16 : index
    %c0_220 = arith.constant 0 : index
    %268 = vector.load %arg6[%c0_218, %c16_219, %c0_220] : memref<1x32x32xf32, #tpu.memory_space<vmem>>, vector<1x4x32xf32>
    %269 = vector.shape_cast %268 : vector<1x4x32xf32> to vector<4x32xf32>
    %270 = vector.shape_cast %267 : vector<4x32xf32> to vector<1x4x32xf32>
    tpu.vector_store %arg6[%c0_218, %c16_219, %c0_220], %270 {strides = array<i32>} : memref<1x32x32xf32, #tpu.memory_space<vmem>>, vector<1x4x32xf32>,
    %c124 = arith.constant 124 : index
    %c0_221 = arith.constant 0 : index
    %271 = tpu.strided_load %arg9[%c124, %c0_221] {strides = array<i32: 2, 1>} : memref<208x32xf32, #tpu.memory_space<vmem>>, vector<4x32xf32>
    %c125_222 = arith.constant 125 : index
    %c0_223 = arith.constant 0 : index
    %272 = tpu.strided_load %arg9[%c125_222, %c0_223] {strides = array<i32: 2, 1>} : memref<208x32xf32, #tpu.memory_space<vmem>>, vector<4x32xf32>
    %273 = arith.maximumf %271, %272 : vector<4x32xf32>
    %c134 = arith.constant 134 : index
    %c0_224 = arith.constant 0 : index
    %274 = tpu.strided_load %arg9[%c134, %c0_224] {strides = array<i32: 2, 1>} : memref<208x32xf32, #tpu.memory_space<vmem>>, vector<4x32xf32>
    %275 = arith.maximumf %273, %274 : vector<4x32xf32>
    %c135_225 = arith.constant 135 : index
    %c0_226 = arith.constant 0 : index
    %276 = tpu.strided_load %arg9[%c135_225, %c0_226] {strides = array<i32: 2, 1>} : memref<208x32xf32, #tpu.memory_space<vmem>>, vector<4x32xf32>
    %277 = arith.maximumf %275, %276 : vector<4x32xf32>
    %c0_227 = arith.constant 0 : index
    %c20_228 = arith.constant 20 : index
    %c0_229 = arith.constant 0 : index
    %278 = vector.load %arg6[%c0_227, %c20_228, %c0_229] : memref<1x32x32xf32, #tpu.memory_space<vmem>>, vector<1x4x32xf32>
    %279 = vector.shape_cast %278 : vector<1x4x32xf32> to vector<4x32xf32>
    %280 = vector.shape_cast %277 : vector<4x32xf32> to vector<1x4x32xf32>
    tpu.vector_store %arg6[%c0_227, %c20_228, %c0_229], %280 {strides = array<i32>} : memref<1x32x32xf32, #tpu.memory_space<vmem>>, vector<1x4x32xf32>,
    %c144_230 = arith.constant 144 : index
    %c0_231 = arith.constant 0 : index
    %281 = tpu.strided_load %arg9[%c144_230, %c0_231] {strides = array<i32: 2, 1>} : memref<208x32xf32, #tpu.memory_space<vmem>>, vector<4x32xf32>
    %c145_232 = arith.constant 145 : index
    %c0_233 = arith.constant 0 : index
    %282 = tpu.strided_load %arg9[%c145_232, %c0_233] {strides = array<i32: 2, 1>} : memref<208x32xf32, #tpu.memory_space<vmem>>, vector<4x32xf32>
    %283 = arith.maximumf %281, %282 : vector<4x32xf32>
    %c154 = arith.constant 154 : index
    %c0_234 = arith.constant 0 : index
    %284 = tpu.strided_load %arg9[%c154, %c0_234] {strides = array<i32: 2, 1>} : memref<208x32xf32, #tpu.memory_space<vmem>>, vector<4x32xf32>
    %285 = arith.maximumf %283, %284 : vector<4x32xf32>
    %c155_235 = arith.constant 155 : index
    %c0_236 = arith.constant 0 : index
    %286 = tpu.strided_load %arg9[%c155_235, %c0_236] {strides = array<i32: 2, 1>} : memref<208x32xf32, #tpu.memory_space<vmem>>, vector<4x32xf32>
    %287 = arith.maximumf %285, %286 : vector<4x32xf32>
    %c0_237 = arith.constant 0 : index
    %c24_238 = arith.constant 24 : index
    %c0_239 = arith.constant 0 : index
    %288 = vector.load %arg6[%c0_237, %c24_238, %c0_239] : memref<1x32x32xf32, #tpu.memory_space<vmem>>, vector<1x4x32xf32>
    %289 = vector.shape_cast %288 : vector<1x4x32xf32> to vector<4x32xf32>
    %290 = vector.shape_cast %287 : vector<4x32xf32> to vector<1x4x32xf32>
    tpu.vector_store %arg6[%c0_237, %c24_238, %c0_239], %290 {strides = array<i32>} : memref<1x32x32xf32, #tpu.memory_space<vmem>>, vector<1x4x32xf32>,
    %c164 = arith.constant 164 : index
    %c0_240 = arith.constant 0 : index
    %291 = tpu.strided_load %arg9[%c164, %c0_240] {strides = array<i32: 2, 1>} : memref<208x32xf32, #tpu.memory_space<vmem>>, vector<4x32xf32>
    %c165_241 = arith.constant 165 : index
    %c0_242 = arith.constant 0 : index
    %292 = tpu.strided_load %arg9[%c165_241, %c0_242] {strides = array<i32: 2, 1>} : memref<208x32xf32, #tpu.memory_space<vmem>>, vector<4x32xf32>
    %293 = arith.maximumf %291, %292 : vector<4x32xf32>
    %c174 = arith.constant 174 : index
    %c0_243 = arith.constant 0 : index
    %294 = tpu.strided_load %arg9[%c174, %c0_243] {strides = array<i32: 2, 1>} : memref<208x32xf32, #tpu.memory_space<vmem>>, vector<4x32xf32>
    %295 = arith.maximumf %293, %294 : vector<4x32xf32>
    %c175_244 = arith.constant 175 : index
    %c0_245 = arith.constant 0 : index
    %296 = tpu.strided_load %arg9[%c175_244, %c0_245] {strides = array<i32: 2, 1>} : memref<208x32xf32, #tpu.memory_space<vmem>>, vector<4x32xf32>
    %297 = arith.maximumf %295, %296 : vector<4x32xf32>
    %c0_246 = arith.constant 0 : index
    %c28 = arith.constant 28 : index
    %c0_247 = arith.constant 0 : index
    %298 = vector.load %arg6[%c0_246, %c28, %c0_247] : memref<1x32x32xf32, #tpu.memory_space<vmem>>, vector<1x4x32xf32>
    %299 = vector.shape_cast %298 : vector<1x4x32xf32> to vector<4x32xf32>
    %300 = vector.shape_cast %297 : vector<4x32xf32> to vector<1x4x32xf32>
    tpu.vector_store %arg6[%c0_246, %c28, %c0_247], %300 {strides = array<i32>} : memref<1x32x32xf32, #tpu.memory_space<vmem>>, vector<1x4x32xf32>,
    return
  }
  func.func @transform_0(%arg0: i32) -> (i32, i32, i32) {
    %c0_i32 = arith.constant 0 : i32
    %c0_i32_0 = arith.constant 0 : i32
    %c0_i32_1 = arith.constant 0 : i32
    return %arg0, %c0_i32, %c0_i32_0 : i32, i32, i32
  }
  func.func @transform_1(%arg0: i32) -> (i32, i32) {
    %c0_i32 = arith.constant 0 : i32
    %c0_i32_0 = arith.constant 0 : i32
    %c0_i32_1 = arith.constant 0 : i32
    return %c0_i32, %c0_i32_0 : i32, i32
  }
  func.func @transform_2(%arg0: i32) -> (i32, i32) {
    %c0_i32 = arith.constant 0 : i32
    %c0_i32_0 = arith.constant 0 : i32
    %c0_i32_1 = arith.constant 0 : i32
    return %c0_i32, %c0_i32_0 : i32, i32
  }
  func.func @transform_3(%arg0: i32) -> (i32, i32) {
    %c0_i32 = arith.constant 0 : i32
    %c0_i32_0 = arith.constant 0 : i32
    %c0_i32_1 = arith.constant 0 : i32
    return %c0_i32, %c0_i32_0 : i32, i32
  }
  func.func @transform_4(%arg0: i32) -> (i32, i32) {
    %c0_i32 = arith.constant 0 : i32
    %c0_i32_0 = arith.constant 0 : i32
    %c0_i32_1 = arith.constant 0 : i32
    return %c0_i32, %c0_i32_0 : i32, i32
  }
  func.func @transform_5(%arg0: i32) -> (i32, i32, i32) {
    %c0_i32 = arith.constant 0 : i32
    %c0_i32_0 = arith.constant 0 : i32
    %c0_i32_1 = arith.constant 0 : i32
    return %arg0, %c0_i32, %c0_i32_0 : i32, i32, i32
  }
}

</mosaic_0001>

<bundles_post_ra>
// kernel: simple_cnn_forward.1
= control target key start
LH: loop header
LB: loop body
LE: loop exit
PB: predicated region body
PF: predicated region fallthrough
CT: control target
= control target key end

     0   :  { %vm187_vm0 = vcmask 64512   ;;  %s19677_s0 = inlined_call_operand.vmem [shape: f32[1,704,8], index: 0, kind: input, shape index: {}]   ;;  %s19678_s1 = inlined_call_operand.vmem [shape: f32[72,16], index: 1, kind: input, shape index: {}]   ;;  %s19679_s2 = inlined_call_operand.vmem [shape: f32[1,16], index: 2, kind: input, shape index: {}]   ;;  %s19680_s3 = inlined_call_operand.vmem [shape: f32[144,32], index: 3, kind: input, shape index: {}]   ;;  %s19681_s4 = inlined_call_operand.vmem [shape: f32[1,32], index: 4, kind: input, shape index: {}]   ;;  %s19682_s5 = inlined_call_operand.hbm [shape: f32[1,32,32], index: 5, kind: output, shape index: {}]  }
   0x1   :  { %v2598_v0 = vld [vmem:[%s19678_s1 + $0x18] sm:$0xff]  ;;  %v3484_v3 = vld [vmem:[%s19678_s1 + $0x20] sm:$0xff]  ;;  %v2519_v5 = vld [vmem:[%s19677_s0 + $0x2a] sm:$0xff] }
   0x2   :  { %v2516_v1 = vld [vmem:[%s19677_s0 + $0x12] sm:$0xff]  ;;  %v2517_v2 = vld [vmem:[%s19677_s0 + $0x1a] sm:$0xff]  ;;  %13743 = vmatprep.subr.mxu0 %v2598_v0  ;;  %v2518_v4 = vld [vmem:[%s19677_s0 + $0x22] sm:$0xff] }
   0x3   :  { %13745 = vmatprep.mubr.msk.f32.mxu0 %vm187_vm0, %v2516_v1  ;;  %13744 = vmatpush3.msra.mxu0 %v2598_v0  ;;  %v2520_v6 = vld [vmem:[%s19677_s0 + $0x32] sm:$0xff]  ;;  %v2521_v7 = vld [vmem:[%s19677_s0 + $0x3a] sm:$0xff]  ;;  %v2522_v8 = vld [vmem:[%s19677_s0 + $0x42] sm:$0xff] }
   0x4   :  { %13746 = vmatmul.mubr.msk.f32.vlgmr.msra.gmra.mrb[0].mxu0 %vm187_vm0, %v2517_v2  ;;  %13868 = vmatprep.subr.mxu0 %v3484_v3  ;;  %v2523_v9 = vld [vmem:[%s19677_s0 + $0x4a] sm:$0xff]  ;;  %v2524_v10 = vld [vmem:[%s19677_s0 + $0x52] sm:$0xff]  ;;  %v2525_v11 = vld [vmem:[%s19677_s0 + $0x5a] sm:$0xff] }
   0x5   :  { %13869 = vmatpush3.msra.mxu0 %v3484_v3  ;;  %13748 = vmatprep.mubr.msk.f32.mxu0 %vm187_vm0, %v2518_v4  ;;  %v2526_v12 = vld [vmem:[%s19677_s0 + $0x62] sm:$0xff]  ;;  %v2527_v13 = vld [vmem:[%s19677_s0 + $0x6a] sm:$0xff]  ;;  %v2528_v14 = vld [vmem:[%s19677_s0 + $0x72] sm:$0xff] }
   0x6   :  { %v186_v15 = vld [vmem:[%s19678_s1 + $0x8] sm:$0xff]  ;;  %v2529_v18 = vld [vmem:[%s19677_s0 + $0x7a] sm:$0xff]  ;;  %v106_v19 = vld [vmem:[%s19677_s0 + $0x11] sm:$0xff] }
   0x7   :  { %v104_v16 = vld [vmem:[%s19677_s0 + $0x1] sm:$0xff]  ;;  %13368 = vmatprep.subr.mxu1 %v186_v15  ;;  %v105_v17 = vld [vmem:[%s19677_s0 + $0x9] sm:$0xff]  ;;  %v107_v21 = vld [vmem:[%s19677_s0 + $0x19] sm:$0xff] }
   0x8   :  { %13749 = vmatmul.mubr.msk.f32.gmra.mrb[2].mxu0 %vm187_vm0, %v2519_v5  ;;  %13369 = vmatpush3.msra.mxu1 %v186_v15  ;;  %v2530_v20 = vld [vmem:[%s19677_s0 + $0x82] sm:$0xff]  ;;  %v2531_v22 = vld [vmem:[%s19677_s0 + $0x8a] sm:$0xff]  ;;  %v2532_v24 = vld [vmem:[%s19677_s0 + $0x92] sm:$0xff] }
   0x9   :  { %13751 = vmatprep.mubr.msk.f32.mxu0 %vm187_vm0, %v2520_v6  ;;  %13370 = vmatprep.mubr.msk.f32.mxu1 %vm187_vm0, %v104_v16  ;;  %v108_v23 = vld [vmem:[%s19677_s0 + $0x21] sm:$0xff]  ;;  %v109_v25 = vld [vmem:[%s19677_s0 + $0x29] sm:$0xff]  ;;  %v110_v28 = vld [vmem:[%s19677_s0 + $0x31] sm:$0xff] }
   0xa   :  { %13371 = vmatmul.mubr.msk.f32.vlgmr.msra.gmra.mrb[0].mxu1 %vm187_vm0, %v105_v17  ;;  %v15948_v26 = vld [vmem:[%s19678_s1 + $0x28] sm:$0xff]  ;;  %v2533_v27 = vld [vmem:[%s19677_s0 + $0x9a] sm:$0xff] }
   0xb   :  { %13373 = vmatprep.mubr.msk.f32.mxu1 %vm187_vm0, %v106_v19  ;;  %13993 = vmatprep.subr.mxu0 %v15948_v26  ;;  %v2534_v29 = vld [vmem:[%s19677_s0 + $0xa2] sm:$0xff] }
   0xc   :  { %13752 = vmatmul.mubr.msk.f32.gmra.mrb[4].mxu0 %vm187_vm0, %v2521_v7 }
   0xd   :  { %13754 = vmatprep.mubr.msk.f32.mxu0 %vm187_vm0, %v2522_v8 }
   0xe   :  { %13374 = vmatmul.mubr.msk.f32.gmra.mrb[2].mxu1 %vm187_vm0, %v107_v21 }
   0xf   :  { %13376 = vmatprep.mubr.msk.f32.mxu1 %vm187_vm0, %v108_v23 }
  0x10   :  { %13755 = vmatmul.mubr.msk.f32.gmra.mrb[6].mxu0 %vm187_vm0, %v2523_v9 }
  0x11   :  { %13757 = vmatprep.mubr.msk.f32.mxu0 %vm187_vm0, %v2524_v10 }
  0x12   :  { %13377 = vmatmul.mubr.msk.f32.gmra.mrb[4].mxu1 %vm187_vm0, %v109_v25 }
  0x14   :  { %13758 = vmatmul.mubr.msk.f32.gmra.mrb[8].mxu0 %vm187_vm0, %v2525_v11 }
  0x15   :  { %13760 = vmatprep.mubr.msk.f32.mxu0 %vm187_vm0, %v2526_v12 }
  0x18   :  { %13761 = vmatmul.mubr.msk.f32.gmra.mrb[10].mxu0 %vm187_vm0, %v2527_v13 }
  0x19   :  { %13763 = vmatprep.mubr.msk.f32.mxu0 %vm187_vm0, %v2528_v14 }
  0x1c   :  { %13764 = vmatmul.mubr.msk.f32.gmra.mrb[12].mxu0 %vm187_vm0, %v2529_v18 }
  0x1d   :  { %13766 = vmatprep.mubr.msk.f32.mxu0 %vm187_vm0, %v2530_v20 }
  0x20   :  { %13767 = vmatmul.mubr.msk.f32.gmra.mrb[14].mxu0 %vm187_vm0, %v2531_v22 }
  0x21   :  { %13769 = vmatprep.mubr.msk.f32.mxu0 %vm187_vm0, %v2532_v24 }
  0x22   :  { %10 = vsyncpa [#allocation6], 0  ;;  %13379 = vmatprep.mubr.msk.f32.mxu1 %vm187_vm0, %v110_v28  ;;  %v111_v30 = vld [vmem:[%s19677_s0 + $0x39] sm:$0xff]  ;;  %v2535_v31 = vld [vmem:[%s19677_s0 + $0xaa] sm:$0xff]  ;;  %vm8003_vm1 = vcmask 130048   ;;  %vm11256_vm2 = vcmask 261120  }
  0x23   :  { %v112_v32 = vld [vmem:[%s19677_s0 + $0x41] sm:$0xff]  ;;  %v2536_v33 = vld [vmem:[%s19677_s0 + $0xb2] sm:$0xff]  ;;  %13380 = vmatmul.mubr.msk.f32.gmra.mrb[6].mxu1 %vm187_vm0, %v111_v30  ;;  %v113_v34 = vld [vmem:[%s19677_s0 + $0x49] sm:$0xff]  ;;  %vm11293_vm3 = vcmask 257024  }
  0x24   :  { %13770 = vmatmul.mubr.msk.f32.gmra.mrb[16].mxu0 %vm187_vm0, %v2533_v27  ;;  %13382 = vmatprep.mubr.msk.f32.mxu1 %vm187_vm0, %v112_v32  ;;  %v2537_v35 = vld [vmem:[%s19677_s0 + $0xba] sm:$0xff]  ;;  %v114_v36 = vld [vmem:[%s19677_s0 + $0x51] sm:$0xff]  ;;  %v2538_v37 = vld [vmem:[%s19677_s0 + $0xc2] sm:$0xff] }
  0x25   :  { %13772 = vmatprep.mubr.msk.f32.mxu0 %vm187_vm0, %v2534_v29  ;;  %v115_v38 = vld [vmem:[%s19677_s0 + $0x59] sm:$0xff]  ;;  %v2539_v39 = vld [vmem:[%s19677_s0 + $0xca] sm:$0xff]  ;;  %v116_v40 = vld [vmem:[%s19677_s0 + $0x61] sm:$0xff] }
  0x26   :  { %v2540_v41 = vld [vmem:[%s19677_s0 + $0xd2] sm:$0xff]  ;;  %v117_v42 = vld [vmem:[%s19677_s0 + $0x69] sm:$0xff]  ;;  %v2541_v43 = vld [vmem:[%s19677_s0 + $0xda] sm:$0xff] }
  0x27   :  { %13383 = vmatmul.mubr.msk.f32.gmra.mrb[8].mxu1 %vm187_vm0, %v113_v34  ;;  %v118_v44 = vld [vmem:[%s19677_s0 + $0x71] sm:$0xff]  ;;  %v2542_v45 = vld [vmem:[%s19677_s0 + $0xe2] sm:$0xff]  ;;  %v119_v46 = vld [vmem:[%s19677_s0 + $0x79] sm:$0xff] }
  0x28   :  { %13773 = vmatmul.mubr.msk.f32.gmra.mrb[18].mxu0 %vm187_vm0, %v2535_v31  ;;  %13385 = vmatprep.mubr.msk.f32.mxu1 %vm187_vm0, %v114_v36  ;;  %v2543_v47 = vld [vmem:[%s19677_s0 + $0xea] sm:$0xff]  ;;  %v120_v48 = vld [vmem:[%s19677_s0 + $0x81] sm:$0xff]  ;;  %v2544_v49 = vld [vmem:[%s19677_s0 + $0xf2] sm:$0xff] }
  0x29   :  { %13775 = vmatprep.mubr.msk.f32.mxu0 %vm187_vm0, %v2536_v33  ;;  %v121_v50 = vld [vmem:[%s19677_s0 + $0x89] sm:$0xff]  ;;  %v2545_v51 = vld [vmem:[%s19677_s0 + $0xfa] sm:$0xff]  ;;  %v122_v52 = vld [vmem:[%s19677_s0 + $0x91] sm:$0xff] }
  0x2a   :  { %v2546_v53 = vld [vmem:[%s19677_s0 + $0x102] sm:$0xff]  ;;  %v123_v54 = vld [vmem:[%s19677_s0 + $0x99] sm:$0xff]  ;;  %v2547_v55 = vld [vmem:[%s19677_s0 + $0x10a] sm:$0xff] }
  0x2b   :  { %13386 = vmatmul.mubr.msk.f32.gmra.mrb[10].mxu1 %vm187_vm0, %v115_v38  ;;  %v124_v56 = vld [vmem:[%s19677_s0 + $0xa1] sm:$0xff]  ;;  %v2548_v57 = vld [vmem:[%s19677_s0 + $0x112] sm:$0xff]  ;;  %v125_v58 = vld [vmem:[%s19677_s0 + $0xa9] sm:$0xff] }
  0x2c   :  { %13776 = vmatmul.mubr.msk.f32.gmra.mrb[20].mxu0 %vm187_vm0, %v2537_v35  ;;  %13388 = vmatprep.mubr.msk.f32.mxu1 %vm187_vm0, %v116_v40  ;;  %v2549_v59 = vld [vmem:[%s19677_s0 + $0x11a] sm:$0xff]  ;;  %v126_v60 = vld [vmem:[%s19677_s0 + $0xb1] sm:$0xff]  ;;  %v2550_v61 = vld [vmem:[%s19677_s0 + $0x122] sm:$0xff] }
  0x2d   :  { %13778 = vmatprep.mubr.msk.f32.mxu0 %vm187_vm0, %v2538_v37  ;;  %v127_v62 = vld [vmem:[%s19677_s0 + $0xb9] sm:$0xff]  ;;  %v2551_v63 = vld [vmem:[%s19677_s0 + $0x12a] sm:$0xff]  ;;  %v128_v0 = vld [vmem:[%s19677_s0 + $0xc1] sm:$0xff] }
  0x2e   :  { %v2552_v1 = vld [vmem:[%s19677_s0 + $0x132] sm:$0xff]  ;;  %v129_v2 = vld [vmem:[%s19677_s0 + $0xc9] sm:$0xff]  ;;  %v2553_v3 = vld [vmem:[%s19677_s0 + $0x13a] sm:$0xff] }
  0x2f   :  { %13389 = vmatmul.mubr.msk.f32.gmra.mrb[12].mxu1 %vm187_vm0, %v117_v42  ;;  %v130_v4 = vld [vmem:[%s19677_s0 + $0xd1] sm:$0xff]  ;;  %v2554_v5 = vld [vmem:[%s19677_s0 + $0x142] sm:$0xff]  ;;  %v131_v6 = vld [vmem:[%s19677_s0 + $0xd9] sm:$0xff] }
  0x30   :  { %13779 = vmatmul.mubr.msk.f32.gmra.mrb[22].mxu0 %vm187_vm0, %v2539_v39  ;;  %13391 = vmatprep.mubr.msk.f32.mxu1 %vm187_vm0, %v118_v44  ;;  %v2555_v7 = vld [vmem:[%s19677_s0 + $0x14a] sm:$0xff]  ;;  %v132_v8 = vld [vmem:[%s19677_s0 + $0xe1] sm:$0xff]  ;;  %v2556_v9 = vld [vmem:[%s19677_s0 + $0x152] sm:$0xff] }
  0x31   :  { %13781 = vmatprep.mubr.msk.f32.mxu0 %vm187_vm0, %v2540_v41  ;;  %v133_v10 = vld [vmem:[%s19677_s0 + $0xe9] sm:$0xff]  ;;  %v2557_v11 = vld [vmem:[%s19677_s0 + $0x15a] sm:$0xff]  ;;  %v134_v12 = vld [vmem:[%s19677_s0 + $0xf1] sm:$0xff] }
  0x32   :  { %v2558_v13 = vld [vmem:[%s19677_s0 + $0x162] sm:$0xff]  ;;  %v135_v14 = vld [vmem:[%s19677_s0 + $0xf9] sm:$0xff]  ;;  %v2559_v15 = vld [vmem:[%s19677_s0 + $0x16a] sm:$0xff] }
  0x33   :  { %13392 = vmatmul.mubr.msk.f32.gmra.mrb[14].mxu1 %vm187_vm0, %v119_v46  ;;  %v136_v16 = vld [vmem:[%s19677_s0 + $0x101] sm:$0xff]  ;;  %v2560_v17 = vld [vmem:[%s19677_s0 + $0x172] sm:$0xff]  ;;  %v137_v18 = vld [vmem:[%s19677_s0 + $0x109] sm:$0xff] }
  0x34   :  { %13782 = vmatmul.mubr.msk.f32.gmra.mrb[24].mxu0 %vm187_vm0, %v2541_v43  ;;  %13394 = vmatprep.mubr.msk.f32.mxu1 %vm187_vm0, %v120_v48  ;;  %v2561_v19 = vld [vmem:[%s19677_s0 + $0x17a] sm:$0xff]  ;;  %v138_v20 = vld [vmem:[%s19677_s0 + $0x111] sm:$0xff]  ;;  %v2562_v21 = vld [vmem:[%s19677_s0 + $0x182] sm:$0xff] }
  0x35   :  { %13784 = vmatprep.mubr.msk.f32.mxu0 %vm187_vm0, %v2542_v45  ;;  %v139_v22 = vld [vmem:[%s19677_s0 + $0x119] sm:$0xff]  ;;  %v2563_v23 = vld [vmem:[%s19677_s0 + $0x18a] sm:$0xff]  ;;  %v140_v24 = vld [vmem:[%s19677_s0 + $0x121] sm:$0xff] }
  0x36   :  { %v2564_v25 = vld [vmem:[%s19677_s0 + $0x192] sm:$0xff]  ;;  %v141_v27 = vld [vmem:[%s19677_s0 + $0x129] sm:$0xff]  ;;  %v2565_v28 = vld [vmem:[%s19677_s0 + $0x19a] sm:$0xff] }
  0x37   :  { %13395 = vmatmul.mubr.msk.f32.gmra.mrb[16].mxu1 %vm187_vm0, %v121_v50  ;;  %v142_v29 = vld [vmem:[%s19677_s0 + $0x131] sm:$0xff]  ;;  %v2566_v30 = vld [vmem:[%s19677_s0 + $0x1a2] sm:$0xff]  ;;  %v143_v31 = vld [vmem:[%s19677_s0 + $0x139] sm:$0xff] }
  0x38   :  { %13785 = vmatmul.mubr.msk.f32.gmra.mrb[26].mxu0 %vm187_vm0, %v2543_v47  ;;  %13397 = vmatprep.mubr.msk.f32.mxu1 %vm187_vm0, %v122_v52  ;;  %v2567_v32 = vld [vmem:[%s19677_s0 + $0x1aa] sm:$0xff]  ;;  %v144_v33 = vld [vmem:[%s19677_s0 + $0x141] sm:$0xff]  ;;  %v2568_v34 = vld [vmem:[%s19677_s0 + $0x1b2] sm:$0xff] }
  0x39   :  { %13787 = vmatprep.mubr.msk.f32.mxu0 %vm187_vm0, %v2544_v49  ;;  %v145_v35 = vld [vmem:[%s19677_s0 + $0x149] sm:$0xff]  ;;  %v2569_v36 = vld [vmem:[%s19677_s0 + $0x1ba] sm:$0xff]  ;;  %v146_v37 = vld [vmem:[%s19677_s0 + $0x151] sm:$0xff] }
  0x3a   :  { %v2570_v38 = vld [vmem:[%s19677_s0 + $0x1c2] sm:$0xff]  ;;  %v147_v39 = vld [vmem:[%s19677_s0 + $0x159] sm:$0xff]  ;;  %v2571_v40 = vld [vmem:[%s19677_s0 + $0x1ca] sm:$0xff] }
  0x3b   :  { %13398 = vmatmul.mubr.msk.f32.gmra.mrb[18].mxu1 %vm187_vm0, %v123_v54  ;;  %v148_v41 = vld [vmem:[%s19677_s0 + $0x161] sm:$0xff]  ;;  %v2572_v42 = vld [vmem:[%s19677_s0 + $0x1d2] sm:$0xff]  ;;  %v149_v43 = vld [vmem:[%s19677_s0 + $0x169] sm:$0xff] }
  0x3c   :  { %13788 = vmatmul.mubr.msk.f32.gmra.mrb[28].mxu0 %vm187_vm0, %v2545_v51  ;;  %13400 = vmatprep.mubr.msk.f32.mxu1 %vm187_vm0, %v124_v56  ;;  %v2573_v44 = vld [vmem:[%s19677_s0 + $0x1da] sm:$0xff]  ;;  %v150_v45 = vld [vmem:[%s19677_s0 + $0x171] sm:$0xff]  ;;  %v2574_v46 = vld [vmem:[%s19677_s0 + $0x1e2] sm:$0xff] }
  0x3d   :  { %13790 = vmatprep.mubr.msk.f32.mxu0 %vm187_vm0, %v2546_v53  ;;  %v151_v47 = vld [vmem:[%s19677_s0 + $0x179] sm:$0xff]  ;;  %v2575_v48 = vld [vmem:[%s19677_s0 + $0x1ea] sm:$0xff]  ;;  %v152_v49 = vld [vmem:[%s19677_s0 + $0x181] sm:$0xff] }
  0x3e   :  { %v2576_v50 = vld [vmem:[%s19677_s0 + $0x1f2] sm:$0xff]  ;;  %v153_v51 = vld [vmem:[%s19677_s0 + $0x189] sm:$0xff]  ;;  %v2577_v52 = vld [vmem:[%s19677_s0 + $0x1fa] sm:$0xff] }
  0x3f   :  { %13401 = vmatmul.mubr.msk.f32.gmra.mrb[20].mxu1 %vm187_vm0, %v125_v58  ;;  %v154_v53 = vld [vmem:[%s19677_s0 + $0x191] sm:$0xff]  ;;  %v2578_v54 = vld [vmem:[%s19677_s0 + $0x202] sm:$0xff] }
  0x40   :  { %13791 = vmatmul.mubr.msk.f32.gmra.mrb[30].mxu0 %vm187_vm0, %v2547_v55  ;;  %13403 = vmatprep.mubr.msk.f32.mxu1 %vm187_vm0, %v126_v60  ;;  %v155_v55 = vld [vmem:[%s19677_s0 + $0x199] sm:$0xff]  ;;  %v2579_v56 = vld [vmem:[%s19677_s0 + $0x20a] sm:$0xff] }
  0x41   :  { %13793 = vmatprep.mubr.msk.f32.mxu0 %vm187_vm0, %v2548_v57  ;;  %v156_v57 = vld [vmem:[%s19677_s0 + $0x1a1] sm:$0xff]  ;;  %v2580_v58 = vld [vmem:[%s19677_s0 + $0x212] sm:$0xff] }
  0x42   :  { %v2581_v60 = vld [vmem:[%s19677_s0 + $0x21a] sm:$0xff] }
  0x43   :  { %13404 = vmatmul.mubr.msk.f32.gmra.mrb[22].mxu1 %vm187_vm0, %v127_v62  ;;  %v2582_v62 = vld [vmem:[%s19677_s0 + $0x222] sm:$0xff] }
  0x44   :  { %13794 = vmatmul.mubr.msk.f32.gmra.mrb[32].mxu0 %vm187_vm0, %v2549_v59  ;;  %13406 = vmatprep.mubr.msk.f32.mxu1 %vm187_vm0, %v128_v0  ;;  %v157_v59 = vld [vmem:[%s19677_s0 + $0x1a9] sm:$0xff] }
  0x45   :  { %13796 = vmatprep.mubr.msk.f32.mxu0 %vm187_vm0, %v2550_v61  ;;  %v158_v61 = vld [vmem:[%s19677_s0 + $0x1b1] sm:$0xff] }
  0x46   :  { %v2583_v0 = vld [vmem:[%s19677_s0 + $0x22a] sm:$0xff] }
  0x47   :  { %13407 = vmatmul.mubr.msk.f32.gmra.mrb[24].mxu1 %vm187_vm0, %v129_v2  ;;  %v2584_v2 = vld [vmem:[%s19677_s0 + $0x232] sm:$0xff] }
  0x48   :  { %13797 = vmatmul.mubr.msk.f32.gmra.mrb[34].mxu0 %vm187_vm0, %v2551_v63  ;;  %13409 = vmatprep.mubr.msk.f32.mxu1 %vm187_vm0, %v130_v4  ;;  %v159_v63 = vld [vmem:[%s19677_s0 + $0x1b9] sm:$0xff] }
  0x49   :  { %13799 = vmatprep.mubr.msk.f32.mxu0 %vm187_vm0, %v2552_v1  ;;  %v160_v1 = vld [vmem:[%s19677_s0 + $0x1c1] sm:$0xff] }
  0x4a   :  { %v2585_v4 = vld [vmem:[%s19677_s0 + $0x23a] sm:$0xff] }
  0x4b   :  { %13410 = vmatmul.mubr.msk.f32.gmra.mrb[26].mxu1 %vm187_vm0, %v131_v6  ;;  %v2586_v6 = vld [vmem:[%s19677_s0 + $0x242] sm:$0xff] }
  0x4c   :  { %13800 = vmatmul.mubr.msk.f32.gmra.mrb[36].mxu0 %vm187_vm0, %v2553_v3  ;;  %13412 = vmatprep.mubr.msk.f32.mxu1 %vm187_vm0, %v132_v8  ;;  %v161_v3 = vld [vmem:[%s19677_s0 + $0x1c9] sm:$0xff] }
  0x4d   :  { %13802 = vmatprep.mubr.msk.f32.mxu0 %vm187_vm0, %v2554_v5  ;;  %v162_v5 = vld [vmem:[%s19677_s0 + $0x1d1] sm:$0xff] }
  0x4e   :  { %v2587_v8 = vld [vmem:[%s19677_s0 + $0x24a] sm:$0xff] }
  0x4f   :  { %13413 = vmatmul.mubr.msk.f32.gmra.mrb[28].mxu1 %vm187_vm0, %v133_v10  ;;  %v2588_v10 = vld [vmem:[%s19677_s0 + $0x252] sm:$0xff] }
  0x50   :  { %13803 = vmatmul.mubr.msk.f32.gmra.mrb[38].mxu0 %vm187_vm0, %v2555_v7  ;;  %13415 = vmatprep.mubr.msk.f32.mxu1 %vm187_vm0, %v134_v12  ;;  %v163_v7 = vld [vmem:[%s19677_s0 + $0x1d9] sm:$0xff] }
  0x51   :  { %13805 = vmatprep.mubr.msk.f32.mxu0 %vm187_vm0, %v2556_v9  ;;  %v164_v9 = vld [vmem:[%s19677_s0 + $0x1e1] sm:$0xff] }
  0x52   :  { %v2589_v12 = vld [vmem:[%s19677_s0 + $0x25a] sm:$0xff] }
  0x53   :  { %13416 = vmatmul.mubr.msk.f32.gmra.mrb[30].mxu1 %vm187_vm0, %v135_v14  ;;  %v2590_v14 = vld [vmem:[%s19677_s0 + $0x262] sm:$0xff] }
  0x54   :  { %13806 = vmatmul.mubr.msk.f32.gmra.mrb[40].mxu0 %vm187_vm0, %v2557_v11  ;;  %13418 = vmatprep.mubr.msk.f32.mxu1 %vm187_vm0, %v136_v16  ;;  %v165_v11 = vld [vmem:[%s19677_s0 + $0x1e9] sm:$0xff] }
  0x55   :  { %13808 = vmatprep.mubr.msk.f32.mxu0 %vm187_vm0, %v2558_v13  ;;  %v166_v13 = vld [vmem:[%s19677_s0 + $0x1f1] sm:$0xff] }
  0x56   :  { %v2591_v16 = vld [vmem:[%s19677_s0 + $0x26a] sm:$0xff] }
  0x57   :  { %13419 = vmatmul.mubr.msk.f32.gmra.mrb[32].mxu1 %vm187_vm0, %v137_v18  ;;  %v3402_v18 = vld [vmem:[%s19677_s0 + $0x13] sm:$0xff] }
  0x58   :  { %13809 = vmatmul.mubr.msk.f32.gmra.mrb[42].mxu0 %vm187_vm0, %v2559_v15  ;;  %13421 = vmatprep.mubr.msk.f32.mxu1 %vm187_vm0, %v138_v20  ;;  %v167_v15 = vld [vmem:[%s19677_s0 + $0x1f9] sm:$0xff] }
  0x59   :  { %13811 = vmatprep.mubr.msk.f32.mxu0 %vm187_vm0, %v2560_v17  ;;  %v168_v17 = vld [vmem:[%s19677_s0 + $0x201] sm:$0xff] }
  0x5a   :  { %v3403_v20 = vld [vmem:[%s19677_s0 + $0x1b] sm:$0xff] }
  0x5b   :  { %13422 = vmatmul.mubr.msk.f32.gmra.mrb[34].mxu1 %vm187_vm0, %v139_v22  ;;  %v3404_v22 = vld [vmem:[%s19677_s0 + $0x23] sm:$0xff] }
  0x5c   :  { %13812 = vmatmul.mubr.msk.f32.gmra.mrb[44].mxu0 %vm187_vm0, %v2561_v19  ;;  %13424 = vmatprep.mubr.msk.f32.mxu1 %vm187_vm0, %v140_v24  ;;  %v169_v19 = vld [vmem:[%s19677_s0 + $0x209] sm:$0xff] }
  0x5d   :  { %13814 = vmatprep.mubr.msk.f32.mxu0 %vm187_vm0, %v2562_v21  ;;  %v170_v21 = vld [vmem:[%s19677_s0 + $0x211] sm:$0xff] }
  0x5e   :  { %v3405_v24 = vld [vmem:[%s19677_s0 + $0x2b] sm:$0xff] }
  0x5f   :  { %13425 = vmatmul.mubr.msk.f32.gmra.mrb[36].mxu1 %vm187_vm0, %v141_v27  ;;  %v3406_v27 = vld [vmem:[%s19677_s0 + $0x33] sm:$0xff] }
  0x60   :  { %13815 = vmatmul.mubr.msk.f32.gmra.mrb[46].mxu0 %vm187_vm0, %v2563_v23  ;;  %13427 = vmatprep.mubr.msk.f32.mxu1 %vm187_vm0, %v142_v29  ;;  %v171_v23 = vld [vmem:[%s19677_s0 + $0x219] sm:$0xff]  ;;  %v174_v29 = vld [vmem:[%s19677_s0 + $0x231] sm:$0xff] }
  0x61   :  { %13817 = vmatprep.mubr.msk.f32.mxu0 %vm187_vm0, %v2564_v25  ;;  %v172_v25 = vld [vmem:[%s19677_s0 + $0x221] sm:$0xff] }
  0x63   :  { %13428 = vmatmul.mubr.msk.f32.gmra.mrb[38].mxu1 %vm187_vm0, %v143_v31  ;;  %v175_v31 = vld [vmem:[%s19677_s0 + $0x239] sm:$0xff] }
  0x64   :  { %13818 = vmatmul.mubr.msk.f32.gmra.mrb[48].mxu0 %vm187_vm0, %v2565_v28  ;;  %13430 = vmatprep.mubr.msk.f32.mxu1 %vm187_vm0, %v144_v33  ;;  %v3407_v28 = vld [vmem:[%s19677_s0 + $0x3b] sm:$0xff]  ;;  %v3409_v33 = vld [vmem:[%s19677_s0 + $0x4b] sm:$0xff] }
  0x65   :  { %13820 = vmatprep.mubr.msk.f32.mxu0 %vm187_vm0, %v2566_v30  ;;  %v3408_v30 = vld [vmem:[%s19677_s0 + $0x43] sm:$0xff] }
  0x67   :  { %13431 = vmatmul.mubr.msk.f32.gmra.mrb[40].mxu1 %vm187_vm0, %v145_v35  ;;  %v3410_v35 = vld [vmem:[%s19677_s0 + $0x53] sm:$0xff] }
  0x68   :  { %13821 = vmatmul.mubr.msk.f32.gmra.mrb[50].mxu0 %vm187_vm0, %v2567_v32  ;;  %13433 = vmatprep.mubr.msk.f32.mxu1 %vm187_vm0, %v146_v37  ;;  %v103_v32 = vld [vmem:[%s19678_s1] sm:$0xff] }
  0x69   :  { %13823 = vmatprep.mubr.msk.f32.mxu0 %vm187_vm0, %v2568_v34  ;;  %v176_v34 = vld [vmem:[%s19677_s0 + $0x241] sm:$0xff]  ;;  %13493 = vmatprep.subr.mxu1 %v103_v32 }
  0x6a   :  { %13494 = vmatpush3.msra.mxu1 %v103_v32  ;;  %v3411_v37 = vld [vmem:[%s19677_s0 + $0x5b] sm:$0xff]  ;;  %v3440_v32 = vld [vmem:[%s19677_s0 + $0x143] sm:$0xff] }
  0x6b   :  { %13434 = vmatmul.mubr.msk.f32.gmra.mrb[42].mxu1 %vm187_vm0, %v147_v39  ;;  %v3412_v39 = vld [vmem:[%s19677_s0 + $0x63] sm:$0xff] }
  0x6c   :  { %13824 = vmatmul.mubr.msk.f32.gmra.mrb[52].mxu0 %vm187_vm0, %v2569_v36  ;;  %13436 = vmatprep.mubr.msk.f32.mxu1 %vm187_vm0, %v148_v41  ;;  %v177_v36 = vld [vmem:[%s19677_s0 + $0x249] sm:$0xff] }
  0x6d   :  { %13826 = vmatprep.mubr.msk.f32.mxu0 %vm187_vm0, %v2570_v38  ;;  %v178_v38 = vld [vmem:[%s19677_s0 + $0x251] sm:$0xff] }
  0x6e   :  { %v3413_v41 = vld [vmem:[%s19677_s0 + $0x6b] sm:$0xff] }
  0x6f   :  { %13437 = vmatmul.mubr.msk.f32.gmra.mrb[44].mxu1 %vm187_vm0, %v149_v43  ;;  %v3414_v43 = vld [vmem:[%s19677_s0 + $0x73] sm:$0xff] }
  0x70   :  { %13827 = vmatmul.mubr.msk.f32.gmra.mrb[54].mxu0 %vm187_vm0, %v2571_v40  ;;  %13439 = vmatprep.mubr.msk.f32.mxu1 %vm187_vm0, %v150_v45  ;;  %v179_v40 = vld [vmem:[%s19677_s0 + $0x259] sm:$0xff] }
  0x71   :  { %13829 = vmatprep.mubr.msk.f32.mxu0 %vm187_vm0, %v2572_v42  ;;  %v180_v42 = vld [vmem:[%s19677_s0 + $0x261] sm:$0xff] }
  0x72   :  { %v3415_v45 = vld [vmem:[%s19677_s0 + $0x7b] sm:$0xff] }
  0x73   :  { %13440 = vmatmul.mubr.msk.f32.gmra.mrb[46].mxu1 %vm187_vm0, %v151_v47  ;;  %v3416_v47 = vld [vmem:[%s19677_s0 + $0x83] sm:$0xff] }
  0x74   :  { %13830 = vmatmul.mubr.msk.f32.gmra.mrb[56].mxu0 %vm187_vm0, %v2573_v44  ;;  %13442 = vmatprep.mubr.msk.f32.mxu1 %vm187_vm0, %v152_v49  ;;  %v181_v44 = vld [vmem:[%s19677_s0 + $0x269] sm:$0xff] }
  0x75   :  { %13832 = vmatprep.mubr.msk.f32.mxu0 %vm187_vm0, %v2574_v46  ;;  %v182_v46 = vld [vmem:[%s19677_s0 + $0x271] sm:$0xff] }
  0x76   :  { %v3417_v49 = vld [vmem:[%s19677_s0 + $0x8b] sm:$0xff] }
  0x77   :  { %13443 = vmatmul.mubr.msk.f32.gmra.mrb[48].mxu1 %vm187_vm0, %v153_v51  ;;  %v3418_v51 = vld [vmem:[%s19677_s0 + $0x93] sm:$0xff] }
  0x78   :  { %13833 = vmatmul.mubr.msk.f32.gmra.mrb[58].mxu0 %vm187_vm0, %v2575_v48  ;;  %13445 = vmatprep.mubr.msk.f32.mxu1 %vm187_vm0, %v154_v53  ;;  %v183_v48 = vld [vmem:[%s19677_s0 + $0x279] sm:$0xff] }
  0x79   :  { %13835 = vmatprep.mubr.msk.f32.mxu0 %vm187_vm0, %v2576_v50  ;;  %v184_v50 = vld [vmem:[%s19677_s0 + $0x281] sm:$0xff] }
  0x7a   :  { %v3419_v53 = vld [vmem:[%s19677_s0 + $0x9b] sm:$0xff] }
  0x7b   :  { %13446 = vmatmul.mubr.msk.f32.gmra.mrb[50].mxu1 %vm187_vm0, %v155_v55  ;;  %v3420_v55 = vld [vmem:[%s19677_s0 + $0xa3] sm:$0xff] }
  0x7c   :  { %13836 = vmatmul.mubr.msk.f32.gmra.mrb[60].mxu0 %vm187_vm0, %v2577_v52  ;;  %13448 = vmatprep.mubr.msk.f32.mxu1 %vm187_vm0, %v156_v57  ;;  %v185_v52 = vld [vmem:[%s19677_s0 + $0x289] sm:$0xff] }
  0x7d   :  { %13838 = vmatprep.mubr.msk.f32.mxu0 %vm187_vm0, %v2578_v54  ;;  %v21_v54 = vld [vmem:[%s19677_s0] sm:$0xff]  ;;  %v3421_v57 = vld [vmem:[%s19677_s0 + $0xab] sm:$0xff] }
  0x7f   :  { %13449 = vmatmul.mubr.msk.f32.gmra.mrb[52].mxu1 %vm187_vm0, %v157_v59  ;;  %v3422_v59 = vld [vmem:[%s19677_s0 + $0xb3] sm:$0xff] }
  0x80   :  { %13839 = vmatmul.mubr.msk.f32.gmra.mrb[62].mxu0 %vm187_vm0, %v2579_v56  ;;  %13451 = vmatprep.mubr.msk.f32.mxu1 %vm187_vm0, %v158_v61  ;;  %v22_v56 = vld [vmem:[%s19677_s0 + $0x8] sm:$0xff]  ;;  %v16598_v61 = vld [vmem:[%s19678_s1 + $0x30] sm:$0xff] }
  0x81   :  { %13841 = vmatprep.mubr.msk.f32.mxu0 %vm187_vm0, %v2580_v58  ;;  %v23_v58 = vld [vmem:[%s19677_s0 + $0x10] sm:$0xff] }
  0x83   :  { %13452 = vmatmul.mubr.msk.f32.gmra.mrb[54].mxu1 %vm187_vm0, %v159_v63  ;;  %v25_v63 = vld [vmem:[%s19677_s0 + $0x20] sm:$0xff] }
  0x84   :  { %13842 = vmatmul.mubr.msk.f32.gmra.mrb[64].mxu0 %vm187_vm0, %v2581_v60  ;;  %13454 = vmatprep.mubr.msk.f32.mxu1 %vm187_vm0, %v160_v1  ;;  %v24_v60 = vld [vmem:[%s19677_s0 + $0x18] sm:$0xff]  ;;  %v26_v1 = vld [vmem:[%s19677_s0 + $0x28] sm:$0xff] }
  0x85   :  { %13844 = vmatprep.mubr.msk.f32.mxu0 %vm187_vm0, %v2582_v62  ;;  %v3423_v62 = vld [vmem:[%s19677_s0 + $0xbb] sm:$0xff] }
  0x87   :  { %13455 = vmatmul.mubr.msk.f32.gmra.mrb[56].mxu1 %vm187_vm0, %v161_v3  ;;  %v27_v3 = vld [vmem:[%s19677_s0 + $0x30] sm:$0xff] }
  0x88   :  { %13845 = vmatmul.mubr.msk.f32.gmra.mrb[66].mxu0 %vm187_vm0, %v2583_v0  ;;  %13457 = vmatprep.mubr.msk.f32.mxu1 %vm187_vm0, %v162_v5  ;;  %v3424_v0 = vld [vmem:[%s19677_s0 + $0xc3] sm:$0xff]  ;;  %v28_v5 = vld [vmem:[%s19677_s0 + $0x38] sm:$0xff] }
  0x89   :  { %13847 = vmatprep.mubr.msk.f32.mxu0 %vm187_vm0, %v2584_v2  ;;  %v3425_v2 = vld [vmem:[%s19677_s0 + $0xcb] sm:$0xff] }
  0x8b   :  { %13458 = vmatmul.mubr.msk.f32.gmra.mrb[58].mxu1 %vm187_vm0, %v163_v7  ;;  %v29_v7 = vld [vmem:[%s19677_s0 + $0x40] sm:$0xff] }
  0x8c   :  { %13848 = vmatmul.mubr.msk.f32.gmra.mrb[68].mxu0 %vm187_vm0, %v2585_v4  ;;  %13460 = vmatprep.mubr.msk.f32.mxu1 %vm187_vm0, %v164_v9  ;;  %v3426_v4 = vld [vmem:[%s19677_s0 + $0xd3] sm:$0xff]  ;;  %v30_v9 = vld [vmem:[%s19677_s0 + $0x48] sm:$0xff] }
  0x8d   :  { %13850 = vmatprep.mubr.msk.f32.mxu0 %vm187_vm0, %v2586_v6  ;;  %v3427_v6 = vld [vmem:[%s19677_s0 + $0xdb] sm:$0xff] }
  0x8f   :  { %13461 = vmatmul.mubr.msk.f32.gmra.mrb[60].mxu1 %vm187_vm0, %v165_v11  ;;  %v31_v11 = vld [vmem:[%s19677_s0 + $0x50] sm:$0xff] }
  0x90   :  { %13851 = vmatmul.mubr.msk.f32.gmra.mrb[70].mxu0 %vm187_vm0, %v2587_v8  ;;  %13463 = vmatprep.mubr.msk.f32.mxu1 %vm187_vm0, %v166_v13  ;;  %v3428_v8 = vld [vmem:[%s19677_s0 + $0xe3] sm:$0xff]  ;;  %v32_v13 = vld [vmem:[%s19677_s0 + $0x58] sm:$0xff] }
  0x91   :  { %13853 = vmatprep.mubr.msk.f32.mxu0 %vm187_vm0, %v2588_v10  ;;  %v3429_v10 = vld [vmem:[%s19677_s0 + $0xeb] sm:$0xff] }
  0x93   :  { %13464 = vmatmul.mubr.msk.f32.gmra.mrb[62].mxu1 %vm187_vm0, %v167_v15  ;;  %v33_v15 = vld [vmem:[%s19677_s0 + $0x60] sm:$0xff] }
  0x94   :  { %13854 = vmatmul.mubr.msk.f32.gmra.mrb[72].mxu0 %vm187_vm0, %v2589_v12  ;;  %13466 = vmatprep.mubr.msk.f32.mxu1 %vm187_vm0, %v168_v17  ;;  %v3430_v12 = vld [vmem:[%s19677_s0 + $0xf3] sm:$0xff]  ;;  %v34_v17 = vld [vmem:[%s19677_s0 + $0x68] sm:$0xff] }
  0x95   :  { %13856 = vmatprep.mubr.msk.f32.mxu0 %vm187_vm0, %v2590_v14  ;;  %v3431_v14 = vld [vmem:[%s19677_s0 + $0xfb] sm:$0xff] }
  0x97   :  { %13467 = vmatmul.mubr.msk.f32.gmra.mrb[64].mxu1 %vm187_vm0, %v169_v19  ;;  %v35_v19 = vld [vmem:[%s19677_s0 + $0x70] sm:$0xff] }
  0x98   :  { %13857 = vmatmul.mubr.msk.f32.gmra.mrb[74].mxu0 %vm187_vm0, %v2591_v16  ;;  %13469 = vmatprep.mubr.msk.f32.mxu1 %vm187_vm0, %v170_v21  ;;  %v3432_v16 = vld [vmem:[%s19677_s0 + $0x103] sm:$0xff]  ;;  %v36_v21 = vld [vmem:[%s19677_s0 + $0x78] sm:$0xff] }
  0x99   :  { %13870 = vmatprep.mubr.msk.f32.mxu0 %vm187_vm0, %v3402_v18  ;;  %v3433_v18 = vld [vmem:[%s19677_s0 + $0x10b] sm:$0xff] }
  0x9b   :  { %13470 = vmatmul.mubr.msk.f32.gmra.mrb[66].mxu1 %vm187_vm0, %v171_v23  ;;  %v37_v23 = vld [vmem:[%s19677_s0 + $0x80] sm:$0xff] }
  0x9c   :  { %13871 = vmatmul.mubr.msk.f32.vlgmr.msra.gmra.mrb[0].mxu0 %vm187_vm0, %v3403_v20  ;;  %13472 = vmatprep.mubr.msk.f32.mxu1 %vm187_vm0, %v172_v25  ;;  %v3434_v20 = vld [vmem:[%s19677_s0 + $0x113] sm:$0xff]  ;;  %v38_v25 = vld [vmem:[%s19677_s0 + $0x88] sm:$0xff] }
  0x9d   :  { %13994 = vmatpush3.msra.mxu0 %v15948_v26  ;;  %13873 = vmatprep.mubr.msk.f32.mxu0 %vm187_vm0, %v3404_v22  ;;  %v173_v26 = vld [vmem:[%s19677_s0 + $0x229] sm:$0xff]  ;;  %v3435_v22 = vld [vmem:[%s19677_s0 + $0x11b] sm:$0xff] }
  0x9e   :  { %14118 = vmatprep.subr.mxu0 %v16598_v61 }
  0x9f   :  { %13473 = vmatmul.mubr.msk.f32.gmra.mrb[68].mxu1 %vm187_vm0, %v173_v26  ;;  %v39_v26 = vld [vmem:[%s19677_s0 + $0x90] sm:$0xff] }
  0xa0   :  { %13874 = vmatmul.mubr.msk.f32.gmra.mrb[2].mxu0 %vm187_vm0, %v3405_v24  ;;  %13475 = vmatprep.mubr.msk.f32.mxu1 %vm187_vm0, %v174_v29  ;;  %v3436_v24 = vld [vmem:[%s19677_s0 + $0x123] sm:$0xff]  ;;  %v40_v29 = vld [vmem:[%s19677_s0 + $0x98] sm:$0xff] }
  0xa1   :  { %13876 = vmatprep.mubr.msk.f32.mxu0 %vm187_vm0, %v3406_v27  ;;  %v3437_v27 = vld [vmem:[%s19677_s0 + $0x12b] sm:$0xff] }
  0xa3   :  { %13476 = vmatmul.mubr.msk.f32.gmra.mrb[70].mxu1 %vm187_vm0, %v175_v31  ;;  %v41_v31 = vld [vmem:[%s19677_s0 + $0xa0] sm:$0xff] }
  0xa4   :  { %13877 = vmatmul.mubr.msk.f32.gmra.mrb[4].mxu0 %vm187_vm0, %v3407_v28  ;;  %13478 = vmatprep.mubr.msk.f32.mxu1 %vm187_vm0, %v176_v34  ;;  %v3438_v28 = vld [vmem:[%s19677_s0 + $0x133] sm:$0xff]  ;;  %v3441_v34 = vld [vmem:[%s19677_s0 + $0x14b] sm:$0xff] }
  0xa5   :  { %13879 = vmatprep.mubr.msk.f32.mxu0 %vm187_vm0, %v3408_v30  ;;  %v3439_v30 = vld [vmem:[%s19677_s0 + $0x13b] sm:$0xff] }
  0xa7   :  { %13479 = vmatmul.mubr.msk.f32.gmra.mrb[72].mxu1 %vm187_vm0, %v177_v36  ;;  %v3442_v36 = vld [vmem:[%s19677_s0 + $0x153] sm:$0xff] }
  0xa8   :  { %13880 = vmatmul.mubr.msk.f32.gmra.mrb[6].mxu0 %vm187_vm0, %v3409_v33  ;;  %13481 = vmatprep.mubr.msk.f32.mxu1 %vm187_vm0, %v178_v38  ;;  %v42_v33 = vld [vmem:[%s19677_s0 + $0xa8] sm:$0xff]  ;;  %v3443_v38 = vld [vmem:[%s19677_s0 + $0x15b] sm:$0xff] }
  0xa9   :  { %13882 = vmatprep.mubr.msk.f32.mxu0 %vm187_vm0, %v3410_v35  ;;  %v43_v35 = vld [vmem:[%s19677_s0 + $0xb0] sm:$0xff] }
  0xab   :  { %13482 = vmatmul.mubr.msk.f32.gmra.mrb[74].mxu1 %vm187_vm0, %v179_v40  ;;  %v3444_v40 = vld [vmem:[%s19677_s0 + $0x163] sm:$0xff] }
  0xac   :  { %13883 = vmatmul.mubr.msk.f32.gmra.mrb[8].mxu0 %vm187_vm0, %v3411_v37  ;;  %13484 = vmatprep.mubr.msk.f32.mxu1 %vm187_vm0, %v180_v42  ;;  %v44_v37 = vld [vmem:[%s19677_s0 + $0xb8] sm:$0xff]  ;;  %v3445_v42 = vld [vmem:[%s19677_s0 + $0x16b] sm:$0xff] }
  0xad   :  { %13885 = vmatprep.mubr.msk.f32.mxu0 %vm187_vm0, %v3412_v39  ;;  %v45_v39 = vld [vmem:[%s19677_s0 + $0xc0] sm:$0xff] }
  0xaf   :  { %13485 = vmatmul.mubr.msk.f32.gmra.mrb[76].mxu1 %vm187_vm0, %v181_v44  ;;  %v3446_v44 = vld [vmem:[%s19677_s0 + $0x173] sm:$0xff] }
  0xb0   :  { %13886 = vmatmul.mubr.msk.f32.gmra.mrb[10].mxu0 %vm187_vm0, %v3413_v41  ;;  %13487 = vmatprep.mubr.msk.f32.mxu1 %vm187_vm0, %v182_v46  ;;  %v46_v41 = vld [vmem:[%s19677_s0 + $0xc8] sm:$0xff]  ;;  %v3447_v46 = vld [vmem:[%s19677_s0 + $0x17b] sm:$0xff] }
  0xb1   :  { %13888 = vmatprep.mubr.msk.f32.mxu0 %vm187_vm0, %v3414_v43  ;;  %v47_v43 = vld [vmem:[%s19677_s0 + $0xd0] sm:$0xff] }
  0xb3   :  { %13488 = vmatmul.mubr.msk.f32.gmra.mrb[78].mxu1 %vm187_vm0, %v183_v48  ;;  %v3448_v48 = vld [vmem:[%s19677_s0 + $0x183] sm:$0xff] }
  0xb4   :  { %13889 = vmatmul.mubr.msk.f32.gmra.mrb[12].mxu0 %vm187_vm0, %v3415_v45  ;;  %13490 = vmatprep.mubr.msk.f32.mxu1 %vm187_vm0, %v184_v50  ;;  %v48_v45 = vld [vmem:[%s19677_s0 + $0xd8] sm:$0xff]  ;;  %v3449_v50 = vld [vmem:[%s19677_s0 + $0x18b] sm:$0xff] }
  0xb5   :  { %13891 = vmatprep.mubr.msk.f32.mxu0 %vm187_vm0, %v3416_v47  ;;  %v49_v47 = vld [vmem:[%s19677_s0 + $0xe0] sm:$0xff] }
  0xb7   :  { %13491 = vmatmul.mubr.msk.f32.gmra.mrb[80].mxu1 %vm187_vm0, %v185_v52  ;;  %v3450_v52 = vld [vmem:[%s19677_s0 + $0x193] sm:$0xff] }
  0xb8   :  { %13892 = vmatmul.mubr.msk.f32.gmra.mrb[14].mxu0 %vm187_vm0, %v3417_v49  ;;  %13495 = vmatprep.mubr.msk.f32.mxu1 %vm187_vm0, %v21_v54  ;;  %v50_v49 = vld [vmem:[%s19677_s0 + $0xe8] sm:$0xff]  ;;  %v3451_v54 = vld [vmem:[%s19677_s0 + $0x19b] sm:$0xff] }
  0xb9   :  { %13894 = vmatprep.mubr.msk.f32.mxu0 %vm187_vm0, %v3418_v51  ;;  %v51_v51 = vld [vmem:[%s19677_s0 + $0xf0] sm:$0xff] }
  0xbb   :  { %13496 = vmatmul.mubr.msk.f32.vlgmr.msra.gmra.mrb[0].mxu1 %vm187_vm0, %v22_v56  ;;  %v3452_v56 = vld [vmem:[%s19677_s0 + $0x1a3] sm:$0xff] }
  0xbc   :  { %13895 = vmatmul.mubr.msk.f32.gmra.mrb[16].mxu0 %vm187_vm0, %v3419_v53  ;;  %13498 = vmatprep.mubr.msk.f32.mxu1 %vm187_vm0, %v23_v58  ;;  %v52_v53 = vld [vmem:[%s19677_s0 + $0xf8] sm:$0xff]  ;;  %v3453_v58 = vld [vmem:[%s19677_s0 + $0x1ab] sm:$0xff] }
  0xbd   :  { %13897 = vmatprep.mubr.msk.f32.mxu0 %vm187_vm0, %v3420_v55  ;;  %v53_v55 = vld [vmem:[%s19677_s0 + $0x100] sm:$0xff] }
  0xbf   :  { %13499 = vmatmul.mubr.msk.f32.gmra.mrb[2].mxu1 %vm187_vm0, %v24_v60  ;;  %v3454_v60 = vld [vmem:[%s19677_s0 + $0x1b3] sm:$0xff] }
  0xc0   :  { %13898 = vmatmul.mubr.msk.f32.gmra.mrb[18].mxu0 %vm187_vm0, %v3421_v57  ;;  %13501 = vmatprep.mubr.msk.f32.mxu1 %vm187_vm0, %v25_v63  ;;  %v54_v57 = vld [vmem:[%s19677_s0 + $0x108] sm:$0xff]  ;;  %v3455_v63 = vld [vmem:[%s19677_s0 + $0x1bb] sm:$0xff] }
  0xc1   :  { %13900 = vmatprep.mubr.msk.f32.mxu0 %vm187_vm0, %v3422_v59  ;;  %v55_v59 = vld [vmem:[%s19677_s0 + $0x110] sm:$0xff] }
  0xc3   :  { %13502 = vmatmul.mubr.msk.f32.gmra.mrb[4].mxu1 %vm187_vm0, %v26_v1  ;;  %v3456_v1 = vld [vmem:[%s19677_s0 + $0x1c3] sm:$0xff] }
  0xc4   :  { %13901 = vmatmul.mubr.msk.f32.gmra.mrb[20].mxu0 %vm187_vm0, %v3423_v62  ;;  %13504 = vmatprep.mubr.msk.f32.mxu1 %vm187_vm0, %v27_v3  ;;  %v56_v62 = vld [vmem:[%s19677_s0 + $0x118] sm:$0xff]  ;;  %v3457_v3 = vld [vmem:[%s19677_s0 + $0x1cb] sm:$0xff] }
  0xc5   :  { %13903 = vmatprep.mubr.msk.f32.mxu0 %vm187_vm0, %v3424_v0  ;;  %v57_v0 = vld [vmem:[%s19677_s0 + $0x120] sm:$0xff] }
  0xc7   :  { %13505 = vmatmul.mubr.msk.f32.gmra.mrb[6].mxu1 %vm187_vm0, %v28_v5  ;;  %v3458_v5 = vld [vmem:[%s19677_s0 + $0x1d3] sm:$0xff] }
  0xc8   :  { %13904 = vmatmul.mubr.msk.f32.gmra.mrb[22].mxu0 %vm187_vm0, %v3425_v2  ;;  %13507 = vmatprep.mubr.msk.f32.mxu1 %vm187_vm0, %v29_v7  ;;  %v58_v2 = vld [vmem:[%s19677_s0 + $0x128] sm:$0xff]  ;;  %v3459_v7 = vld [vmem:[%s19677_s0 + $0x1db] sm:$0xff] }
  0xc9   :  { %13906 = vmatprep.mubr.msk.f32.mxu0 %vm187_vm0, %v3426_v4  ;;  %v59_v4 = vld [vmem:[%s19677_s0 + $0x130] sm:$0xff] }
  0xcb   :  { %13508 = vmatmul.mubr.msk.f32.gmra.mrb[8].mxu1 %vm187_vm0, %v30_v9  ;;  %v3460_v9 = vld [vmem:[%s19677_s0 + $0x1e3] sm:$0xff] }
  0xcc   :  { %13907 = vmatmul.mubr.msk.f32.gmra.mrb[24].mxu0 %vm187_vm0, %v3427_v6  ;;  %13510 = vmatprep.mubr.msk.f32.mxu1 %vm187_vm0, %v31_v11  ;;  %v60_v6 = vld [vmem:[%s19677_s0 + $0x138] sm:$0xff]  ;;  %v3461_v11 = vld [vmem:[%s19677_s0 + $0x1eb] sm:$0xff] }
  0xcd   :  { %13909 = vmatprep.mubr.msk.f32.mxu0 %vm187_vm0, %v3428_v8  ;;  %v61_v8 = vld [vmem:[%s19677_s0 + $0x140] sm:$0xff] }
  0xcf   :  { %13511 = vmatmul.mubr.msk.f32.gmra.mrb[10].mxu1 %vm187_vm0, %v32_v13  ;;  %v3462_v13 = vld [vmem:[%s19677_s0 + $0x1f3] sm:$0xff] }
  0xd0   :  { %13910 = vmatmul.mubr.msk.f32.gmra.mrb[26].mxu0 %vm187_vm0, %v3429_v10  ;;  %13513 = vmatprep.mubr.msk.f32.mxu1 %vm187_vm0, %v33_v15  ;;  %v62_v10 = vld [vmem:[%s19677_s0 + $0x148] sm:$0xff]  ;;  %v3463_v15 = vld [vmem:[%s19677_s0 + $0x1fb] sm:$0xff] }
  0xd1   :  { %13912 = vmatprep.mubr.msk.f32.mxu0 %vm187_vm0, %v3430_v12  ;;  %v63_v12 = vld [vmem:[%s19677_s0 + $0x150] sm:$0xff] }
  0xd3   :  { %13514 = vmatmul.mubr.msk.f32.gmra.mrb[12].mxu1 %vm187_vm0, %v34_v17  ;;  %v3464_v17 = vld [vmem:[%s19677_s0 + $0x203] sm:$0xff] }
  0xd4   :  { %13913 = vmatmul.mubr.msk.f32.gmra.mrb[28].mxu0 %vm187_vm0, %v3431_v14  ;;  %13516 = vmatprep.mubr.msk.f32.mxu1 %vm187_vm0, %v35_v19  ;;  %v64_v14 = vld [vmem:[%s19677_s0 + $0x158] sm:$0xff]  ;;  %v3465_v19 = vld [vmem:[%s19677_s0 + $0x20b] sm:$0xff] }
  0xd5   :  { %13915 = vmatprep.mubr.msk.f32.mxu0 %vm187_vm0, %v3432_v16  ;;  %v65_v16 = vld [vmem:[%s19677_s0 + $0x160] sm:$0xff] }
  0xd7   :  { %13517 = vmatmul.mubr.msk.f32.gmra.mrb[14].mxu1 %vm187_vm0, %v36_v21  ;;  %v3466_v21 = vld [vmem:[%s19677_s0 + $0x213] sm:$0xff] }
  0xd8   :  { %13916 = vmatmul.mubr.msk.f32.gmra.mrb[30].mxu0 %vm187_vm0, %v3433_v18  ;;  %13519 = vmatprep.mubr.msk.f32.mxu1 %vm187_vm0, %v37_v23  ;;  %v66_v18 = vld [vmem:[%s19677_s0 + $0x168] sm:$0xff]  ;;  %v3467_v23 = vld [vmem:[%s19677_s0 + $0x21b] sm:$0xff] }
  0xd9   :  { %13918 = vmatprep.mubr.msk.f32.mxu0 %vm187_vm0, %v3434_v20  ;;  %v67_v20 = vld [vmem:[%s19677_s0 + $0x170] sm:$0xff] }
  0xdb   :  { %13520 = vmatmul.mubr.msk.f32.gmra.mrb[16].mxu1 %vm187_vm0, %v38_v25  ;;  %v3468_v25 = vld [vmem:[%s19677_s0 + $0x223] sm:$0xff] }
  0xdc   :  { %13919 = vmatmul.mubr.msk.f32.gmra.mrb[32].mxu0 %vm187_vm0, %v3435_v22  ;;  %13522 = vmatprep.mubr.msk.f32.mxu1 %vm187_vm0, %v39_v26  ;;  %v68_v22 = vld [vmem:[%s19677_s0 + $0x178] sm:$0xff]  ;;  %v3469_v26 = vld [vmem:[%s19677_s0 + $0x22b] sm:$0xff] }
  0xdd   :  { %13921 = vmatprep.mubr.msk.f32.mxu0 %vm187_vm0, %v3436_v24  ;;  %v69_v24 = vld [vmem:[%s19677_s0 + $0x180] sm:$0xff] }
  0xdf   :  { %13523 = vmatmul.mubr.msk.f32.gmra.mrb[18].mxu1 %vm187_vm0, %v40_v29  ;;  %v3470_v29 = vld [vmem:[%s19677_s0 + $0x233] sm:$0xff] }
  0xe0   :  { %13922 = vmatmul.mubr.msk.f32.gmra.mrb[34].mxu0 %vm187_vm0, %v3437_v27  ;;  %13525 = vmatprep.mubr.msk.f32.mxu1 %vm187_vm0, %v41_v31  ;;  %v70_v27 = vld [vmem:[%s19677_s0 + $0x188] sm:$0xff]  ;;  %v3471_v31 = vld [vmem:[%s19677_s0 + $0x23b] sm:$0xff] }
  0xe1   :  { %13924 = vmatprep.mubr.msk.f32.mxu0 %vm187_vm0, %v3438_v28  ;;  %v71_v28 = vld [vmem:[%s19677_s0 + $0x190] sm:$0xff] }
  0xe3   :  { %13526 = vmatmul.mubr.msk.f32.gmra.mrb[20].mxu1 %vm187_vm0, %v42_v33  ;;  %v3472_v33 = vld [vmem:[%s19677_s0 + $0x243] sm:$0xff] }
  0xe4   :  { %13925 = vmatmul.mubr.msk.f32.gmra.mrb[36].mxu0 %vm187_vm0, %v3439_v30  ;;  %13528 = vmatprep.mubr.msk.f32.mxu1 %vm187_vm0, %v43_v35  ;;  %v72_v30 = vld [vmem:[%s19677_s0 + $0x198] sm:$0xff]  ;;  %v3473_v35 = vld [vmem:[%s19677_s0 + $0x24b] sm:$0xff] }
  0xe5   :  { %13927 = vmatprep.mubr.msk.f32.mxu0 %vm187_vm0, %v3440_v32  ;;  %v73_v32 = vld [vmem:[%s19677_s0 + $0x1a0] sm:$0xff] }
  0xe7   :  { %13529 = vmatmul.mubr.msk.f32.gmra.mrb[22].mxu1 %vm187_vm0, %v44_v37  ;;  %v3474_v37 = vld [vmem:[%s19677_s0 + $0x253] sm:$0xff] }
  0xe8   :  { %13928 = vmatmul.mubr.msk.f32.gmra.mrb[38].mxu0 %vm187_vm0, %v3441_v34  ;;  %13531 = vmatprep.mubr.msk.f32.mxu1 %vm187_vm0, %v45_v39  ;;  %v74_v34 = vld [vmem:[%s19677_s0 + $0x1a8] sm:$0xff]  ;;  %v3475_v39 = vld [vmem:[%s19677_s0 + $0x25b] sm:$0xff] }
  0xe9   :  { %13930 = vmatprep.mubr.msk.f32.mxu0 %vm187_vm0, %v3442_v36  ;;  %v75_v36 = vld [vmem:[%s19677_s0 + $0x1b0] sm:$0xff] }
  0xeb   :  { %13532 = vmatmul.mubr.msk.f32.gmra.mrb[24].mxu1 %vm187_vm0, %v46_v41  ;;  %v3476_v41 = vld [vmem:[%s19677_s0 + $0x263] sm:$0xff] }
  0xec   :  { %13931 = vmatmul.mubr.msk.f32.gmra.mrb[40].mxu0 %vm187_vm0, %v3443_v38  ;;  %13534 = vmatprep.mubr.msk.f32.mxu1 %vm187_vm0, %v47_v43  ;;  %v76_v38 = vld [vmem:[%s19677_s0 + $0x1b8] sm:$0xff]  ;;  %v3477_v43 = vld [vmem:[%s19677_s0 + $0x26b] sm:$0xff] }
  0xed   :  { %13933 = vmatprep.mubr.msk.f32.mxu0 %vm187_vm0, %v3444_v40  ;;  %v77_v40 = vld [vmem:[%s19677_s0 + $0x1c0] sm:$0xff] }
  0xef   :  { %13535 = vmatmul.mubr.msk.f32.gmra.mrb[26].mxu1 %vm187_vm0, %v48_v45  ;;  %v3478_v45 = vld [vmem:[%s19677_s0 + $0x273] sm:$0xff] }
  0xf0   :  { %13934 = vmatmul.mubr.msk.f32.gmra.mrb[42].mxu0 %vm187_vm0, %v3445_v42  ;;  %13537 = vmatprep.mubr.msk.f32.mxu1 %vm187_vm0, %v49_v47  ;;  %v78_v42 = vld [vmem:[%s19677_s0 + $0x1c8] sm:$0xff]  ;;  %v3479_v47 = vld [vmem:[%s19677_s0 + $0x27b] sm:$0xff] }
  0xf1   :  { %13936 = vmatprep.mubr.msk.f32.mxu0 %vm187_vm0, %v3446_v44  ;;  %v79_v44 = vld [vmem:[%s19677_s0 + $0x1d0] sm:$0xff] }
  0xf3   :  { %13538 = vmatmul.mubr.msk.f32.gmra.mrb[28].mxu1 %vm187_vm0, %v50_v49  ;;  %v3480_v49 = vld [vmem:[%s19677_s0 + $0x283] sm:$0xff] }
  0xf4   :  { %13937 = vmatmul.mubr.msk.f32.gmra.mrb[44].mxu0 %vm187_vm0, %v3447_v46  ;;  %13540 = vmatprep.mubr.msk.f32.mxu1 %vm187_vm0, %v51_v51  ;;  %v80_v46 = vld [vmem:[%s19677_s0 + $0x1d8] sm:$0xff]  ;;  %v3481_v51 = vld [vmem:[%s19677_s0 + $0x28b] sm:$0xff] }
  0xf5   :  { %13939 = vmatprep.mubr.msk.f32.mxu0 %vm187_vm0, %v3448_v48  ;;  %v81_v48 = vld [vmem:[%s19677_s0 + $0x1e0] sm:$0xff] }
  0xf7   :  { %13541 = vmatmul.mubr.msk.f32.gmra.mrb[30].mxu1 %vm187_vm0, %v52_v53  ;;  %v3482_v53 = vld [vmem:[%s19677_s0 + $0x293] sm:$0xff] }
  0xf8   :  { %13940 = vmatmul.mubr.msk.f32.gmra.mrb[46].mxu0 %vm187_vm0, %v3449_v50  ;;  %13543 = vmatprep.mubr.msk.f32.mxu1 %vm187_vm0, %v53_v55  ;;  %v82_v50 = vld [vmem:[%s19677_s0 + $0x1e8] sm:$0xff]  ;;  %v3483_v55 = vld [vmem:[%s19677_s0 + $0x29b] sm:$0xff] }
  0xf9   :  { %13942 = vmatprep.mubr.msk.f32.mxu0 %vm187_vm0, %v3450_v52  ;;  %v83_v52 = vld [vmem:[%s19677_s0 + $0x1f0] sm:$0xff] }
  0xfb   :  { %13544 = vmatmul.mubr.msk.f32.gmra.mrb[32].mxu1 %vm187_vm0, %v54_v57  ;;  %v4288_v57 = vld [vmem:[%s19677_s0 + $0x14] sm:$0xff] }
  0xfc   :  { %13943 = vmatmul.mubr.msk.f32.gmra.mrb[48].mxu0 %vm187_vm0, %v3451_v54  ;;  %13546 = vmatprep.mubr.msk.f32.mxu1 %vm187_vm0, %v55_v59  ;;  %v84_v54 = vld [vmem:[%s19677_s0 + $0x1f8] sm:$0xff] }
  0xfd   :  { %13945 = vmatprep.mubr.msk.f32.mxu0 %vm187_vm0, %v3452_v56  ;;  %v85_v56 = vld [vmem:[%s19677_s0 + $0x200] sm:$0xff] }
  0xfe   :  { %v4289_v59 = vld [vmem:[%s19677_s0 + $0x1c] sm:$0xff] }
  0xff   :  { %13547 = vmatmul.mubr.msk.f32.gmra.mrb[34].mxu1 %vm187_vm0, %v56_v62  ;;  %v17107_v62 = vld [vmem:[%s19677_s0 + $0x24] sm:$0xff] }
 0x100   :  { %13946 = vmatmul.mubr.msk.f32.gmra.mrb[50].mxu0 %vm187_vm0, %v3453_v58  ;;  %13549 = vmatprep.mubr.msk.f32.mxu1 %vm187_vm0, %v57_v0  ;;  %v86_v58 = vld [vmem:[%s19677_s0 + $0x208] sm:$0xff] }
 0x101   :  { %13948 = vmatprep.mubr.msk.f32.mxu0 %vm187_vm0, %v3454_v60  ;;  %v87_v60 = vld [vmem:[%s19677_s0 + $0x210] sm:$0xff] }
 0x102   :  { %v17121_v0 = vld [vmem:[%s19677_s0 + $0x2c] sm:$0xff] }
 0x103   :  { %13550 = vmatmul.mubr.msk.f32.gmra.mrb[36].mxu1 %vm187_vm0, %v58_v2  ;;  %v17129_v2 = vld [vmem:[%s19677_s0 + $0x34] sm:$0xff] }
 0x104   :  { %13949 = vmatmul.mubr.msk.f32.gmra.mrb[52].mxu0 %vm187_vm0, %v3455_v63  ;;  %13552 = vmatprep.mubr.msk.f32.mxu1 %vm187_vm0, %v59_v4  ;;  %v88_v63 = vld [vmem:[%s19677_s0 + $0x218] sm:$0xff]  ;;  %v91_v4 = vld [vmem:[%s19677_s0 + $0x230] sm:$0xff] }
 0x105   :  { %13951 = vmatprep.mubr.msk.f32.mxu0 %vm187_vm0, %v3456_v1  ;;  %v89_v1 = vld [vmem:[%s19677_s0 + $0x220] sm:$0xff] }
 0x107   :  { %13553 = vmatmul.mubr.msk.f32.gmra.mrb[38].mxu1 %vm187_vm0, %v60_v6  ;;  %v92_v6 = vld [vmem:[%s19677_s0 + $0x238] sm:$0xff] }
 0x108   :  { %13952 = vmatmul.mubr.msk.f32.gmra.mrb[54].mxu0 %vm187_vm0, %v3457_v3  ;;  %13555 = vmatprep.mubr.msk.f32.mxu1 %vm187_vm0, %v61_v8  ;;  %v17143_v3 = vld [vmem:[%s19677_s0 + $0x3c] sm:$0xff]  ;;  %v17168_v8 = vld [vmem:[%s19677_s0 + $0x4c] sm:$0xff] }
 0x109   :  { %13954 = vmatprep.mubr.msk.f32.mxu0 %vm187_vm0, %v3458_v5  ;;  %v17151_v5 = vld [vmem:[%s19677_s0 + $0x44] sm:$0xff] }
 0x10b   :  { %13556 = vmatmul.mubr.msk.f32.gmra.mrb[40].mxu1 %vm187_vm0, %v62_v10  ;;  %v17176_v10 = vld [vmem:[%s19677_s0 + $0x54] sm:$0xff] }
 0x10c   :  { %13955 = vmatmul.mubr.msk.f32.gmra.mrb[56].mxu0 %vm187_vm0, %v3459_v7  ;;  %13558 = vmatprep.mubr.msk.f32.mxu1 %vm187_vm0, %v63_v12  ;;  %v1712_v7 = vld [vmem:[%s19678_s1 + $0x10] sm:$0xff]  ;;  %v94_v12 = vld [vmem:[%s19677_s0 + $0x248] sm:$0xff] }
 0x10d   :  { %13957 = vmatprep.mubr.msk.f32.mxu0 %vm187_vm0, %v3460_v9  ;;  %v93_v9 = vld [vmem:[%s19677_s0 + $0x240] sm:$0xff]  ;;  %13618 = vmatprep.subr.mxu1 %v1712_v7 }
 0x10e   :  { %13619 = vmatpush3.msra.mxu1 %v1712_v7  ;;  %v17485_v7 = vld [vmem:[%s19677_s0 + $0x12c] sm:$0xff] }
 0x10f   :  { %13559 = vmatmul.mubr.msk.f32.gmra.mrb[42].mxu1 %vm187_vm0, %v64_v14  ;;  %v95_v14 = vld [vmem:[%s19677_s0 + $0x250] sm:$0xff] }
 0x110   :  { %13958 = vmatmul.mubr.msk.f32.gmra.mrb[58].mxu0 %vm187_vm0, %v3461_v11  ;;  %13561 = vmatprep.mubr.msk.f32.mxu1 %vm187_vm0, %v65_v16  ;;  %v15786_v11 = vld [vmem:[%s19678_s1 + $0x18] sm:$0xff] }
 0x111   :  { %13960 = vmatprep.mubr.msk.f32.mxu0 %vm187_vm0, %v3462_v13  ;;  %14916 = vmatprep.subr.mxu1 %v15786_v11  ;;  %v17193_v13 = vld [vmem:[%s19677_s0 + $0x5c] sm:$0xff] }
 0x112   :  { %v96_v16 = vld [vmem:[%s19677_s0 + $0x258] sm:$0xff] }
 0x113   :  { %13562 = vmatmul.mubr.msk.f32.gmra.mrb[44].mxu1 %vm187_vm0, %v66_v18  ;;  %v97_v18 = vld [vmem:[%s19677_s0 + $0x260] sm:$0xff] }
 0x114   :  { %13961 = vmatmul.mubr.msk.f32.gmra.mrb[60].mxu0 %vm187_vm0, %v3463_v15  ;;  %13564 = vmatprep.mubr.msk.f32.mxu1 %vm187_vm0, %v67_v20  ;;  %v17201_v15 = vld [vmem:[%s19677_s0 + $0x64] sm:$0xff] }
 0x115   :  { %13963 = vmatprep.mubr.msk.f32.mxu0 %vm187_vm0, %v3464_v17  ;;  %v17215_v17 = vld [vmem:[%s19677_s0 + $0x6c] sm:$0xff] }
 0x116   :  { %v98_v20 = vld [vmem:[%s19677_s0 + $0x268] sm:$0xff] }
 0x117   :  { %13565 = vmatmul.mubr.msk.f32.gmra.mrb[46].mxu1 %vm187_vm0, %v68_v22  ;;  %v99_v22 = vld [vmem:[%s19677_s0 + $0x270] sm:$0xff] }
 0x118   :  { %13964 = vmatmul.mubr.msk.f32.gmra.mrb[62].mxu0 %vm187_vm0, %v3465_v19  ;;  %13567 = vmatprep.mubr.msk.f32.mxu1 %vm187_vm0, %v69_v24  ;;  %v17223_v19 = vld [vmem:[%s19677_s0 + $0x74] sm:$0xff] }
 0x119   :  { %13966 = vmatprep.mubr.msk.f32.mxu0 %vm187_vm0, %v3466_v21  ;;  %v17237_v21 = vld [vmem:[%s19677_s0 + $0x7c] sm:$0xff] }
 0x11a   :  { %v100_v24 = vld [vmem:[%s19677_s0 + $0x278] sm:$0xff] }
 0x11b   :  { %13568 = vmatmul.mubr.msk.f32.gmra.mrb[48].mxu1 %vm187_vm0, %v70_v27  ;;  %v101_v27 = vld [vmem:[%s19677_s0 + $0x280] sm:$0xff] }
 0x11c   :  { %13967 = vmatmul.mubr.msk.f32.gmra.mrb[64].mxu0 %vm187_vm0, %v3467_v23  ;;  %13570 = vmatprep.mubr.msk.f32.mxu1 %vm187_vm0, %v71_v28  ;;  %v17245_v23 = vld [vmem:[%s19677_s0 + $0x84] sm:$0xff] }
 0x11d   :  { %13969 = vmatprep.mubr.msk.f32.mxu0 %vm187_vm0, %v3468_v25  ;;  %v17259_v25 = vld [vmem:[%s19677_s0 + $0x8c] sm:$0xff] }
 0x11e   :  { %v102_v28 = vld [vmem:[%s19677_s0 + $0x288] sm:$0xff] }
 0x11f   :  { %13571 = vmatmul.mubr.msk.f32.gmra.mrb[50].mxu1 %vm187_vm0, %v72_v30  ;;  %v1630_v30 = vld [vmem:[%s19677_s0 + $0x2] sm:$0xff] }
 0x120   :  { %13970 = vmatmul.mubr.msk.f32.gmra.mrb[66].mxu0 %vm187_vm0, %v3469_v26  ;;  %13573 = vmatprep.mubr.msk.f32.mxu1 %vm187_vm0, %v73_v32  ;;  %v17267_v26 = vld [vmem:[%s19677_s0 + $0x94] sm:$0xff]  ;;  %v1631_v32 = vld [vmem:[%s19677_s0 + $0xa] sm:$0xff] }
 0x121   :  { %13972 = vmatprep.mubr.msk.f32.mxu0 %vm187_vm0, %v3470_v29  ;;  %v17281_v29 = vld [vmem:[%s19677_s0 + $0x9c] sm:$0xff] }
 0x123   :  { %13574 = vmatmul.mubr.msk.f32.gmra.mrb[52].mxu1 %vm187_vm0, %v74_v34  ;;  %v1632_v34 = vld [vmem:[%s19677_s0 + $0x12] sm:$0xff] }
 0x124   :  { %13973 = vmatmul.mubr.msk.f32.gmra.mrb[68].mxu0 %vm187_vm0, %v3471_v31  ;;  %13576 = vmatprep.mubr.msk.f32.mxu1 %vm187_vm0, %v75_v36  ;;  %v17289_v31 = vld [vmem:[%s19677_s0 + $0xa4] sm:$0xff]  ;;  %v1633_v36 = vld [vmem:[%s19677_s0 + $0x1a] sm:$0xff] }
 0x125   :  { %13975 = vmatprep.mubr.msk.f32.mxu0 %vm187_vm0, %v3472_v33  ;;  %v17303_v33 = vld [vmem:[%s19677_s0 + $0xac] sm:$0xff] }
 0x127   :  { %13577 = vmatmul.mubr.msk.f32.gmra.mrb[54].mxu1 %vm187_vm0, %v76_v38  ;;  %v17330_v38 = vld [vmem:[%s19677_s0 + $0xbc] sm:$0xff] }
 0x128   :  { %13976 = vmatmul.mubr.msk.f32.gmra.mrb[70].mxu0 %vm187_vm0, %v3473_v35  ;;  %13579 = vmatprep.mubr.msk.f32.mxu1 %vm187_vm0, %v77_v40  ;;  %v17311_v35 = vld [vmem:[%s19677_s0 + $0xb4] sm:$0xff]  ;;  %v17339_v40 = vld [vmem:[%s19677_s0 + $0xc4] sm:$0xff] }
 0x129   :  { %13978 = vmatprep.mubr.msk.f32.mxu0 %vm187_vm0, %v3474_v37  ;;  %v17323_v37 = vld [vmem:[%s19678_s1 + $0x38] sm:$0xff] }
 0x12b   :  { %13580 = vmatmul.mubr.msk.f32.gmra.mrb[56].mxu1 %vm187_vm0, %v78_v42  ;;  %v17353_v42 = vld [vmem:[%s19677_s0 + $0xcc] sm:$0xff] }
 0x12c   :  { %13979 = vmatmul.mubr.msk.f32.gmra.mrb[72].mxu0 %vm187_vm0, %v3475_v39  ;;  %13582 = vmatprep.mubr.msk.f32.mxu1 %vm187_vm0, %v79_v44  ;;  %v1634_v39 = vld [vmem:[%s19677_s0 + $0x22] sm:$0xff]  ;;  %v17361_v44 = vld [vmem:[%s19677_s0 + $0xd4] sm:$0xff] }
 0x12d   :  { %13981 = vmatprep.mubr.msk.f32.mxu0 %vm187_vm0, %v3476_v41  ;;  %v1635_v41 = vld [vmem:[%s19677_s0 + $0x2a] sm:$0xff] }
 0x12f   :  { %13583 = vmatmul.mubr.msk.f32.gmra.mrb[58].mxu1 %vm187_vm0, %v80_v46  ;;  %v17375_v46 = vld [vmem:[%s19677_s0 + $0xdc] sm:$0xff] }
 0x130   :  { %13982 = vmatmul.mubr.msk.f32.gmra.mrb[74].mxu0 %vm187_vm0, %v3477_v43  ;;  %13585 = vmatprep.mubr.msk.f32.mxu1 %vm187_vm0, %v81_v48  ;;  %v1636_v43 = vld [vmem:[%s19677_s0 + $0x32] sm:$0xff]  ;;  %v17383_v48 = vld [vmem:[%s19677_s0 + $0xe4] sm:$0xff] }
 0x131   :  { %13984 = vmatprep.mubr.msk.f32.mxu0 %vm187_vm0, %v3478_v45  ;;  %v1637_v45 = vld [vmem:[%s19677_s0 + $0x3a] sm:$0xff] }
 0x133   :  { %13586 = vmatmul.mubr.msk.f32.gmra.mrb[60].mxu1 %vm187_vm0, %v82_v50  ;;  %v17397_v50 = vld [vmem:[%s19677_s0 + $0xec] sm:$0xff] }
 0x134   :  { %13985 = vmatmul.mubr.msk.f32.gmra.mrb[76].mxu0 %vm187_vm0, %v3479_v47  ;;  %13588 = vmatprep.mubr.msk.f32.mxu1 %vm187_vm0, %v83_v52  ;;  %v1638_v47 = vld [vmem:[%s19677_s0 + $0x42] sm:$0xff]  ;;  %v17405_v52 = vld [vmem:[%s19677_s0 + $0xf4] sm:$0xff] }
 0x135   :  { %13987 = vmatprep.mubr.msk.f32.mxu0 %vm187_vm0, %v3480_v49  ;;  %v1639_v49 = vld [vmem:[%s19677_s0 + $0x4a] sm:$0xff] }
 0x137   :  { %13589 = vmatmul.mubr.msk.f32.gmra.mrb[62].mxu1 %vm187_vm0, %v84_v54  ;;  %v17419_v54 = vld [vmem:[%s19677_s0 + $0xfc] sm:$0xff] }
 0x138   :  { %13988 = vmatmul.mubr.msk.f32.gmra.mrb[78].mxu0 %vm187_vm0, %v3481_v51  ;;  %13591 = vmatprep.mubr.msk.f32.mxu1 %vm187_vm0, %v85_v56  ;;  %v1640_v51 = vld [vmem:[%s19677_s0 + $0x52] sm:$0xff]  ;;  %v17427_v56 = vld [vmem:[%s19677_s0 + $0x104] sm:$0xff] }
 0x139   :  { %13990 = vmatprep.mubr.msk.f32.mxu0 %vm187_vm0, %v3482_v53  ;;  %v1641_v53 = vld [vmem:[%s19677_s0 + $0x5a] sm:$0xff] }
 0x13b   :  { %13592 = vmatmul.mubr.msk.f32.gmra.mrb[64].mxu1 %vm187_vm0, %v86_v58  ;;  %v17441_v58 = vld [vmem:[%s19677_s0 + $0x10c] sm:$0xff] }
 0x13c   :  { %13991 = vmatmul.mubr.msk.f32.gmra.mrb[80].mxu0 %vm187_vm0, %v3483_v55  ;;  %13594 = vmatprep.mubr.msk.f32.mxu1 %vm187_vm0, %v87_v60  ;;  %v1642_v55 = vld [vmem:[%s19677_s0 + $0x62] sm:$0xff]  ;;  %v17449_v60 = vld [vmem:[%s19677_s0 + $0x114] sm:$0xff] }
 0x13d   :  { %13995 = vmatprep.mubr.msk.f32.mxu0 %vm187_vm0, %v4288_v57  ;;  %v1643_v57 = vld [vmem:[%s19677_s0 + $0x6a] sm:$0xff] }
 0x13f   :  { %13595 = vmatmul.mubr.msk.f32.gmra.mrb[66].mxu1 %vm187_vm0, %v88_v63  ;;  %v1645_v63 = vld [vmem:[%s19677_s0 + $0x7a] sm:$0xff] }
 0x140   :  { %13996 = vmatmul.mubr.msk.f32.vlgmr.msra.gmra.mrb[0].mxu0 %vm187_vm0, %v4289_v59  ;;  %13597 = vmatprep.mubr.msk.f32.mxu1 %vm187_vm0, %v89_v1  ;;  %v1644_v59 = vld [vmem:[%s19677_s0 + $0x72] sm:$0xff]  ;;  %v17463_v1 = vld [vmem:[%s19677_s0 + $0x11c] sm:$0xff] }
 0x141   :  { %14119 = vmatpush3.msra.mxu0 %v16598_v61  ;;  %13998 = vmatprep.mubr.msk.f32.mxu0 %vm187_vm0, %v17107_v62  ;;  %v90_v61 = vld [vmem:[%s19677_s0 + $0x228] sm:$0xff] }
 0x142   :  { %14243 = vmatprep.subr.mxu0 %v17323_v37 }
 0x143   :  { %13598 = vmatmul.mubr.msk.f32.gmra.mrb[68].mxu1 %vm187_vm0, %v90_v61  ;;  %v1646_v61 = vld [vmem:[%s19677_s0 + $0x82] sm:$0xff] }
 0x144   :  { %13999 = vmatmul.mubr.msk.f32.gmra.mrb[2].mxu0 %vm187_vm0, %v17121_v0  ;;  %13600 = vmatprep.mubr.msk.f32.mxu1 %vm187_vm0, %v91_v4  ;;  %v17471_v4 = vld [vmem:[%s19677_s0 + $0x124] sm:$0xff] }
 0x145   :  { %14001 = vmatprep.mubr.msk.f32.mxu0 %vm187_vm0, %v17129_v2 }
 0x147   :  { %13601 = vmatmul.mubr.msk.f32.gmra.mrb[70].mxu1 %vm187_vm0, %v92_v6  ;;  %v1647_v6 = vld [vmem:[%s19677_s0 + $0x8a] sm:$0xff] }
 0x148   :  { %14002 = vmatmul.mubr.msk.f32.gmra.mrb[4].mxu0 %vm187_vm0, %v17143_v3  ;;  %13603 = vmatprep.mubr.msk.f32.mxu1 %vm187_vm0, %v93_v9  ;;  %v1648_v9 = vld [vmem:[%s19677_s0 + $0x92] sm:$0xff] }
 0x149   :  { %14004 = vmatprep.mubr.msk.f32.mxu0 %vm187_vm0, %v17151_v5 }
 0x14b   :  { %13604 = vmatmul.mubr.msk.f32.gmra.mrb[72].mxu1 %vm187_vm0, %v94_v12  ;;  %v1649_v12 = vld [vmem:[%s19677_s0 + $0x9a] sm:$0xff] }
 0x14c   :  { %14005 = vmatmul.mubr.msk.f32.gmra.mrb[6].mxu0 %vm187_vm0, %v17168_v8  ;;  %13606 = vmatprep.mubr.msk.f32.mxu1 %vm187_vm0, %v95_v14  ;;  %v17507_v14 = vld [vmem:[%s19677_s0 + $0x13c] sm:$0xff] }
 0x14d   :  { %14007 = vmatprep.mubr.msk.f32.mxu0 %vm187_vm0, %v17176_v10 }
 0x14f   :  { %13607 = vmatmul.mubr.msk.f32.gmra.mrb[74].mxu1 %vm187_vm0, %v96_v16  ;;  %v1650_v16 = vld [vmem:[%s19677_s0 + $0xa2] sm:$0xff] }
 0x150   :  { %14008 = vmatmul.mubr.msk.f32.gmra.mrb[8].mxu0 %vm187_vm0, %v17193_v13  ;;  %13609 = vmatprep.mubr.msk.f32.mxu1 %vm187_vm0, %v97_v18  ;;  %v17515_v18 = vld [vmem:[%s19677_s0 + $0x144] sm:$0xff] }
 0x151   :  { %14010 = vmatprep.mubr.msk.f32.mxu0 %vm187_vm0, %v17201_v15 }
 0x153   :  { %13610 = vmatmul.mubr.msk.f32.gmra.mrb[76].mxu1 %vm187_vm0, %v98_v20  ;;  %v1651_v20 = vld [vmem:[%s19677_s0 + $0xaa] sm:$0xff] }
 0x154   :  { %14011 = vmatmul.mubr.msk.f32.gmra.mrb[10].mxu0 %vm187_vm0, %v17215_v17  ;;  %13612 = vmatprep.mubr.msk.f32.mxu1 %vm187_vm0, %v99_v22  ;;  %v17529_v22 = vld [vmem:[%s19677_s0 + $0x14c] sm:$0xff] }
 0x155   :  { %14013 = vmatprep.mubr.msk.f32.mxu0 %vm187_vm0, %v17223_v19 }
 0x157   :  { %13613 = vmatmul.mubr.msk.f32.gmra.mrb[78].mxu1 %vm187_vm0, %v100_v24  ;;  %v1652_v24 = vld [vmem:[%s19677_s0 + $0xb2] sm:$0xff] }
 0x158   :  { %14014 = vmatmul.mubr.msk.f32.gmra.mrb[12].mxu0 %vm187_vm0, %v17237_v21  ;;  %13615 = vmatprep.mubr.msk.f32.mxu1 %vm187_vm0, %v101_v27  ;;  %v17537_v27 = vld [vmem:[%s19677_s0 + $0x154] sm:$0xff] }
 0x159   :  { %14016 = vmatprep.mubr.msk.f32.mxu0 %vm187_vm0, %v17245_v23 }
 0x15b   :  { %13616 = vmatmul.mubr.msk.f32.gmra.mrb[80].mxu1 %vm187_vm0, %v102_v28  ;;  %v1653_v28 = vld [vmem:[%s19677_s0 + $0xba] sm:$0xff] }
 0x15c   :  { %14017 = vmatmul.mubr.msk.f32.gmra.mrb[14].mxu0 %vm187_vm0, %v17259_v25  ;;  %13620 = vmatprep.mubr.msk.f32.mxu1 %vm187_vm0, %v1630_v30  ;;  %v17551_v30 = vld [vmem:[%s19677_s0 + $0x15c] sm:$0xff] }
 0x15d   :  { %14019 = vmatprep.mubr.msk.f32.mxu0 %vm187_vm0, %v17267_v26 }
 0x15f   :  { %13621 = vmatmul.mubr.msk.f32.vlgmr.msra.gmra.mrb[0].mxu1 %vm187_vm0, %v1631_v32  ;;  %v1654_v32 = vld [vmem:[%s19677_s0 + $0xc2] sm:$0xff] }
 0x160   :  { %14020 = vmatmul.mubr.msk.f32.gmra.mrb[16].mxu0 %vm187_vm0, %v17281_v29  ;;  %13623 = vmatprep.mubr.msk.f32.mxu1 %vm187_vm0, %v1632_v34  ;;  %v17559_v34 = vld [vmem:[%s19677_s0 + $0x164] sm:$0xff] }
 0x161   :  { %14022 = vmatprep.mubr.msk.f32.mxu0 %vm187_vm0, %v17289_v31  ;;  %14917 = vmatpush3.msra.mxu1 %v15786_v11  ;;  %v17493_v11 = vld [vmem:[%s19677_s0 + $0x134] sm:$0xff] }
 0x163   :  { %13624 = vmatmul.mubr.msk.f32.gmra.mrb[2].mxu1 %vm187_vm0, %v1633_v36  ;;  %v1655_v36 = vld [vmem:[%s19677_s0 + $0xca] sm:$0xff] }
 0x164   :  { %14023 = vmatmul.mubr.msk.f32.gmra.mrb[18].mxu0 %vm187_vm0, %v17303_v33  ;;  %13626 = vmatprep.mubr.msk.f32.mxu1 %vm187_vm0, %v1634_v39  ;;  %v17573_v39 = vld [vmem:[%s19677_s0 + $0x16c] sm:$0xff] }
 0x165   :  { %14025 = vmatprep.mubr.msk.f32.mxu0 %vm187_vm0, %v17311_v35 }
 0x167   :  { %13627 = vmatmul.mubr.msk.f32.gmra.mrb[4].mxu1 %vm187_vm0, %v1635_v41  ;;  %v1656_v41 = vld [vmem:[%s19677_s0 + $0xd2] sm:$0xff] }
 0x168   :  { %14026 = vmatmul.mubr.msk.f32.gmra.mrb[20].mxu0 %vm187_vm0, %v17330_v38  ;;  %13629 = vmatprep.mubr.msk.f32.mxu1 %vm187_vm0, %v1636_v43  ;;  %v17581_v43 = vld [vmem:[%s19677_s0 + $0x174] sm:$0xff] }
 0x169   :  { %14028 = vmatprep.mubr.msk.f32.mxu0 %vm187_vm0, %v17339_v40 }
 0x16b   :  { %13630 = vmatmul.mubr.msk.f32.gmra.mrb[6].mxu1 %vm187_vm0, %v1637_v45  ;;  %v1657_v45 = vld [vmem:[%s19677_s0 + $0xda] sm:$0xff] }
 0x16c   :  { %14029 = vmatmul.mubr.msk.f32.gmra.mrb[22].mxu0 %vm187_vm0, %v17353_v42  ;;  %13632 = vmatprep.mubr.msk.f32.mxu1 %vm187_vm0, %v1638_v47  ;;  %v17595_v47 = vld [vmem:[%s19677_s0 + $0x17c] sm:$0xff] }
 0x16d   :  { %14031 = vmatprep.mubr.msk.f32.mxu0 %vm187_vm0, %v17361_v44 }
 0x16f   :  { %13633 = vmatmul.mubr.msk.f32.gmra.mrb[8].mxu1 %vm187_vm0, %v1639_v49  ;;  %v1658_v49 = vld [vmem:[%s19677_s0 + $0xe2] sm:$0xff] }
 0x170   :  { %14032 = vmatmul.mubr.msk.f32.gmra.mrb[24].mxu0 %vm187_vm0, %v17375_v46  ;;  %13635 = vmatprep.mubr.msk.f32.mxu1 %vm187_vm0, %v1640_v51  ;;  %v17603_v51 = vld [vmem:[%s19677_s0 + $0x184] sm:$0xff] }
 0x171   :  { %14034 = vmatprep.mubr.msk.f32.mxu0 %vm187_vm0, %v17383_v48 }
 0x173   :  { %13636 = vmatmul.mubr.msk.f32.gmra.mrb[10].mxu1 %vm187_vm0, %v1641_v53  ;;  %v1659_v53 = vld [vmem:[%s19677_s0 + $0xea] sm:$0xff] }
 0x174   :  { %14035 = vmatmul.mubr.msk.f32.gmra.mrb[26].mxu0 %vm187_vm0, %v17397_v50  ;;  %13638 = vmatprep.mubr.msk.f32.mxu1 %vm187_vm0, %v1642_v55  ;;  %v17617_v55 = vld [vmem:[%s19677_s0 + $0x18c] sm:$0xff] }
 0x175   :  { %14037 = vmatprep.mubr.msk.f32.mxu0 %vm187_vm0, %v17405_v52 }
 0x177   :  { %13639 = vmatmul.mubr.msk.f32.gmra.mrb[12].mxu1 %vm187_vm0, %v1643_v57  ;;  %v1660_v57 = vld [vmem:[%s19677_s0 + $0xf2] sm:$0xff] }
 0x178   :  { %14038 = vmatmul.mubr.msk.f32.gmra.mrb[28].mxu0 %vm187_vm0, %v17419_v54  ;;  %13641 = vmatprep.mubr.msk.f32.mxu1 %vm187_vm0, %v1644_v59  ;;  %v17625_v59 = vld [vmem:[%s19677_s0 + $0x194] sm:$0xff] }
 0x179   :  { %14040 = vmatprep.mubr.msk.f32.mxu0 %vm187_vm0, %v17427_v56 }
 0x17b   :  { %13642 = vmatmul.mubr.msk.f32.gmra.mrb[14].mxu1 %vm187_vm0, %v1645_v63  ;;  %v1661_v63 = vld [vmem:[%s19677_s0 + $0xfa] sm:$0xff] }
 0x17c   :  { %14041 = vmatmul.mubr.msk.f32.gmra.mrb[30].mxu0 %vm187_vm0, %v17441_v58  ;;  %13644 = vmatprep.mubr.msk.f32.mxu1 %vm187_vm0, %v1646_v61  ;;  %v17639_v61 = vld [vmem:[%s19677_s0 + $0x19c] sm:$0xff] }
 0x17d   :  { %14043 = vmatprep.mubr.msk.f32.mxu0 %vm187_vm0, %v17449_v60 }
 0x17f   :  { %13645 = vmatmul.mubr.msk.f32.gmra.mrb[16].mxu1 %vm187_vm0, %v1647_v6  ;;  %v1662_v6 = vld [vmem:[%s19677_s0 + $0x102] sm:$0xff] }
 0x180   :  { %14044 = vmatmul.mubr.msk.f32.gmra.mrb[32].mxu0 %vm187_vm0, %v17463_v1  ;;  %13647 = vmatprep.mubr.msk.f32.mxu1 %vm187_vm0, %v1648_v9  ;;  %v17647_v9 = vld [vmem:[%s19677_s0 + $0x1a4] sm:$0xff] }
 0x181   :  { %14046 = vmatprep.mubr.msk.f32.mxu0 %vm187_vm0, %v17471_v4 }
 0x183   :  { %13648 = vmatmul.mubr.msk.f32.gmra.mrb[18].mxu1 %vm187_vm0, %v1649_v12  ;;  %v1663_v12 = vld [vmem:[%s19677_s0 + $0x10a] sm:$0xff] }
 0x184   :  { %14047 = vmatmul.mubr.msk.f32.gmra.mrb[34].mxu0 %vm187_vm0, %v17485_v7  ;;  %13650 = vmatprep.mubr.msk.f32.mxu1 %vm187_vm0, %v1650_v16  ;;  %v17661_v16 = vld [vmem:[%s19677_s0 + $0x1ac] sm:$0xff] }
 0x185   :  { %14049 = vmatprep.mubr.msk.f32.mxu0 %vm187_vm0, %v17493_v11 }
 0x187   :  { %13651 = vmatmul.mubr.msk.f32.gmra.mrb[20].mxu1 %vm187_vm0, %v1651_v20  ;;  %v1664_v20 = vld [vmem:[%s19677_s0 + $0x112] sm:$0xff] }
 0x188   :  { %14050 = vmatmul.mubr.msk.f32.gmra.mrb[36].mxu0 %vm187_vm0, %v17507_v14  ;;  %13653 = vmatprep.mubr.msk.f32.mxu1 %vm187_vm0, %v1652_v24  ;;  %v17669_v24 = vld [vmem:[%s19677_s0 + $0x1b4] sm:$0xff] }
 0x189   :  { %14052 = vmatprep.mubr.msk.f32.mxu0 %vm187_vm0, %v17515_v18 }
 0x18b   :  { %13654 = vmatmul.mubr.msk.f32.gmra.mrb[22].mxu1 %vm187_vm0, %v1653_v28  ;;  %v1665_v28 = vld [vmem:[%s19677_s0 + $0x11a] sm:$0xff] }
 0x18c   :  { %14053 = vmatmul.mubr.msk.f32.gmra.mrb[38].mxu0 %vm187_vm0, %v17529_v22  ;;  %13656 = vmatprep.mubr.msk.f32.mxu1 %vm187_vm0, %v1654_v32  ;;  %v17683_v32 = vld [vmem:[%s19677_s0 + $0x1bc] sm:$0xff] }
 0x18d   :  { %14055 = vmatprep.mubr.msk.f32.mxu0 %vm187_vm0, %v17537_v27 }
 0x18f   :  { %13657 = vmatmul.mubr.msk.f32.gmra.mrb[24].mxu1 %vm187_vm0, %v1655_v36  ;;  %v1666_v36 = vld [vmem:[%s19677_s0 + $0x122] sm:$0xff] }
 0x190   :  { %14056 = vmatmul.mubr.msk.f32.gmra.mrb[40].mxu0 %vm187_vm0, %v17551_v30  ;;  %13659 = vmatprep.mubr.msk.f32.mxu1 %vm187_vm0, %v1656_v41  ;;  %v17691_v41 = vld [vmem:[%s19677_s0 + $0x1c4] sm:$0xff] }
 0x191   :  { %14058 = vmatprep.mubr.msk.f32.mxu0 %vm187_vm0, %v17559_v34 }
 0x193   :  { %13660 = vmatmul.mubr.msk.f32.gmra.mrb[26].mxu1 %vm187_vm0, %v1657_v45  ;;  %v1667_v45 = vld [vmem:[%s19677_s0 + $0x12a] sm:$0xff] }
 0x194   :  { %14059 = vmatmul.mubr.msk.f32.gmra.mrb[42].mxu0 %vm187_vm0, %v17573_v39  ;;  %13662 = vmatprep.mubr.msk.f32.mxu1 %vm187_vm0, %v1658_v49  ;;  %v17705_v49 = vld [vmem:[%s19677_s0 + $0x1cc] sm:$0xff] }
 0x195   :  { %14061 = vmatprep.mubr.msk.f32.mxu0 %vm187_vm0, %v17581_v43 }
 0x197   :  { %13663 = vmatmul.mubr.msk.f32.gmra.mrb[28].mxu1 %vm187_vm0, %v1659_v53  ;;  %v1668_v53 = vld [vmem:[%s19677_s0 + $0x132] sm:$0xff] }
 0x198   :  { %14062 = vmatmul.mubr.msk.f32.gmra.mrb[44].mxu0 %vm187_vm0, %v17595_v47  ;;  %13665 = vmatprep.mubr.msk.f32.mxu1 %vm187_vm0, %v1660_v57  ;;  %v17713_v57 = vld [vmem:[%s19677_s0 + $0x1d4] sm:$0xff] }
 0x199   :  { %14064 = vmatprep.mubr.msk.f32.mxu0 %vm187_vm0, %v17603_v51 }
 0x19b   :  { %13666 = vmatmul.mubr.msk.f32.gmra.mrb[30].mxu1 %vm187_vm0, %v1661_v63  ;;  %v1669_v63 = vld [vmem:[%s19677_s0 + $0x13a] sm:$0xff] }
 0x19c   :  { %14065 = vmatmul.mubr.msk.f32.gmra.mrb[46].mxu0 %vm187_vm0, %v17617_v55  ;;  %13668 = vmatprep.mubr.msk.f32.mxu1 %vm187_vm0, %v1662_v6  ;;  %v17727_v6 = vld [vmem:[%s19677_s0 + $0x1dc] sm:$0xff] }
 0x19d   :  { %14067 = vmatprep.mubr.msk.f32.mxu0 %vm187_vm0, %v17625_v59 }
 0x19f   :  { %13669 = vmatmul.mubr.msk.f32.gmra.mrb[32].mxu1 %vm187_vm0, %v1663_v12  ;;  %v1670_v12 = vld [vmem:[%s19677_s0 + $0x142] sm:$0xff] }
 0x1a0   :  { %14068 = vmatmul.mubr.msk.f32.gmra.mrb[48].mxu0 %vm187_vm0, %v17639_v61  ;;  %13671 = vmatprep.mubr.msk.f32.mxu1 %vm187_vm0, %v1664_v20  ;;  %v17735_v20 = vld [vmem:[%s19677_s0 + $0x1e4] sm:$0xff] }
 0x1a1   :  { %14070 = vmatprep.mubr.msk.f32.mxu0 %vm187_vm0, %v17647_v9 }
 0x1a3   :  { %13672 = vmatmul.mubr.msk.f32.gmra.mrb[34].mxu1 %vm187_vm0, %v1665_v28  ;;  %v1671_v28 = vld [vmem:[%s19677_s0 + $0x14a] sm:$0xff] }
 0x1a4   :  { %14071 = vmatmul.mubr.msk.f32.gmra.mrb[50].mxu0 %vm187_vm0, %v17661_v16  ;;  %13674 = vmatprep.mubr.msk.f32.mxu1 %vm187_vm0, %v1666_v36  ;;  %v17749_v36 = vld [vmem:[%s19677_s0 + $0x1ec] sm:$0xff] }
 0x1a5   :  { %14073 = vmatprep.mubr.msk.f32.mxu0 %vm187_vm0, %v17669_v24  ;;  %19704 = vst [vmem:[#allocation8_spill] sm:$0xff] %v17749_v36 }
 0x1a7   :  { %13675 = vmatmul.mubr.msk.f32.gmra.mrb[36].mxu1 %vm187_vm0, %v1667_v45  ;;  %v1672_v45 = vld [vmem:[%s19677_s0 + $0x152] sm:$0xff] }
 0x1a8   :  { %14074 = vmatmul.mubr.msk.f32.gmra.mrb[52].mxu0 %vm187_vm0, %v17683_v32  ;;  %13677 = vmatprep.mubr.msk.f32.mxu1 %vm187_vm0, %v1668_v53  ;;  %v17757_v53 = vld [vmem:[%s19677_s0 + $0x1f4] sm:$0xff] }
 0x1a9   :  { %14076 = vmatprep.mubr.msk.f32.mxu0 %vm187_vm0, %v17691_v41  ;;  %19705 = vst [vmem:[#allocation9_spill] sm:$0xff] %v17757_v53 }
 0x1ab   :  { %13678 = vmatmul.mubr.msk.f32.gmra.mrb[38].mxu1 %vm187_vm0, %v1669_v63  ;;  %v1673_v63 = vld [vmem:[%s19677_s0 + $0x15a] sm:$0xff] }
 0x1ac   :  { %14077 = vmatmul.mubr.msk.f32.gmra.mrb[54].mxu0 %vm187_vm0, %v17705_v49  ;;  %13680 = vmatprep.mubr.msk.f32.mxu1 %vm187_vm0, %v1670_v12  ;;  %v17771_v12 = vld [vmem:[%s19677_s0 + $0x1fc] sm:$0xff] }
 0x1ad   :  { %14079 = vmatprep.mubr.msk.f32.mxu0 %vm187_vm0, %v17713_v57  ;;  %19706 = vst [vmem:[#allocation10_spill] sm:$0xff] %v17771_v12 }
 0x1af   :  { %13681 = vmatmul.mubr.msk.f32.gmra.mrb[40].mxu1 %vm187_vm0, %v1671_v28  ;;  %v1674_v28 = vld [vmem:[%s19677_s0 + $0x162] sm:$0xff] }
 0x1b0   :  { %14080 = vmatmul.mubr.msk.f32.gmra.mrb[56].mxu0 %vm187_vm0, %v17727_v6  ;;  %13683 = vmatprep.mubr.msk.f32.mxu1 %vm187_vm0, %v1672_v45  ;;  %v17779_v45 = vld [vmem:[%s19677_s0 + $0x204] sm:$0xff] }
 0x1b1   :  { %14082 = vmatprep.mubr.msk.f32.mxu0 %vm187_vm0, %v17735_v20  ;;  %19707 = vst [vmem:[#allocation11_spill] sm:$0xff] %v17779_v45 }
 0x1b3   :  { %13684 = vmatmul.mubr.msk.f32.gmra.mrb[42].mxu1 %vm187_vm0, %v1673_v63  ;;  %v1676_v63 = vld [vmem:[%s19677_s0 + $0x172] sm:$0xff] }
 0x1b4   :  { %14083 = vmatmul.mubr.msk.f32.gmra.mrb[58].mxu0 %vm187_vm0, %v17749_v36  ;;  %13686 = vmatprep.mubr.msk.f32.mxu1 %vm187_vm0, %v1674_v28  ;;  %v17793_v36 = vld [vmem:[%s19677_s0 + $0x20c] sm:$0xff]  ;;  %v17801_v28 = vld [vmem:[%s19677_s0 + $0x214] sm:$0xff] }
 0x1b5   :  { %14085 = vmatprep.mubr.msk.f32.mxu0 %vm187_vm0, %v17757_v53  ;;  %v1675_v53 = vld [vmem:[%s19677_s0 + $0x16a] sm:$0xff]  ;;  %19708 = vst [vmem:[#allocation12_spill] sm:$0xff] %v17793_v36  ;;  %19709 = vst [vmem:[#allocation13_spill] sm:$0xff] %v17801_v28 }
 0x1b7   :  { %13687 = vmatmul.mubr.msk.f32.gmra.mrb[44].mxu1 %vm187_vm0, %v1675_v53  ;;  %v1678_v53 = vld [vmem:[%s19677_s0 + $0x182] sm:$0xff] }
 0x1b8   :  { %14086 = vmatmul.mubr.msk.f32.gmra.mrb[60].mxu0 %vm187_vm0, %v17771_v12  ;;  %13689 = vmatprep.mubr.msk.f32.mxu1 %vm187_vm0, %v1676_v63  ;;  %v17815_v12 = vld [vmem:[%s19677_s0 + $0x21c] sm:$0xff]  ;;  %v17823_v63 = vld [vmem:[%s19677_s0 + $0x224] sm:$0xff] }
 0x1b9   :  { %14088 = vmatprep.mubr.msk.f32.mxu0 %vm187_vm0, %v17779_v45  ;;  %v1677_v45 = vld [vmem:[%s19677_s0 + $0x17a] sm:$0xff]  ;;  %19710 = vst [vmem:[#allocation14_spill] sm:$0xff] %v17815_v12  ;;  %19711 = vst [vmem:[#allocation15_spill] sm:$0xff] %v17823_v63 }
 0x1bb   :  { %13690 = vmatmul.mubr.msk.f32.gmra.mrb[46].mxu1 %vm187_vm0, %v1677_v45  ;;  %v1680_v45 = vld [vmem:[%s19677_s0 + $0x192] sm:$0xff] }
 0x1bc   :  { %14089 = vmatmul.mubr.msk.f32.gmra.mrb[62].mxu0 %vm187_vm0, %v17793_v36  ;;  %13692 = vmatprep.mubr.msk.f32.mxu1 %vm187_vm0, %v1678_v53  ;;  %v17837_v36 = vld [vmem:[%s19677_s0 + $0x22c] sm:$0xff]  ;;  %v17845_v53 = vld [vmem:[%s19677_s0 + $0x234] sm:$0xff] }
 0x1bd   :  { %14091 = vmatprep.mubr.msk.f32.mxu0 %vm187_vm0, %v17801_v28  ;;  %v1679_v28 = vld [vmem:[%s19677_s0 + $0x18a] sm:$0xff]  ;;  %19712 = vst [vmem:[#allocation16_spill] sm:$0xff] %v17837_v36  ;;  %19713 = vst [vmem:[#allocation17_spill] sm:$0xff] %v17845_v53 }
 0x1bf   :  { %13693 = vmatmul.mubr.msk.f32.gmra.mrb[48].mxu1 %vm187_vm0, %v1679_v28  ;;  %v1682_v28 = vld [vmem:[%s19677_s0 + $0x1a2] sm:$0xff] }
 0x1c0   :  { %14092 = vmatmul.mubr.msk.f32.gmra.mrb[64].mxu0 %vm187_vm0, %v17815_v12  ;;  %13695 = vmatprep.mubr.msk.f32.mxu1 %vm187_vm0, %v1680_v45  ;;  %v17859_v12 = vld [vmem:[%s19677_s0 + $0x23c] sm:$0xff]  ;;  %v17867_v45 = vld [vmem:[%s19677_s0 + $0x244] sm:$0xff] }
 0x1c1   :  { %14094 = vmatprep.mubr.msk.f32.mxu0 %vm187_vm0, %v17823_v63  ;;  %v1681_v63 = vld [vmem:[%s19677_s0 + $0x19a] sm:$0xff]  ;;  %19714 = vst [vmem:[#allocation18_spill] sm:$0xff] %v17859_v12  ;;  %19715 = vst [vmem:[#allocation19_spill] sm:$0xff] %v17867_v45 }
 0x1c3   :  { %13696 = vmatmul.mubr.msk.f32.gmra.mrb[50].mxu1 %vm187_vm0, %v1681_v63  ;;  %v1684_v63 = vld [vmem:[%s19677_s0 + $0x1b2] sm:$0xff] }
 0x1c4   :  { %14095 = vmatmul.mubr.msk.f32.gmra.mrb[66].mxu0 %vm187_vm0, %v17837_v36  ;;  %13698 = vmatprep.mubr.msk.f32.mxu1 %vm187_vm0, %v1682_v28  ;;  %v17881_v36 = vld [vmem:[%s19677_s0 + $0x24c] sm:$0xff]  ;;  %v17889_v28 = vld [vmem:[%s19677_s0 + $0x254] sm:$0xff] }
 0x1c5   :  { %14097 = vmatprep.mubr.msk.f32.mxu0 %vm187_vm0, %v17845_v53  ;;  %v1683_v53 = vld [vmem:[%s19677_s0 + $0x1aa] sm:$0xff]  ;;  %19716 = vst [vmem:[#allocation20_spill] sm:$0xff] %v17881_v36  ;;  %19717 = vst [vmem:[#allocation21_spill] sm:$0xff] %v17889_v28 }
 0x1c7   :  { %13699 = vmatmul.mubr.msk.f32.gmra.mrb[52].mxu1 %vm187_vm0, %v1683_v53  ;;  %v1686_v53 = vld [vmem:[%s19677_s0 + $0x1c2] sm:$0xff] }
 0x1c8   :  { %14098 = vmatmul.mubr.msk.f32.gmra.mrb[68].mxu0 %vm187_vm0, %v17859_v12  ;;  %13701 = vmatprep.mubr.msk.f32.mxu1 %vm187_vm0, %v1684_v63  ;;  %v17903_v12 = vld [vmem:[%s19677_s0 + $0x25c] sm:$0xff]  ;;  %v17911_v63 = vld [vmem:[%s19677_s0 + $0x264] sm:$0xff] }
 0x1c9   :  { %14100 = vmatprep.mubr.msk.f32.mxu0 %vm187_vm0, %v17867_v45  ;;  %v1685_v45 = vld [vmem:[%s19677_s0 + $0x1ba] sm:$0xff]  ;;  %19718 = vst [vmem:[#allocation22_spill] sm:$0xff] %v17903_v12  ;;  %19719 = vst [vmem:[#allocation23_spill] sm:$0xff] %v17911_v63 }
 0x1cb   :  { %13702 = vmatmul.mubr.msk.f32.gmra.mrb[54].mxu1 %vm187_vm0, %v1685_v45  ;;  %v1688_v45 = vld [vmem:[%s19677_s0 + $0x1d2] sm:$0xff] }
 0x1cc   :  { %14101 = vmatmul.mubr.msk.f32.gmra.mrb[70].mxu0 %vm187_vm0, %v17881_v36  ;;  %13704 = vmatprep.mubr.msk.f32.mxu1 %vm187_vm0, %v1686_v53  ;;  %v17925_v36 = vld [vmem:[%s19677_s0 + $0x26c] sm:$0xff]  ;;  %v17933_v53 = vld [vmem:[%s19677_s0 + $0x274] sm:$0xff] }
 0x1cd   :  { %14103 = vmatprep.mubr.msk.f32.mxu0 %vm187_vm0, %v17889_v28  ;;  %v1687_v28 = vld [vmem:[%s19677_s0 + $0x1ca] sm:$0xff]  ;;  %19720 = vst [vmem:[#allocation24_spill] sm:$0xff] %v17925_v36  ;;  %19721 = vst [vmem:[#allocation25_spill] sm:$0xff] %v17933_v53 }
 0x1cf   :  { %13705 = vmatmul.mubr.msk.f32.gmra.mrb[56].mxu1 %vm187_vm0, %v1687_v28  ;;  %v1690_v28 = vld [vmem:[%s19677_s0 + $0x1e2] sm:$0xff] }
 0x1d0   :  { %14104 = vmatmul.mubr.msk.f32.gmra.mrb[72].mxu0 %vm187_vm0, %v17903_v12  ;;  %13707 = vmatprep.mubr.msk.f32.mxu1 %vm187_vm0, %v1688_v45  ;;  %v17947_v12 = vld [vmem:[%s19677_s0 + $0x27c] sm:$0xff]  ;;  %v17955_v45 = vld [vmem:[%s19677_s0 + $0x284] sm:$0xff] }
 0x1d1   :  { %14106 = vmatprep.mubr.msk.f32.mxu0 %vm187_vm0, %v17911_v63  ;;  %v1689_v63 = vld [vmem:[%s19677_s0 + $0x1da] sm:$0xff]  ;;  %19722 = vst [vmem:[#allocation26_spill] sm:$0xff] %v17947_v12  ;;  %19723 = vst [vmem:[#allocation27_spill] sm:$0xff] %v17955_v45 }
 0x1d3   :  { %13708 = vmatmul.mubr.msk.f32.gmra.mrb[58].mxu1 %vm187_vm0, %v1689_v63  ;;  %v1692_v63 = vld [vmem:[%s19677_s0 + $0x1f2] sm:$0xff] }
 0x1d4   :  { %14107 = vmatmul.mubr.msk.f32.gmra.mrb[74].mxu0 %vm187_vm0, %v17925_v36  ;;  %13710 = vmatprep.mubr.msk.f32.mxu1 %vm187_vm0, %v1690_v28  ;;  %v17969_v36 = vld [vmem:[%s19677_s0 + $0x28c] sm:$0xff]  ;;  %v17977_v28 = vld [vmem:[%s19677_s0 + $0x294] sm:$0xff] }
 0x1d5   :  { %14109 = vmatprep.mubr.msk.f32.mxu0 %vm187_vm0, %v17933_v53  ;;  %v1691_v53 = vld [vmem:[%s19677_s0 + $0x1ea] sm:$0xff]  ;;  %19724 = vst [vmem:[#allocation28_spill] sm:$0xff] %v17977_v28 }
 0x1d7   :  { %13711 = vmatmul.mubr.msk.f32.gmra.mrb[60].mxu1 %vm187_vm0, %v1691_v53  ;;  %v1694_v53 = vld [vmem:[%s19677_s0 + $0x202] sm:$0xff] }
 0x1d8   :  { %14110 = vmatmul.mubr.msk.f32.gmra.mrb[76].mxu0 %vm187_vm0, %v17947_v12  ;;  %13713 = vmatprep.mubr.msk.f32.mxu1 %vm187_vm0, %v1692_v63  ;;  %v17991_v12 = vld [vmem:[%s19677_s0 + $0x29c] sm:$0xff]  ;;  %v1695_v63 = vld [vmem:[%s19677_s0 + $0x20a] sm:$0xff] }
 0x1d9   :  { %14112 = vmatprep.mubr.msk.f32.mxu0 %vm187_vm0, %v17955_v45  ;;  %v1693_v45 = vld [vmem:[%s19677_s0 + $0x1fa] sm:$0xff] }
 0x1db   :  { %13714 = vmatmul.mubr.msk.f32.gmra.mrb[62].mxu1 %vm187_vm0, %v1693_v45  ;;  %v1697_v45 = vld [vmem:[%s19677_s0 + $0x21a] sm:$0xff] }
 0x1dc   :  { %14113 = vmatmul.mubr.msk.f32.gmra.mrb[78].mxu0 %vm187_vm0, %v17969_v36  ;;  %13716 = vmatprep.mubr.msk.f32.mxu1 %vm187_vm0, %v1694_v53 }
 0x1dd   :  { %14115 = vmatprep.mubr.msk.f32.mxu0 %vm187_vm0, %v17977_v28  ;;  %v1696_v28 = vld [vmem:[%s19677_s0 + $0x212] sm:$0xff] }
 0x1df   :  { %13717 = vmatmul.mubr.msk.f32.gmra.mrb[64].mxu1 %vm187_vm0, %v1695_v63 }
 0x1e0   :  { %14116 = vmatmul.mubr.msk.f32.gmra.mrb[80].mxu0 %vm187_vm0, %v17991_v12  ;;  %13719 = vmatprep.mubr.msk.f32.mxu1 %vm187_vm0, %v1696_v28  ;;  %v19738_v28 = vld [vmem:[#allocation21_spill] sm:$0xff] }
 0x1e1   :  { %14120 = vmatprep.mubr.msk.f32.mxu0 %vm187_vm0, %v17107_v62  ;;  %v1698_v62 = vld [vmem:[%s19677_s0 + $0x222] sm:$0xff] }
 0x1e3   :  { %13720 = vmatmul.mubr.msk.f32.gmra.mrb[66].mxu1 %vm187_vm0, %v1697_v45  ;;  %v19739_v45 = vld [vmem:[#allocation22_spill] sm:$0xff] }
 0x1e4   :  { %14121 = vmatmul.mubr.msk.f32.vlgmr.msra.gmra.mrb[0].mxu0 %vm187_vm0, %v17121_v0  ;;  %13722 = vmatprep.mubr.msk.f32.mxu1 %vm187_vm0, %v1698_v62  ;;  %v1699_v0 = vld [vmem:[%s19677_s0 + $0x22a] sm:$0xff]  ;;  %v19740_v62 = vld [vmem:[#allocation23_spill] sm:$0xff] }
 0x1e5   :  { %14244 = vmatpush3.msra.mxu0 %v17323_v37  ;;  %14123 = vmatprep.mubr.msk.f32.mxu0 %vm187_vm0, %v17129_v2  ;;  %v1700_v2 = vld [vmem:[%s19677_s0 + $0x232] sm:$0xff] }
 0x1e7   :  { %13723 = vmatmul.mubr.msk.f32.gmra.mrb[68].mxu1 %vm187_vm0, %v1699_v0 }
 0x1e8   :  { %14124 = vmatmul.mubr.msk.f32.gmra.mrb[2].mxu0 %vm187_vm0, %v17143_v3  ;;  %13725 = vmatprep.mubr.msk.f32.mxu1 %vm187_vm0, %v1700_v2  ;;  %v1701_v3 = vld [vmem:[%s19677_s0 + $0x23a] sm:$0xff] }
 0x1e9   :  { %14126 = vmatprep.mubr.msk.f32.mxu0 %vm187_vm0, %v17151_v5  ;;  %v1702_v5 = vld [vmem:[%s19677_s0 + $0x242] sm:$0xff] }
 0x1eb   :  { %13726 = vmatmul.mubr.msk.f32.gmra.mrb[70].mxu1 %vm187_vm0, %v1701_v3  ;;  %v19741_v3 = vld [vmem:[#allocation24_spill] sm:$0xff] }
 0x1ec   :  { %14127 = vmatmul.mubr.msk.f32.gmra.mrb[4].mxu0 %vm187_vm0, %v17168_v8  ;;  %13728 = vmatprep.mubr.msk.f32.mxu1 %vm187_vm0, %v1702_v5  ;;  %v1703_v8 = vld [vmem:[%s19677_s0 + $0x24a] sm:$0xff] }
 0x1ed   :  { %14129 = vmatprep.mubr.msk.f32.mxu0 %vm187_vm0, %v17176_v10  ;;  %v1704_v10 = vld [vmem:[%s19677_s0 + $0x252] sm:$0xff] }
 0x1ee   :  { %v19742_v5 = vld [vmem:[#allocation25_spill] sm:$0xff] }
 0x1ef   :  { %13729 = vmatmul.mubr.msk.f32.gmra.mrb[72].mxu1 %vm187_vm0, %v1703_v8 }
 0x1f0   :  { %14130 = vmatmul.mubr.msk.f32.gmra.mrb[6].mxu0 %vm187_vm0, %v17193_v13  ;;  %13731 = vmatprep.mubr.msk.f32.mxu1 %vm187_vm0, %v1704_v10  ;;  %v1705_v13 = vld [vmem:[%s19677_s0 + $0x25a] sm:$0xff] }
 0x1f1   :  { %14132 = vmatprep.mubr.msk.f32.mxu0 %vm187_vm0, %v17201_v15  ;;  %v1706_v15 = vld [vmem:[%s19677_s0 + $0x262] sm:$0xff] }
 0x1f3   :  { %13732 = vmatmul.mubr.msk.f32.gmra.mrb[74].mxu1 %vm187_vm0, %v1705_v13  ;;  %v19743_v13 = vld [vmem:[#allocation26_spill] sm:$0xff] }
 0x1f4   :  { %14133 = vmatmul.mubr.msk.f32.gmra.mrb[8].mxu0 %vm187_vm0, %v17215_v17  ;;  %13734 = vmatprep.mubr.msk.f32.mxu1 %vm187_vm0, %v1706_v15  ;;  %v1707_v17 = vld [vmem:[%s19677_s0 + $0x26a] sm:$0xff]  ;;  %v19744_v15 = vld [vmem:[#allocation27_spill] sm:$0xff] }
 0x1f5   :  { %14135 = vmatprep.mubr.msk.f32.mxu0 %vm187_vm0, %v17223_v19  ;;  %v1708_v19 = vld [vmem:[%s19677_s0 + $0x272] sm:$0xff] }
 0x1f7   :  { %13735 = vmatmul.mubr.msk.f32.gmra.mrb[76].mxu1 %vm187_vm0, %v1707_v17 }
 0x1f8   :  { %14136 = vmatmul.mubr.msk.f32.gmra.mrb[10].mxu0 %vm187_vm0, %v17237_v21  ;;  %13737 = vmatprep.mubr.msk.f32.mxu1 %vm187_vm0, %v1708_v19  ;;  %v1709_v21 = vld [vmem:[%s19677_s0 + $0x27a] sm:$0xff] }
 0x1f9   :  { %14138 = vmatprep.mubr.msk.f32.mxu0 %vm187_vm0, %v17245_v23  ;;  %v1710_v23 = vld [vmem:[%s19677_s0 + $0x282] sm:$0xff] }
 0x1fb   :  { %13738 = vmatmul.mubr.msk.f32.gmra.mrb[78].mxu1 %vm187_vm0, %v1709_v21 }
 0x1fc   :  { %14139 = vmatmul.mubr.msk.f32.gmra.mrb[12].mxu0 %vm187_vm0, %v17259_v25  ;;  %13740 = vmatprep.mubr.msk.f32.mxu1 %vm187_vm0, %v1710_v23  ;;  %v1711_v25 = vld [vmem:[%s19677_s0 + $0x28a] sm:$0xff] }
 0x1fd   :  { %14141 = vmatprep.mubr.msk.f32.mxu0 %vm187_vm0, %v17267_v26  ;;  %v18115_v26 = vld [vmem:[%s19678_s1 + $0x40] sm:$0xff] }
 0x1fe   :  { %14368 = vmatprep.subr.mxu0 %v18115_v26 }
 0x1ff   :  { %13741 = vmatmul.mubr.msk.f32.gmra.mrb[80].mxu1 %vm187_vm0, %v1711_v25 }
 0x200   :  { %14142 = vmatmul.mubr.msk.f32.gmra.mrb[14].mxu0 %vm187_vm0, %v17281_v29  ;;  %13859 = vmatprep.mubr.msk.f32.mxu1 %vm187_vm0, %v1708_v19  ;;  %v2596_v29 = vld [vmem:[%s19677_s0 + $0x292] sm:$0xff] }
 0x201   :  { %14144 = vmatprep.mubr.msk.f32.mxu0 %vm187_vm0, %v17289_v31  ;;  %v2597_v31 = vld [vmem:[%s19677_s0 + $0x29a] sm:$0xff] }
 0x203   :  { %13860 = vmatmul.mubr.msk.f32.vlgmr.msra.gmra.mrb[76].mxu1 %vm187_vm0, %v1709_v21  ;;  %v19745_v21 = vld [vmem:[#allocation28_spill] sm:$0xff] }
 0x204   :  { %14145 = vmatmul.mubr.msk.f32.gmra.mrb[16].mxu0 %vm187_vm0, %v17303_v33  ;;  %13862 = vmatprep.mubr.msk.f32.mxu1 %vm187_vm0, %v1710_v23  ;;  %v5254_v23 = vld [vmem:[%s19677_s0 + $0x2a4] sm:$0xff] }
 0x205   :  { %14147 = vmatprep.mubr.msk.f32.mxu0 %vm187_vm0, %v17311_v35 }
 0x207   :  { %13863 = vmatmul.mubr.msk.f32.gmra.mrb[78].mxu1 %vm187_vm0, %v1711_v25 }
 0x208   :  { %14148 = vmatmul.mubr.msk.f32.gmra.mrb[18].mxu0 %vm187_vm0, %v17330_v38  ;;  %13865 = vmatprep.mubr.msk.f32.mxu1 %vm187_vm0, %v2596_v29 }
 0x209   :  { %14150 = vmatprep.mubr.msk.f32.mxu0 %vm187_vm0, %v17339_v40 }
 0x20b   :  { %13866 = vmatmul.mubr.msk.f32.gmra.mrb[80].mxu1 %vm187_vm0, %v2597_v31  ;;  %v5255_v31 = vld [vmem:[%s19677_s0 + $0x2ac] sm:$0xff] }
 0x20c   :  { %14151 = vmatmul.mubr.msk.f32.gmra.mrb[20].mxu0 %vm187_vm0, %v17353_v42 }
 0x20d   :  { %14153 = vmatprep.mubr.msk.f32.mxu0 %vm187_vm0, %v17361_v44 }
 0x210   :  { %14154 = vmatmul.mubr.msk.f32.gmra.mrb[22].mxu0 %vm187_vm0, %v17375_v46 }
 0x211   :  { %14156 = vmatprep.mubr.msk.f32.mxu0 %vm187_vm0, %v17383_v48 }
 0x214   :  { %14157 = vmatmul.mubr.msk.f32.gmra.mrb[24].mxu0 %vm187_vm0, %v17397_v50 }
 0x215   :  { %14159 = vmatprep.mubr.msk.f32.mxu0 %vm187_vm0, %v17405_v52 }
 0x218   :  { %14160 = vmatmul.mubr.msk.f32.gmra.mrb[26].mxu0 %vm187_vm0, %v17419_v54 }
 0x219   :  { %14162 = vmatprep.mubr.msk.f32.mxu0 %vm187_vm0, %v17427_v56 }
 0x21c   :  { %14163 = vmatmul.mubr.msk.f32.gmra.mrb[28].mxu0 %vm187_vm0, %v17441_v58 }
 0x21d   :  { %14165 = vmatprep.mubr.msk.f32.mxu0 %vm187_vm0, %v17449_v60 }
 0x220   :  { %14166 = vmatmul.mubr.msk.f32.gmra.mrb[30].mxu0 %vm187_vm0, %v17463_v1 }
 0x221   :  { %14168 = vmatprep.mubr.msk.f32.mxu0 %vm187_vm0, %v17471_v4  ;;  %v19725_v4 = vld [vmem:[#allocation8_spill] sm:$0xff] }
 0x224   :  { %14169 = vmatmul.mubr.msk.f32.gmra.mrb[32].mxu0 %vm187_vm0, %v17485_v7  ;;  %v19726_v7 = vld [vmem:[#allocation9_spill] sm:$0xff] }
 0x225   :  { %14171 = vmatprep.mubr.msk.f32.mxu0 %vm187_vm0, %v17493_v11 }
 0x228   :  { %14172 = vmatmul.mubr.msk.f32.gmra.mrb[34].mxu0 %vm187_vm0, %v17507_v14 }
 0x229   :  { %14174 = vmatprep.mubr.msk.f32.mxu0 %vm187_vm0, %v17515_v18  ;;  %v19727_v18 = vld [vmem:[#allocation10_spill] sm:$0xff] }
 0x22c   :  { %14175 = vmatmul.mubr.msk.f32.gmra.mrb[36].mxu0 %vm187_vm0, %v17529_v22  ;;  %v19728_v22 = vld [vmem:[#allocation11_spill] sm:$0xff] }
 0x22d   :  { %14177 = vmatprep.mubr.msk.f32.mxu0 %vm187_vm0, %v17537_v27 }
 0x230   :  { %14178 = vmatmul.mubr.msk.f32.gmra.mrb[38].mxu0 %vm187_vm0, %v17551_v30 }
 0x231   :  { %14180 = vmatprep.mubr.msk.f32.mxu0 %vm187_vm0, %v17559_v34  ;;  %v19729_v34 = vld [vmem:[#allocation12_spill] sm:$0xff] }
 0x232   :  { %v18173_v33 = vpop.f32.mrb[0].mxu1 }
 0x233   :  { %v18175_v35 = vpop.f32.mrb[1].mxu1 }
 0x234   :  { %14181 = vmatmul.mubr.msk.f32.gmra.mrb[40].mxu0 %vm187_vm0, %v17573_v39  ;;  %v19730_v39 = vld [vmem:[#allocation13_spill] sm:$0xff] }
 0x235   :  { %14183 = vmatprep.mubr.msk.f32.mxu0 %vm187_vm0, %v17581_v43 }
 0x236   :  { %v18181_v37 = vpop.f32.mrb[2].mxu1 }
 0x237   :  { %v18183_v38 = vpop.f32.mrb[3].mxu1 }
 0x238   :  { %14184 = vmatmul.mubr.msk.f32.gmra.mrb[42].mxu0 %vm187_vm0, %v17595_v47 }
 0x239   :  { %14186 = vmatprep.mubr.msk.f32.mxu0 %vm187_vm0, %v17603_v51  ;;  %v19731_v51 = vld [vmem:[#allocation14_spill] sm:$0xff] }
 0x23a   :  { %v18189_v40 = vpop.f32.mrb[4].mxu1 }
 0x23b   :  { %v18191_v42 = vpop.f32.mrb[5].mxu1 }
 0x23c   :  { %14187 = vmatmul.mubr.msk.f32.gmra.mrb[44].mxu0 %vm187_vm0, %v17617_v55  ;;  %v19732_v55 = vld [vmem:[#allocation15_spill] sm:$0xff] }
 0x23d   :  { %14189 = vmatprep.mubr.msk.f32.mxu0 %vm187_vm0, %v17625_v59 }
 0x23e   :  { %v18197_v44 = vpop.f32.mrb[6].mxu1 }
 0x23f   :  { %v18199_v46 = vpop.f32.mrb[7].mxu1 }
 0x240   :  { %14190 = vmatmul.mubr.msk.f32.gmra.mrb[46].mxu0 %vm187_vm0, %v17639_v61 }
 0x241   :  { %14192 = vmatprep.mubr.msk.f32.mxu0 %vm187_vm0, %v17647_v9  ;;  %v19733_v9 = vld [vmem:[#allocation16_spill] sm:$0xff] }
 0x242   :  { %v18205_v48 = vpop.f32.mrb[8].mxu1 }
 0x243   :  { %v18207_v50 = vpop.f32.mrb[9].mxu1 }
 0x244   :  { %14193 = vmatmul.mubr.msk.f32.gmra.mrb[48].mxu0 %vm187_vm0, %v17661_v16  ;;  %v19734_v16 = vld [vmem:[#allocation17_spill] sm:$0xff] }
 0x245   :  { %14195 = vmatprep.mubr.msk.f32.mxu0 %vm187_vm0, %v17669_v24 }
 0x246   :  { %v18213_v52 = vpop.f32.mrb[10].mxu1 }
 0x247   :  { %v18215_v54 = vpop.f32.mrb[11].mxu1 }
 0x248   :  { %14196 = vmatmul.mubr.msk.f32.gmra.mrb[50].mxu0 %vm187_vm0, %v17683_v32 }
 0x249   :  { %14198 = vmatprep.mubr.msk.f32.mxu0 %vm187_vm0, %v17691_v41  ;;  %v19735_v41 = vld [vmem:[#allocation18_spill] sm:$0xff] }
 0x24a   :  { %v18221_v56 = vpop.f32.mrb[12].mxu1 }
 0x24b   :  { %v18223_v58 = vpop.f32.mrb[13].mxu1 }
 0x24c   :  { %14199 = vmatmul.mubr.msk.f32.gmra.mrb[52].mxu0 %vm187_vm0, %v17705_v49  ;;  %v19736_v49 = vld [vmem:[#allocation19_spill] sm:$0xff] }
 0x24d   :  { %14201 = vmatprep.mubr.msk.f32.mxu0 %vm187_vm0, %v17713_v57 }
 0x24e   :  { %v18229_v60 = vpop.f32.mrb[14].mxu1 }
 0x24f   :  { %v18231_v1 = vpop.f32.mrb[15].mxu1 }
 0x250   :  { %14202 = vmatmul.mubr.msk.f32.gmra.mrb[54].mxu0 %vm187_vm0, %v17727_v6 }
 0x251   :  { %14204 = vmatprep.mubr.msk.f32.mxu0 %vm187_vm0, %v17735_v20  ;;  %v19737_v20 = vld [vmem:[#allocation20_spill] sm:$0xff] }
 0x252   :  { %v18237_v11 = vpop.f32.mrb[16].mxu1 }
 0x253   :  { %v18239_v14 = vpop.f32.mrb[17].mxu1 }
 0x254   :  { %14205 = vmatmul.mubr.msk.f32.gmra.mrb[56].mxu0 %vm187_vm0, %v19725_v4 }
 0x255   :  { %14207 = vmatprep.mubr.msk.f32.mxu0 %vm187_vm0, %v19726_v7 }
 0x256   :  { %v18245_v27 = vpop.f32.mrb[18].mxu1 }
 0x257   :  { %v18247_v30 = vpop.f32.mrb[19].mxu1 }
 0x258   :  { %14208 = vmatmul.mubr.msk.f32.gmra.mrb[58].mxu0 %vm187_vm0, %v19727_v18  ;;  %v6062_v18 = vld [vmem:[%s19677_s0 + $0x35] sm:$0xff] }
 0x259   :  { %14210 = vmatprep.mubr.msk.f32.mxu0 %vm187_vm0, %v19728_v22 }
 0x25a   :  { %v18253_v43 = vpop.f32.mrb[20].mxu1 }
 0x25b   :  { %v18255_v47 = vpop.f32.mrb[21].mxu1 }
 0x25c   :  { %14211 = vmatmul.mubr.msk.f32.gmra.mrb[60].mxu0 %vm187_vm0, %v19729_v34 }
 0x25d   :  { %14213 = vmatprep.mubr.msk.f32.mxu0 %vm187_vm0, %v19730_v39  ;;  %v6063_v39 = vld [vmem:[%s19677_s0 + $0x3d] sm:$0xff] }
 0x25e   :  { %v18261_v59 = vpop.f32.mrb[22].mxu1 }
 0x25f   :  { %v18263_v61 = vpop.f32.mrb[23].mxu1 }
 0x260   :  { %14214 = vmatmul.mubr.msk.f32.gmra.mrb[62].mxu0 %vm187_vm0, %v19731_v51  ;;  %v6064_v51 = vld [vmem:[%s19677_s0 + $0x45] sm:$0xff] }
 0x261   :  { %14216 = vmatprep.mubr.msk.f32.mxu0 %vm187_vm0, %v19732_v55 }
 0x262   :  { %v18269_v24 = vpop.f32.mrb[24].mxu1 }
 0x263   :  { %v18271_v32 = vpop.f32.mrb[25].mxu1 }
 0x264   :  { %14217 = vmatmul.mubr.msk.f32.gmra.mrb[64].mxu0 %vm187_vm0, %v19733_v9 }
 0x265   :  { %14219 = vmatprep.mubr.msk.f32.mxu0 %vm187_vm0, %v19734_v16  ;;  %v6066_v16 = vld [vmem:[%s19677_s0 + $0x55] sm:$0xff] }
 0x266   :  { %v18277_v57 = vpop.f32.mrb[26].mxu1 }
 0x267   :  { %v18279_v6 = vpop.f32.mrb[27].mxu1 }
 0x268   :  { %14220 = vmatmul.mubr.msk.f32.gmra.mrb[66].mxu0 %vm187_vm0, %v19735_v41 }
 0x269   :  { %14222 = vmatprep.mubr.msk.f32.mxu0 %vm187_vm0, %v19736_v49 }
 0x26a   :  { %v18285_v53 = vpop.f32.mrb[28].mxu1 }
 0x26b   :  { %v18287_v63 = vpop.f32.mrb[29].mxu1 }
 0x26c   :  { %14223 = vmatmul.mubr.msk.f32.gmra.mrb[68].mxu0 %vm187_vm0, %v19737_v20  ;;  %v6067_v20 = vld [vmem:[%s19677_s0 + $0x5d] sm:$0xff] }
 0x26d   :  { %14225 = vmatprep.mubr.msk.f32.mxu0 %vm187_vm0, %v19738_v28  ;;  %v6068_v28 = vld [vmem:[%s19677_s0 + $0x65] sm:$0xff] }
 0x26e   :  { %v18293_v0 = vpop.f32.mrb[30].mxu1 }
 0x26f   :  { %v18295_v2 = vpop.f32.mrb[31].mxu1 }
 0x270   :  { %14226 = vmatmul.mubr.msk.f32.gmra.mrb[70].mxu0 %vm187_vm0, %v19739_v45 }
 0x271   :  { %14228 = vmatprep.mubr.msk.f32.mxu0 %vm187_vm0, %v19740_v62 }
 0x272   :  { %v18301_v8 = vpop.f32.mrb[32].mxu1 }
 0x273   :  { %v18303_v10 = vpop.f32.mrb[33].mxu1 }
 0x274   :  { %14229 = vmatmul.mubr.msk.f32.gmra.mrb[72].mxu0 %vm187_vm0, %v19741_v3  ;;  %v6069_v3 = vld [vmem:[%s19677_s0 + $0x6d] sm:$0xff] }
 0x275   :  { %14231 = vmatprep.mubr.msk.f32.mxu0 %vm187_vm0, %v19742_v5  ;;  %v6070_v5 = vld [vmem:[%s19677_s0 + $0x75] sm:$0xff] }
 0x276   :  { %v18309_v17 = vpop.f32.mrb[34].mxu1 }
 0x277   :  { %v18311_v19 = vpop.f32.mrb[35].mxu1 }
 0x278   :  { %14232 = vmatmul.mubr.msk.f32.gmra.mrb[74].mxu0 %vm187_vm0, %v19743_v13 }
 0x279   :  { %14234 = vmatprep.mubr.msk.f32.mxu0 %vm187_vm0, %v19744_v15 }
 0x27a   :  { %v13676_v25 = vpop.f32.mrb[36].mxu1 }
 0x27b   :  { %v2205_v29 = vpop.f32.mrb[37].mxu1 }
 0x27c   :  { %14235 = vmatmul.mubr.msk.f32.gmra.mrb[76].mxu0 %vm187_vm0, %v17969_v36  ;;  %v6060_v36 = vld [vmem:[%s19677_s0 + $0x25] sm:$0xff] }
 0x27d   :  { %14237 = vmatprep.mubr.msk.f32.mxu0 %vm187_vm0, %v19745_v21  ;;  %v6071_v21 = vld [vmem:[%s19677_s0 + $0x7d] sm:$0xff] }
 0x27e   :  { %v13679_v4 = vpop.f32.mrb[38].mxu1 }
 0x27f   :  { %v2215_v7 = vpop.f32.mrb[39].mxu1 }
 0x280   :  { %14238 = vmatmul.mubr.msk.f32.gmra.mrb[78].mxu0 %vm187_vm0, %v17991_v12  ;;  %v6061_v12 = vld [vmem:[%s19677_s0 + $0x2d] sm:$0xff] }
 0x281   :  { %14240 = vmatprep.mubr.msk.f32.mxu0 %vm187_vm0, %v5254_v23  ;;  %v6072_v23 = vld [vmem:[%s19677_s0 + $0x85] sm:$0xff] }
 0x282   :  { %v18337_v22 = vpop.f32.mrb[40].mxu1 }
 0x283   :  { %v2225_v34 = vpop.f32.mrb[41].mxu1 }
 0x284   :  { %14241 = vmatmul.mubr.msk.f32.gmra.mrb[80].mxu0 %vm187_vm0, %v5255_v31  ;;  %v6073_v31 = vld [vmem:[%s19677_s0 + $0x8d] sm:$0xff] }
 0x285   :  { %14245 = vmatprep.mubr.msk.f32.mxu0 %vm187_vm0, %v6060_v36  ;;  %v6074_v36 = vld [vmem:[%s19677_s0 + $0x95] sm:$0xff] }
 0x286   :  { %v18348_v55 = vpop.f32.mrb[42].mxu1 }
 0x287   :  { %v18350_v9 = vpop.f32.mrb[43].mxu1 }
 0x288   :  { %14246 = vmatmul.mubr.msk.f32.vlgmr.msra.gmra.mrb[0].mxu0 %vm187_vm0, %v6061_v12  ;;  %v6075_v12 = vld [vmem:[%s19677_s0 + $0x9d] sm:$0xff] }
 0x289   :  { %14369 = vmatpush3.msra.mxu0 %v18115_v26  ;;  %14248 = vmatprep.mubr.msk.f32.mxu0 %vm187_vm0, %v6062_v18  ;;  %v6065_v26 = vld [vmem:[%s19677_s0 + $0x4d] sm:$0xff]  ;;  %v6076_v18 = vld [vmem:[%s19677_s0 + $0xa5] sm:$0xff] }
 0x28a   :  { %v18360_v41 = vpop.f32.mrb[44].mxu1 }
 0x28b   :  { %v18362_v49 = vpop.f32.mrb[45].mxu1 }
 0x28c   :  { %14249 = vmatmul.mubr.msk.f32.gmra.mrb[2].mxu0 %vm187_vm0, %v6063_v39 }
 0x28d   :  { %14251 = vmatprep.mubr.msk.f32.mxu0 %vm187_vm0, %v6064_v51  ;;  %v6077_v51 = vld [vmem:[%s19677_s0 + $0xad] sm:$0xff] }
 0x28e   :  { %v18372_v45 = vpop.f32.mrb[46].mxu1 }
 0x28f   :  { %v18374_v62 = vpop.f32.mrb[47].mxu1 }
 0x290   :  { %14252 = vmatmul.mubr.msk.f32.gmra.mrb[4].mxu0 %vm187_vm0, %v6065_v26  ;;  %v6078_v26 = vld [vmem:[%s19677_s0 + $0xb5] sm:$0xff] }
 0x291   :  { %14254 = vmatprep.mubr.msk.f32.mxu0 %vm187_vm0, %v6066_v16 }
 0x292   :  { %v18384_v13 = vpop.f32.mrb[48].mxu1 }
 0x293   :  { %v18386_v15 = vpop.f32.mrb[49].mxu1 }
 0x294   :  { %14255 = vmatmul.mubr.msk.f32.gmra.mrb[6].mxu0 %vm187_vm0, %v6067_v20 }
 0x295   :  { %14257 = vmatprep.mubr.msk.f32.mxu0 %vm187_vm0, %v6068_v28  ;;  %v6079_v28 = vld [vmem:[%s19677_s0 + $0xbd] sm:$0xff] }
 0x296   :  { %v18396_v25 = vpop.f32.mrb[50].mxu1 }
 0x297   :  { %v18398_v29 = vpop.f32.mrb[51].mxu1 }
 0x298   :  { %14258 = vmatmul.mubr.msk.f32.gmra.mrb[8].mxu0 %vm187_vm0, %v6069_v3  ;;  %v6080_v3 = vld [vmem:[%s19677_s0 + $0xc5] sm:$0xff] }
 0x299   :  { %14260 = vmatprep.mubr.msk.f32.mxu0 %vm187_vm0, %v6070_v5 }
 0x29a   :  { %v18408_v4 = vpop.f32.mrb[52].mxu1 }
 0x29b   :  { %v18410_v7 = vpop.f32.mrb[53].mxu1 }
 0x29c   :  { %14261 = vmatmul.mubr.msk.f32.gmra.mrb[10].mxu0 %vm187_vm0, %v6071_v21 }
 0x29d   :  { %14263 = vmatprep.mubr.msk.f32.mxu0 %vm187_vm0, %v6072_v23  ;;  %v6081_v23 = vld [vmem:[%s19677_s0 + $0xcd] sm:$0xff] }
 0x29e   :  { %v18420_v34 = vpop.f32.mrb[54].mxu1 }
 0x29f   :  { %v18422_v39 = vpop.f32.mrb[55].mxu1 }
 0x2a0   :  { %14264 = vmatmul.mubr.msk.f32.gmra.mrb[12].mxu0 %vm187_vm0, %v6073_v31  ;;  %19746 = vst [vmem:[#allocation8_spill] sm:$0xff] %v18422_v39  ;;  %v6082_v31 = vld [vmem:[%s19677_s0 + $0xd5] sm:$0xff] }
 0x2a1   :  { %14266 = vmatprep.mubr.msk.f32.mxu0 %vm187_vm0, %v6074_v36 }
 0x2a2   :  { %v18432_v16 = vpop.f32.mrb[56].mxu1 }
 0x2a3   :  { %19747 = vst [vmem:[#allocation9_spill] sm:$0xff] %v18432_v16  ;;  %v18434_v20 = vpop.f32.mrb[57].mxu1 }
 0x2a4   :  { %14267 = vmatmul.mubr.msk.f32.gmra.mrb[14].mxu0 %vm187_vm0, %v6075_v12  ;;  %19748 = vst [vmem:[#allocation10_spill] sm:$0xff] %v18434_v20 }
 0x2a5   :  { %14269 = vmatprep.mubr.msk.f32.mxu0 %vm187_vm0, %v6076_v18  ;;  %v6083_v18 = vld [vmem:[%s19677_s0 + $0xdd] sm:$0xff] }
 0x2a6   :  { %v18444_v5 = vpop.f32.mrb[58].mxu1 }
 0x2a7   :  { %19749 = vst [vmem:[#allocation11_spill] sm:$0xff] %v18444_v5  ;;  %v18446_v21 = vpop.f32.mrb[59].mxu1 }
 0x2a8   :  { %14270 = vmatmul.mubr.msk.f32.gmra.mrb[16].mxu0 %vm187_vm0, %v6077_v51  ;;  %19750 = vst [vmem:[#allocation12_spill] sm:$0xff] %v18446_v21  ;;  %v6084_v51 = vld [vmem:[%s19677_s0 + $0xe5] sm:$0xff] }
 0x2a9   :  { %14272 = vmatprep.mubr.msk.f32.mxu0 %vm187_vm0, %v6078_v26 }
 0x2aa   :  { %v18456_v36 = vpop.f32.mrb[60].mxu1 }
 0x2ab   :  { %19751 = vst [vmem:[#allocation13_spill] sm:$0xff] %v18456_v36  ;;  %v18458_v12 = vpop.f32.mrb[61].mxu1 }
 0x2ac   :  { %14273 = vmatmul.mubr.msk.f32.gmra.mrb[18].mxu0 %vm187_vm0, %v6079_v28  ;;  %19752 = vst [vmem:[#allocation14_spill] sm:$0xff] %v18458_v12 }
 0x2ad   :  { %14275 = vmatprep.mubr.msk.f32.mxu0 %vm187_vm0, %v6080_v3  ;;  %v6085_v3 = vld [vmem:[%s19677_s0 + $0xed] sm:$0xff] }
 0x2ae   :  { %v18468_v26 = vpop.f32.mrb[62].mxu1 }
 0x2af   :  { %19753 = vst [vmem:[#allocation15_spill] sm:$0xff] %v18468_v26  ;;  %v18470_v28 = vpop.f32.mrb[63].mxu1 }
 0x2b0   :  { %14276 = vmatmul.mubr.msk.f32.gmra.mrb[20].mxu0 %vm187_vm0, %v6081_v23  ;;  %19754 = vst [vmem:[#allocation16_spill] sm:$0xff] %v18470_v28  ;;  %v6086_v23 = vld [vmem:[%s19677_s0 + $0xf5] sm:$0xff] }
 0x2b1   :  { %14278 = vmatprep.mubr.msk.f32.mxu0 %vm187_vm0, %v6082_v31 }
 0x2b2   :  { %v18480_v31 = vpop.f32.mrb[64].mxu1 }
 0x2b3   :  { %19755 = vst [vmem:[#allocation17_spill] sm:$0xff] %v18480_v31  ;;  %v18482_v12 = vpop.f32.mrb[65].mxu1 }
 0x2b4   :  { %14279 = vmatmul.mubr.msk.f32.gmra.mrb[22].mxu0 %vm187_vm0, %v6083_v18  ;;  %19756 = vst [vmem:[#allocation18_spill] sm:$0xff] %v18482_v12  ;;  %v6087_v18 = vld [vmem:[%s19677_s0 + $0xfd] sm:$0xff] }
 0x2b5   :  { %14281 = vmatprep.mubr.msk.f32.mxu0 %vm187_vm0, %v6084_v51  ;;  %v6088_v51 = vld [vmem:[%s19677_s0 + $0x105] sm:$0xff] }
 0x2b6   :  { %v18492_v28 = vpop.f32.mrb[66].mxu1 }
 0x2b7   :  { %19757 = vst [vmem:[#allocation19_spill] sm:$0xff] %v18492_v28  ;;  %v18494_v26 = vpop.f32.mrb[67].mxu1 }
 0x2b8   :  { %14282 = vmatmul.mubr.msk.f32.gmra.mrb[24].mxu0 %vm187_vm0, %v6085_v3  ;;  %19758 = vst [vmem:[#allocation20_spill] sm:$0xff] %v18494_v26  ;;  %v6089_v3 = vld [vmem:[%s19677_s0 + $0x10d] sm:$0xff] }
 0x2b9   :  { %14284 = vmatprep.mubr.msk.f32.mxu0 %vm187_vm0, %v6086_v23  ;;  %v6090_v23 = vld [vmem:[%s19677_s0 + $0x115] sm:$0xff] }
 0x2ba   :  { %v18504_v12 = vpop.f32.mrb[68].mxu1 }
 0x2bb   :  { %19759 = vst [vmem:[#allocation21_spill] sm:$0xff] %v18504_v12  ;;  %v18506_v31 = vpop.f32.mrb[69].mxu1 }
 0x2bc   :  { %14285 = vmatmul.mubr.msk.f32.gmra.mrb[26].mxu0 %vm187_vm0, %v6087_v18  ;;  %19760 = vst [vmem:[#allocation22_spill] sm:$0xff] %v18506_v31  ;;  %v6091_v18 = vld [vmem:[%s19677_s0 + $0x11d] sm:$0xff] }
 0x2bd   :  { %14287 = vmatprep.mubr.msk.f32.mxu0 %vm187_vm0, %v6088_v51  ;;  %v6092_v51 = vld [vmem:[%s19677_s0 + $0x125] sm:$0xff] }
 0x2be   :  { %v18516_v26 = vpop.f32.mrb[70].mxu1 }
 0x2bf   :  { %19761 = vst [vmem:[#allocation23_spill] sm:$0xff] %v18516_v26  ;;  %v18518_v28 = vpop.f32.mrb[71].mxu1 }
 0x2c0   :  { %14288 = vmatmul.mubr.msk.f32.gmra.mrb[28].mxu0 %vm187_vm0, %v6089_v3  ;;  %19762 = vst [vmem:[#allocation24_spill] sm:$0xff] %v18518_v28  ;;  %v6093_v3 = vld [vmem:[%s19677_s0 + $0x12d] sm:$0xff] }
 0x2c1   :  { %14290 = vmatprep.mubr.msk.f32.mxu0 %vm187_vm0, %v6090_v23  ;;  %v6094_v23 = vld [vmem:[%s19677_s0 + $0x135] sm:$0xff] }
 0x2c2   :  { %v18528_v31 = vpop.f32.mrb[72].mxu1 }
 0x2c3   :  { %19763 = vst [vmem:[#allocation25_spill] sm:$0xff] %v18528_v31  ;;  %v18530_v12 = vpop.f32.mrb[73].mxu1 }
 0x2c4   :  { %14291 = vmatmul.mubr.msk.f32.gmra.mrb[30].mxu0 %vm187_vm0, %v6091_v18  ;;  %19764 = vst [vmem:[#allocation26_spill] sm:$0xff] %v18530_v12  ;;  %v6095_v18 = vld [vmem:[%s19677_s0 + $0x13d] sm:$0xff] }
 0x2c5   :  { %14293 = vmatprep.mubr.msk.f32.mxu0 %vm187_vm0, %v6092_v51  ;;  %v6096_v51 = vld [vmem:[%s19677_s0 + $0x145] sm:$0xff] }
 0x2c6   :  { %v18540_v28 = vpop.f32.mrb[74].mxu1 }
 0x2c7   :  { %19765 = vst [vmem:[#allocation27_spill] sm:$0xff] %v18540_v28  ;;  %v18542_v26 = vpop.f32.mrb[75].mxu1 }
 0x2c8   :  { %14294 = vmatmul.mubr.msk.f32.gmra.mrb[32].mxu0 %vm187_vm0, %v6093_v3  ;;  %19766 = vst [vmem:[#allocation28_spill] sm:$0xff] %v18542_v26  ;;  %v6097_v3 = vld [vmem:[%s19677_s0 + $0x14d] sm:$0xff]  ;;  %v6099_v26 = vld [vmem:[%s19677_s0 + $0x15d] sm:$0xff] }
 0x2c9   :  { %14296 = vmatprep.mubr.msk.f32.mxu0 %vm187_vm0, %v6094_v23  ;;  %v6098_v23 = vld [vmem:[%s19677_s0 + $0x155] sm:$0xff] }
 0x2cc   :  { %14297 = vmatmul.mubr.msk.f32.gmra.mrb[34].mxu0 %vm187_vm0, %v6095_v18  ;;  %v6100_v18 = vld [vmem:[%s19677_s0 + $0x165] sm:$0xff] }
 0x2cd   :  { %14299 = vmatprep.mubr.msk.f32.mxu0 %vm187_vm0, %v6096_v51  ;;  %v6101_v51 = vld [vmem:[%s19677_s0 + $0x16d] sm:$0xff] }
 0x2d0   :  { %14300 = vmatmul.mubr.msk.f32.gmra.mrb[36].mxu0 %vm187_vm0, %v6097_v3  ;;  %v6102_v3 = vld [vmem:[%s19677_s0 + $0x175] sm:$0xff] }
 0x2d1   :  { %14302 = vmatprep.mubr.msk.f32.mxu0 %vm187_vm0, %v6098_v23  ;;  %v6103_v23 = vld [vmem:[%s19677_s0 + $0x17d] sm:$0xff] }
 0x2d4   :  { %14303 = vmatmul.mubr.msk.f32.gmra.mrb[38].mxu0 %vm187_vm0, %v6099_v26  ;;  %v6104_v26 = vld [vmem:[%s19677_s0 + $0x185] sm:$0xff] }
 0x2d5   :  { %14305 = vmatprep.mubr.msk.f32.mxu0 %vm187_vm0, %v6100_v18 }
 0x2d6   :  { %v13861_v18 = vpop.f32.mrb[76].mxu1 }
 0x2d7   :  { %v18576_v28 = vpop.f32.mrb[77].mxu1 }
 0x2d8   :  { %14306 = vmatmul.mubr.msk.f32.gmra.mrb[40].mxu0 %vm187_vm0, %v6101_v51  ;;  %19767 = vst [vmem:[#allocation29_spill] sm:$0xff] %v18576_v28  ;;  %v6105_v51 = vld [vmem:[%s19677_s0 + $0x18d] sm:$0xff] }
 0x2d9   :  { %14308 = vmatprep.mubr.msk.f32.mxu0 %vm187_vm0, %v6102_v3  ;;  %v6106_v3 = vld [vmem:[%s19677_s0 + $0x195] sm:$0xff] }
 0x2da   :  { %v13864_v12 = vpop.f32.mrb[78].mxu1 }
 0x2db   :  { %v3301_v31 = vpop.f32.mrb[79].mxu1  ;;  %v6109_v12 = vld [vmem:[%s19677_s0 + $0x1ad] sm:$0xff] }
 0x2dc   :  { %14309 = vmatmul.mubr.msk.f32.gmra.mrb[42].mxu0 %vm187_vm0, %v6103_v23  ;;  %v6107_v23 = vld [vmem:[%s19677_s0 + $0x19d] sm:$0xff]  ;;  %v6110_v31 = vld [vmem:[%s19677_s0 + $0x1b5] sm:$0xff] }
 0x2dd   :  { %14311 = vmatprep.mubr.msk.f32.mxu0 %vm187_vm0, %v6104_v26  ;;  %v6108_v26 = vld [vmem:[%s19677_s0 + $0x1a5] sm:$0xff] }
 0x2de   :  { %v13867_v18 = vpop.f32.mrb[80].mxu1 }
 0x2df   :  { %v3311_v28 = vpop.f32.mrb[81].mxu1  ;;  %v6116_v18 = vld [vmem:[%s19677_s0 + $0x1e5] sm:$0xff] }
 0x2e0   :  { %14312 = vmatmul.mubr.msk.f32.gmra.mrb[44].mxu0 %vm187_vm0, %v6105_v51  ;;  %v6111_v28 = vld [vmem:[%s19677_s0 + $0x1bd] sm:$0xff]  ;;  %v6112_v51 = vld [vmem:[%s19677_s0 + $0x1c5] sm:$0xff] }
 0x2e1   :  { %14314 = vmatprep.mubr.msk.f32.mxu0 %vm187_vm0, %v6106_v3  ;;  %v6113_v3 = vld [vmem:[%s19677_s0 + $0x1cd] sm:$0xff] }
 0x2e4   :  { %14315 = vmatmul.mubr.msk.f32.gmra.mrb[46].mxu0 %vm187_vm0, %v6107_v23  ;;  %v6114_v23 = vld [vmem:[%s19677_s0 + $0x1d5] sm:$0xff] }
 0x2e5   :  { %14317 = vmatprep.mubr.msk.f32.mxu0 %vm187_vm0, %v6108_v26  ;;  %v6115_v26 = vld [vmem:[%s19677_s0 + $0x1dd] sm:$0xff] }
 0x2e8   :  { %14318 = vmatmul.mubr.msk.f32.gmra.mrb[48].mxu0 %vm187_vm0, %v6109_v12  ;;  %v6117_v12 = vld [vmem:[%s19677_s0 + $0x1ed] sm:$0xff] }
 0x2e9   :  { %14320 = vmatprep.mubr.msk.f32.mxu0 %vm187_vm0, %v6110_v31  ;;  %v6118_v31 = vld [vmem:[%s19677_s0 + $0x1f5] sm:$0xff] }
 0x2ec   :  { %14321 = vmatmul.mubr.msk.f32.gmra.mrb[50].mxu0 %vm187_vm0, %v6111_v28  ;;  %v6119_v28 = vld [vmem:[%s19677_s0 + $0x1fd] sm:$0xff] }
 0x2ed   :  { %14323 = vmatprep.mubr.msk.f32.mxu0 %vm187_vm0, %v6112_v51  ;;  %v6120_v51 = vld [vmem:[%s19677_s0 + $0x205] sm:$0xff] }
 0x2f0   :  { %14324 = vmatmul.mubr.msk.f32.gmra.mrb[52].mxu0 %vm187_vm0, %v6113_v3  ;;  %v6121_v3 = vld [vmem:[%s19677_s0 + $0x20d] sm:$0xff] }
 0x2f1   :  { %14326 = vmatprep.mubr.msk.f32.mxu0 %vm187_vm0, %v6114_v23  ;;  %v6122_v23 = vld [vmem:[%s19677_s0 + $0x215] sm:$0xff] }
 0x2f4   :  { %14327 = vmatmul.mubr.msk.f32.gmra.mrb[54].mxu0 %vm187_vm0, %v6115_v26  ;;  %v6123_v26 = vld [vmem:[%s19677_s0 + $0x21d] sm:$0xff] }
 0x2f5   :  { %14329 = vmatprep.mubr.msk.f32.mxu0 %vm187_vm0, %v6116_v18  ;;  %v6124_v18 = vld [vmem:[%s19677_s0 + $0x225] sm:$0xff] }
 0x2f8   :  { %14330 = vmatmul.mubr.msk.f32.gmra.mrb[56].mxu0 %vm187_vm0, %v6117_v12  ;;  %v6125_v12 = vld [vmem:[%s19677_s0 + $0x22d] sm:$0xff] }
 0x2f9   :  { %14332 = vmatprep.mubr.msk.f32.mxu0 %vm187_vm0, %v6118_v31  ;;  %v6126_v31 = vld [vmem:[%s19677_s0 + $0x235] sm:$0xff] }
 0x2fc   :  { %14333 = vmatmul.mubr.msk.f32.gmra.mrb[58].mxu0 %vm187_vm0, %v6119_v28  ;;  %v6127_v28 = vld [vmem:[%s19677_s0 + $0x23d] sm:$0xff] }
 0x2fd   :  { %14335 = vmatprep.mubr.msk.f32.mxu0 %vm187_vm0, %v6120_v51  ;;  %v6128_v51 = vld [vmem:[%s19677_s0 + $0x245] sm:$0xff] }
 0x300   :  { %14336 = vmatmul.mubr.msk.f32.gmra.mrb[60].mxu0 %vm187_vm0, %v6121_v3  ;;  %v6129_v3 = vld [vmem:[%s19677_s0 + $0x24d] sm:$0xff] }
 0x301   :  { %14338 = vmatprep.mubr.msk.f32.mxu0 %vm187_vm0, %v6122_v23  ;;  %v6130_v23 = vld [vmem:[%s19677_s0 + $0x255] sm:$0xff] }
 0x304   :  { %14339 = vmatmul.mubr.msk.f32.gmra.mrb[62].mxu0 %vm187_vm0, %v6123_v26  ;;  %v6131_v26 = vld [vmem:[%s19677_s0 + $0x25d] sm:$0xff] }
 0x305   :  { %14341 = vmatprep.mubr.msk.f32.mxu0 %vm187_vm0, %v6124_v18  ;;  %v6132_v18 = vld [vmem:[%s19677_s0 + $0x265] sm:$0xff] }
 0x308   :  { %14342 = vmatmul.mubr.msk.f32.gmra.mrb[64].mxu0 %vm187_vm0, %v6125_v12  ;;  %v6133_v12 = vld [vmem:[%s19677_s0 + $0x26d] sm:$0xff] }
 0x309   :  { %14344 = vmatprep.mubr.msk.f32.mxu0 %vm187_vm0, %v6126_v31  ;;  %v6134_v31 = vld [vmem:[%s19677_s0 + $0x275] sm:$0xff] }
 0x30c   :  { %14345 = vmatmul.mubr.msk.f32.gmra.mrb[66].mxu0 %vm187_vm0, %v6127_v28  ;;  %v6135_v28 = vld [vmem:[%s19677_s0 + $0x27d] sm:$0xff] }
 0x30d   :  { %14347 = vmatprep.mubr.msk.f32.mxu0 %vm187_vm0, %v6128_v51  ;;  %v6136_v51 = vld [vmem:[%s19677_s0 + $0x285] sm:$0xff] }
 0x310   :  { %14348 = vmatmul.mubr.msk.f32.gmra.mrb[68].mxu0 %vm187_vm0, %v6129_v3  ;;  %v6137_v3 = vld [vmem:[%s19677_s0 + $0x28d] sm:$0xff] }
 0x311   :  { %14350 = vmatprep.mubr.msk.f32.mxu0 %vm187_vm0, %v6130_v23  ;;  %v6138_v23 = vld [vmem:[%s19677_s0 + $0x295] sm:$0xff] }
 0x314   :  { %14351 = vmatmul.mubr.msk.f32.gmra.mrb[70].mxu0 %vm187_vm0, %v6131_v26  ;;  %v6139_v26 = vld [vmem:[%s19677_s0 + $0x29d] sm:$0xff] }
 0x315   :  { %14353 = vmatprep.mubr.msk.f32.mxu0 %vm187_vm0, %v6132_v18  ;;  %v6140_v18 = vld [vmem:[%s19677_s0 + $0x2a5] sm:$0xff] }
 0x318   :  { %14354 = vmatmul.mubr.msk.f32.gmra.mrb[72].mxu0 %vm187_vm0, %v6133_v12  ;;  %v6141_v12 = vld [vmem:[%s19677_s0 + $0x2ad] sm:$0xff] }
 0x319   :  { %14356 = vmatprep.mubr.msk.f32.mxu0 %vm187_vm0, %v6134_v31  ;;  %v6946_v31 = vld [vmem:[%s19677_s0 + $0x26] sm:$0xff] }
 0x31c   :  { %14357 = vmatmul.mubr.msk.f32.gmra.mrb[74].mxu0 %vm187_vm0, %v6135_v28  ;;  %v6947_v28 = vld [vmem:[%s19677_s0 + $0x2e] sm:$0xff] }
 0x31d   :  { %14359 = vmatprep.mubr.msk.f32.mxu0 %vm187_vm0, %v6136_v51  ;;  %v6948_v51 = vld [vmem:[%s19677_s0 + $0x36] sm:$0xff] }
 0x320   :  { %14360 = vmatmul.mubr.msk.f32.gmra.mrb[76].mxu0 %vm187_vm0, %v6137_v3  ;;  %v6949_v3 = vld [vmem:[%s19677_s0 + $0x3e] sm:$0xff] }
 0x321   :  { %14362 = vmatprep.mubr.msk.f32.mxu0 %vm187_vm0, %v6138_v23  ;;  %v6950_v23 = vld [vmem:[%s19677_s0 + $0x46] sm:$0xff] }
 0x324   :  { %14363 = vmatmul.mubr.msk.f32.gmra.mrb[78].mxu0 %vm187_vm0, %v6139_v26  ;;  %v6951_v26 = vld [vmem:[%s19677_s0 + $0x4e] sm:$0xff] }
 0x325   :  { %14365 = vmatprep.mubr.msk.f32.mxu0 %vm187_vm0, %v6140_v18  ;;  %v6952_v18 = vld [vmem:[%s19677_s0 + $0x56] sm:$0xff] }
 0x328   :  { %14366 = vmatmul.mubr.msk.f32.gmra.mrb[80].mxu0 %vm187_vm0, %v6141_v12  ;;  %v6953_v12 = vld [vmem:[%s19677_s0 + $0x5e] sm:$0xff] }
 0x329   :  { %14370 = vmatprep.mubr.msk.f32.mxu0 %vm187_vm0, %v6946_v31  ;;  %v6954_v31 = vld [vmem:[%s19677_s0 + $0x66] sm:$0xff] }
 0x32c   :  { %14371 = vmatmul.mubr.msk.f32.vlgmr.msra.gmra.mrb[0].mxu0 %vm187_vm0, %v6947_v28  ;;  %v6955_v28 = vld [vmem:[%s19677_s0 + $0x6e] sm:$0xff] }
 0x32d   :  { %14373 = vmatprep.mubr.msk.f32.mxu0 %vm187_vm0, %v6948_v51  ;;  %v6956_v51 = vld [vmem:[%s19677_s0 + $0x76] sm:$0xff] }
 0x330   :  { %14374 = vmatmul.mubr.msk.f32.gmra.mrb[2].mxu0 %vm187_vm0, %v6949_v3  ;;  %v6957_v3 = vld [vmem:[%s19677_s0 + $0x7e] sm:$0xff] }
 0x331   :  { %14376 = vmatprep.mubr.msk.f32.mxu0 %vm187_vm0, %v6950_v23  ;;  %v6958_v23 = vld [vmem:[%s19677_s0 + $0x86] sm:$0xff] }
 0x334   :  { %14377 = vmatmul.mubr.msk.f32.gmra.mrb[4].mxu0 %vm187_vm0, %v6951_v26  ;;  %v6959_v26 = vld [vmem:[%s19677_s0 + $0x8e] sm:$0xff] }
 0x335   :  { %14379 = vmatprep.mubr.msk.f32.mxu0 %vm187_vm0, %v6952_v18  ;;  %v6960_v18 = vld [vmem:[%s19677_s0 + $0x96] sm:$0xff] }
 0x338   :  { %14380 = vmatmul.mubr.msk.f32.gmra.mrb[6].mxu0 %vm187_vm0, %v6953_v12  ;;  %v6961_v12 = vld [vmem:[%s19677_s0 + $0x9e] sm:$0xff] }
 0x339   :  { %14382 = vmatprep.mubr.msk.f32.mxu0 %vm187_vm0, %v6954_v31  ;;  %v6962_v31 = vld [vmem:[%s19677_s0 + $0xa6] sm:$0xff] }
 0x33c   :  { %14383 = vmatmul.mubr.msk.f32.gmra.mrb[8].mxu0 %vm187_vm0, %v6955_v28  ;;  %v6963_v28 = vld [vmem:[%s19677_s0 + $0xae] sm:$0xff] }
 0x33d   :  { %14385 = vmatprep.mubr.msk.f32.mxu0 %vm187_vm0, %v6956_v51  ;;  %v6964_v51 = vld [vmem:[%s19677_s0 + $0xb6] sm:$0xff] }
 0x340   :  { %14386 = vmatmul.mubr.msk.f32.gmra.mrb[10].mxu0 %vm187_vm0, %v6957_v3  ;;  %v6965_v3 = vld [vmem:[%s19677_s0 + $0xbe] sm:$0xff] }
 0x341   :  { %14388 = vmatprep.mubr.msk.f32.mxu0 %vm187_vm0, %v6958_v23  ;;  %v6966_v23 = vld [vmem:[%s19677_s0 + $0xc6] sm:$0xff] }
 0x344   :  { %14389 = vmatmul.mubr.msk.f32.gmra.mrb[12].mxu0 %vm187_vm0, %v6959_v26  ;;  %v6967_v26 = vld [vmem:[%s19677_s0 + $0xce] sm:$0xff] }
 0x345   :  { %14391 = vmatprep.mubr.msk.f32.mxu0 %vm187_vm0, %v6960_v18  ;;  %v6968_v18 = vld [vmem:[%s19677_s0 + $0xd6] sm:$0xff] }
 0x348   :  { %14392 = vmatmul.mubr.msk.f32.gmra.mrb[14].mxu0 %vm187_vm0, %v6961_v12  ;;  %v6969_v12 = vld [vmem:[%s19677_s0 + $0xde] sm:$0xff] }
 0x349   :  { %14394 = vmatprep.mubr.msk.f32.mxu0 %vm187_vm0, %v6962_v31  ;;  %v6970_v31 = vld [vmem:[%s19677_s0 + $0xe6] sm:$0xff] }
 0x34c   :  { %14395 = vmatmul.mubr.msk.f32.gmra.mrb[16].mxu0 %vm187_vm0, %v6963_v28  ;;  %v6971_v28 = vld [vmem:[%s19677_s0 + $0xee] sm:$0xff] }
 0x34d   :  { %14397 = vmatprep.mubr.msk.f32.mxu0 %vm187_vm0, %v6964_v51  ;;  %v6972_v51 = vld [vmem:[%s19677_s0 + $0xf6] sm:$0xff] }
 0x350   :  { %14398 = vmatmul.mubr.msk.f32.gmra.mrb[18].mxu0 %vm187_vm0, %v6965_v3  ;;  %v6973_v3 = vld [vmem:[%s19677_s0 + $0xfe] sm:$0xff] }
 0x351   :  { %14400 = vmatprep.mubr.msk.f32.mxu0 %vm187_vm0, %v6966_v23  ;;  %v6974_v23 = vld [vmem:[%s19677_s0 + $0x106] sm:$0xff] }
 0x354   :  { %14401 = vmatmul.mubr.msk.f32.gmra.mrb[20].mxu0 %vm187_vm0, %v6967_v26  ;;  %v6975_v26 = vld [vmem:[%s19677_s0 + $0x10e] sm:$0xff] }
 0x355   :  { %14403 = vmatprep.mubr.msk.f32.mxu0 %vm187_vm0, %v6968_v18  ;;  %v6976_v18 = vld [vmem:[%s19677_s0 + $0x116] sm:$0xff] }
 0x358   :  { %14404 = vmatmul.mubr.msk.f32.gmra.mrb[22].mxu0 %vm187_vm0, %v6969_v12  ;;  %v6977_v12 = vld [vmem:[%s19677_s0 + $0x11e] sm:$0xff] }
 0x359   :  { %14406 = vmatprep.mubr.msk.f32.mxu0 %vm187_vm0, %v6970_v31  ;;  %v6978_v31 = vld [vmem:[%s19677_s0 + $0x126] sm:$0xff] }
 0x35c   :  { %14407 = vmatmul.mubr.msk.f32.gmra.mrb[24].mxu0 %vm187_vm0, %v6971_v28  ;;  %v6979_v28 = vld [vmem:[%s19677_s0 + $0x12e] sm:$0xff] }
 0x35d   :  { %14409 = vmatprep.mubr.msk.f32.mxu0 %vm187_vm0, %v6972_v51  ;;  %v6980_v51 = vld [vmem:[%s19677_s0 + $0x136] sm:$0xff] }
 0x360   :  { %14410 = vmatmul.mubr.msk.f32.gmra.mrb[26].mxu0 %vm187_vm0, %v6973_v3  ;;  %v6981_v3 = vld [vmem:[%s19677_s0 + $0x13e] sm:$0xff] }
 0x361   :  { %14412 = vmatprep.mubr.msk.f32.mxu0 %vm187_vm0, %v6974_v23  ;;  %v6982_v23 = vld [vmem:[%s19677_s0 + $0x146] sm:$0xff] }
 0x364   :  { %14413 = vmatmul.mubr.msk.f32.gmra.mrb[28].mxu0 %vm187_vm0, %v6975_v26  ;;  %v6983_v26 = vld [vmem:[%s19677_s0 + $0x14e] sm:$0xff] }
 0x365   :  { %14415 = vmatprep.mubr.msk.f32.mxu0 %vm187_vm0, %v6976_v18  ;;  %v6984_v18 = vld [vmem:[%s19677_s0 + $0x156] sm:$0xff] }
 0x368   :  { %14416 = vmatmul.mubr.msk.f32.gmra.mrb[30].mxu0 %vm187_vm0, %v6977_v12  ;;  %v6985_v12 = vld [vmem:[%s19677_s0 + $0x15e] sm:$0xff] }
 0x369   :  { %14418 = vmatprep.mubr.msk.f32.mxu0 %vm187_vm0, %v6978_v31  ;;  %v6986_v31 = vld [vmem:[%s19677_s0 + $0x166] sm:$0xff] }
 0x36c   :  { %14419 = vmatmul.mubr.msk.f32.gmra.mrb[32].mxu0 %vm187_vm0, %v6979_v28  ;;  %v6987_v28 = vld [vmem:[%s19677_s0 + $0x16e] sm:$0xff] }
 0x36d   :  { %14421 = vmatprep.mubr.msk.f32.mxu0 %vm187_vm0, %v6980_v51  ;;  %v6988_v51 = vld [vmem:[%s19677_s0 + $0x176] sm:$0xff] }
 0x370   :  { %14422 = vmatmul.mubr.msk.f32.gmra.mrb[34].mxu0 %vm187_vm0, %v6981_v3  ;;  %v6989_v3 = vld [vmem:[%s19677_s0 + $0x17e] sm:$0xff] }
 0x371   :  { %14424 = vmatprep.mubr.msk.f32.mxu0 %vm187_vm0, %v6982_v23  ;;  %v6990_v23 = vld [vmem:[%s19677_s0 + $0x186] sm:$0xff] }
 0x374   :  { %14425 = vmatmul.mubr.msk.f32.gmra.mrb[36].mxu0 %vm187_vm0, %v6983_v26  ;;  %v6991_v26 = vld [vmem:[%s19677_s0 + $0x18e] sm:$0xff] }
 0x375   :  { %14427 = vmatprep.mubr.msk.f32.mxu0 %vm187_vm0, %v6984_v18  ;;  %v6992_v18 = vld [vmem:[%s19677_s0 + $0x196] sm:$0xff] }
 0x378   :  { %14428 = vmatmul.mubr.msk.f32.gmra.mrb[38].mxu0 %vm187_vm0, %v6985_v12  ;;  %v6993_v12 = vld [vmem:[%s19677_s0 + $0x19e] sm:$0xff] }
 0x379   :  { %14430 = vmatprep.mubr.msk.f32.mxu0 %vm187_vm0, %v6986_v31  ;;  %v6994_v31 = vld [vmem:[%s19677_s0 + $0x1a6] sm:$0xff] }
 0x37c   :  { %14431 = vmatmul.mubr.msk.f32.gmra.mrb[40].mxu0 %vm187_vm0, %v6987_v28  ;;  %v6995_v28 = vld [vmem:[%s19677_s0 + $0x1ae] sm:$0xff] }
 0x37d   :  { %14433 = vmatprep.mubr.msk.f32.mxu0 %vm187_vm0, %v6988_v51  ;;  %v6996_v51 = vld [vmem:[%s19677_s0 + $0x1b6] sm:$0xff] }
 0x380   :  { %14434 = vmatmul.mubr.msk.f32.gmra.mrb[42].mxu0 %vm187_vm0, %v6989_v3  ;;  %v6997_v3 = vld [vmem:[%s19677_s0 + $0x1be] sm:$0xff] }
 0x381   :  { %14436 = vmatprep.mubr.msk.f32.mxu0 %vm187_vm0, %v6990_v23  ;;  %v6998_v23 = vld [vmem:[%s19677_s0 + $0x1c6] sm:$0xff] }
 0x384   :  { %14437 = vmatmul.mubr.msk.f32.gmra.mrb[44].mxu0 %vm187_vm0, %v6991_v26  ;;  %v6999_v26 = vld [vmem:[%s19677_s0 + $0x1ce] sm:$0xff] }
 0x385   :  { %14439 = vmatprep.mubr.msk.f32.mxu0 %vm187_vm0, %v6992_v18  ;;  %v7000_v18 = vld [vmem:[%s19677_s0 + $0x1d6] sm:$0xff] }
 0x388   :  { %14440 = vmatmul.mubr.msk.f32.gmra.mrb[46].mxu0 %vm187_vm0, %v6993_v12  ;;  %v7001_v12 = vld [vmem:[%s19677_s0 + $0x1de] sm:$0xff] }
 0x389   :  { %14442 = vmatprep.mubr.msk.f32.mxu0 %vm187_vm0, %v6994_v31  ;;  %v7002_v31 = vld [vmem:[%s19677_s0 + $0x1e6] sm:$0xff] }
 0x38c   :  { %14443 = vmatmul.mubr.msk.f32.gmra.mrb[48].mxu0 %vm187_vm0, %v6995_v28  ;;  %v7003_v28 = vld [vmem:[%s19677_s0 + $0x1ee] sm:$0xff] }
 0x38d   :  { %14445 = vmatprep.mubr.msk.f32.mxu0 %vm187_vm0, %v6996_v51  ;;  %v7004_v51 = vld [vmem:[%s19677_s0 + $0x1f6] sm:$0xff] }
 0x390   :  { %14446 = vmatmul.mubr.msk.f32.gmra.mrb[50].mxu0 %vm187_vm0, %v6997_v3  ;;  %v15812_v3 = vmov 0.0  }
 0x391   :  { %14448 = vmatprep.mubr.msk.f32.mxu0 %vm187_vm0, %v6998_v23  ;;  %8086 = vst.msk [vmem:[#allocation3] sm:$0xff] %vm8003_vm1, %v15812_v3  ;;  %8087 = vst.msk [vmem:[#allocation3 + $0x8] sm:$0xff] %vm8003_vm1, %v15812_v3  ;;  %v8360_v23 = vld [vmem:[%s19680_s3 + $0x10] sm:$0xff] }
 0x392   :  { %8088 = vst.msk [vmem:[#allocation3 + $0x10] sm:$0xff] %vm8003_vm1, %v15812_v3  ;;  %8089 = vst.msk [vmem:[#allocation3 + $0x18] sm:$0xff] %vm8003_vm1, %v15812_v3 }
 0x393   :  { %8090 = vst.msk [vmem:[#allocation3 + $0x20] sm:$0xff] %vm8003_vm1, %v15812_v3  ;;  %8091 = vst.msk [vmem:[#allocation3 + $0x28] sm:$0xff] %vm8003_vm1, %v15812_v3 }
 0x394   :  { %14449 = vmatmul.mubr.msk.f32.gmra.mrb[52].mxu0 %vm187_vm0, %v6999_v26  ;;  %8092 = vst.msk [vmem:[#allocation3 + $0x30] sm:$0xff] %vm8003_vm1, %v15812_v3  ;;  %8093 = vst.msk [vmem:[#allocation3 + $0x38] sm:$0xff] %vm8003_vm1, %v15812_v3  ;;  %v8361_v26 = vld [vmem:[%s19680_s3 + $0x18] sm:$0xff] }
 0x395   :  { %14451 = vmatprep.mubr.msk.f32.mxu0 %vm187_vm0, %v7000_v18  ;;  %8094 = vst.msk [vmem:[#allocation3 + $0x40] sm:$0xff] %vm8003_vm1, %v15812_v3  ;;  %8095 = vst.msk [vmem:[#allocation3 + $0x48] sm:$0xff] %vm8003_vm1, %v15812_v3  ;;  %v7005_v18 = vld [vmem:[%s19677_s0 + $0x1fe] sm:$0xff] }
 0x396   :  { %8096 = vst.msk [vmem:[#allocation3 + $0x50] sm:$0xff] %vm8003_vm1, %v15812_v3  ;;  %8097 = vst.msk [vmem:[#allocation3 + $0x58] sm:$0xff] %vm8003_vm1, %v15812_v3 }
 0x397   :  { %8098 = vst.msk [vmem:[#allocation3 + $0x60] sm:$0xff] %vm8003_vm1, %v15812_v3  ;;  %8099 = vst.msk [vmem:[#allocation3 + $0x68] sm:$0xff] %vm8003_vm1, %v15812_v3 }
 0x398   :  { %14452 = vmatmul.mubr.msk.f32.gmra.mrb[54].mxu0 %vm187_vm0, %v7001_v12  ;;  %8100 = vst.msk [vmem:[#allocation3 + $0x70] sm:$0xff] %vm8003_vm1, %v15812_v3  ;;  %8101 = vst.msk [vmem:[#allocation3 + $0x78] sm:$0xff] %vm8003_vm1, %v15812_v3  ;;  %v14880_v12 = vpack.c.bf16 %v8361_v26, %v8360_v23  ;;  %v7009_v23 = vld [vmem:[%s19677_s0 + $0x21e] sm:$0xff]  ;;  %v7010_v26 = vld [vmem:[%s19677_s0 + $0x226] sm:$0xff] }
 0x399   :  { %14454 = vmatprep.mubr.msk.f32.mxu0 %vm187_vm0, %v7002_v31  ;;  %8102 = vst.msk [vmem:[#allocation3 + $0x80] sm:$0xff] %vm8003_vm1, %v15812_v3  ;;  %8103 = vst.msk [vmem:[#allocation3 + $0x88] sm:$0xff] %vm8003_vm1, %v15812_v3  ;;  %v7006_v31 = vld [vmem:[%s19677_s0 + $0x206] sm:$0xff] }
 0x39a   :  { %8104 = vst.msk [vmem:[#allocation3 + $0x90] sm:$0xff] %vm8003_vm1, %v15812_v3  ;;  %8105 = vst.msk [vmem:[#allocation3 + $0x98] sm:$0xff] %vm8003_vm1, %v15812_v3  ;;  %14881 = vmatprep.subr.bf16.mxu1 %v14880_v12 }
 0x39b   :  { %8106 = vst.msk [vmem:[#allocation3 + $0xa0] sm:$0xff] %vm8003_vm1, %v15812_v3  ;;  %8107 = vst.msk [vmem:[#allocation3 + $0xa8] sm:$0xff] %vm8003_vm1, %v15812_v3  ;;  %14883 = vmatpush3.bf16.msra.mxu1 %v14880_v12  ;;  %v7012_v12 = vld [vmem:[%s19677_s0 + $0x236] sm:$0xff] }
 0x39c   :  { %8108 = vst.msk [vmem:[#allocation3 + $0xb0] sm:$0xff] %vm8003_vm1, %v15812_v3  ;;  %8109 = vst.msk [vmem:[#allocation3 + $0xb8] sm:$0xff] %vm8003_vm1, %v15812_v3  ;;  %14455 = vmatmul.mubr.msk.f32.gmra.mrb[56].mxu0 %vm187_vm0, %v7003_v28  ;;  %v7007_v28 = vld [vmem:[%s19677_s0 + $0x20e] sm:$0xff] }
 0x39d   :  { %8110 = vst.msk [vmem:[#allocation3 + $0xc0] sm:$0xff] %vm8003_vm1, %v15812_v3  ;;  %8111 = vst.msk [vmem:[#allocation3 + $0xc8] sm:$0xff] %vm8003_vm1, %v15812_v3  ;;  %14457 = vmatprep.mubr.msk.f32.mxu0 %vm187_vm0, %v7004_v51  ;;  %v8334_v51 = vld [vmem:[#allocation3 + $0x1] sm:$0xff] }
 0x39e   :  { %8112 = vst.msk [vmem:[#allocation3 + $0xd0] sm:$0xff] %vm8003_vm1, %v15812_v3  ;;  %8113 = vst.msk [vmem:[#allocation3 + $0xd8] sm:$0xff] %vm8003_vm1, %v15812_v3  ;;  %14497 = vmatprep.mubr.msk.f32.mxu1 %vm8003_vm1, %v8334_v51  ;;  %v7015_v51 = vld [vmem:[%s19677_s0 + $0x24e] sm:$0xff] }
 0x39f   :  { %8114 = vst.msk [vmem:[#allocation3 + $0xe0] sm:$0xff] %vm8003_vm1, %v15812_v3  ;;  %v7008_v3 = vld [vmem:[%s19677_s0 + $0x216] sm:$0xff] }
 0x3a0   :  { %14458 = vmatmul.mubr.msk.f32.gmra.mrb[58].mxu0 %vm187_vm0, %v7005_v18  ;;  %v7011_v18 = vld [vmem:[%s19677_s0 + $0x22e] sm:$0xff] }
 0x3a1   :  { %14460 = vmatprep.mubr.msk.f32.mxu0 %vm187_vm0, %v7006_v31  ;;  %v7013_v31 = vld [vmem:[%s19677_s0 + $0x23e] sm:$0xff] }
 0x3a4   :  { %14461 = vmatmul.mubr.msk.f32.gmra.mrb[60].mxu0 %vm187_vm0, %v7007_v28  ;;  %v7014_v28 = vld [vmem:[%s19677_s0 + $0x246] sm:$0xff] }
 0x3a5   :  { %14463 = vmatprep.mubr.msk.f32.mxu0 %vm187_vm0, %v7008_v3  ;;  %v7016_v3 = vld [vmem:[%s19677_s0 + $0x256] sm:$0xff] }
 0x3a8   :  { %14464 = vmatmul.mubr.msk.f32.gmra.mrb[62].mxu0 %vm187_vm0, %v7009_v23  ;;  %v7017_v23 = vld [vmem:[%s19677_s0 + $0x25e] sm:$0xff] }
 0x3a9   :  { %14466 = vmatprep.mubr.msk.f32.mxu0 %vm187_vm0, %v7010_v26  ;;  %v7018_v26 = vld [vmem:[%s19677_s0 + $0x266] sm:$0xff] }
 0x3ac   :  { %14467 = vmatmul.mubr.msk.f32.gmra.mrb[64].mxu0 %vm187_vm0, %v7011_v18  ;;  %v7019_v18 = vld [vmem:[%s19677_s0 + $0x26e] sm:$0xff] }
 0x3ad   :  { %14469 = vmatprep.mubr.msk.f32.mxu0 %vm187_vm0, %v7012_v12  ;;  %v7020_v12 = vld [vmem:[%s19677_s0 + $0x276] sm:$0xff] }
 0x3b0   :  { %14470 = vmatmul.mubr.msk.f32.gmra.mrb[66].mxu0 %vm187_vm0, %v7013_v31  ;;  %v7021_v31 = vld [vmem:[%s19677_s0 + $0x27e] sm:$0xff] }
 0x3b1   :  { %14472 = vmatprep.mubr.msk.f32.mxu0 %vm187_vm0, %v7014_v28  ;;  %v7022_v28 = vld [vmem:[%s19677_s0 + $0x286] sm:$0xff] }
 0x3b4   :  { %14473 = vmatmul.mubr.msk.f32.gmra.mrb[68].mxu0 %vm187_vm0, %v7015_v51  ;;  %v7023_v51 = vld [vmem:[%s19677_s0 + $0x28e] sm:$0xff] }
 0x3b5   :  { %14475 = vmatprep.mubr.msk.f32.mxu0 %vm187_vm0, %v7016_v3  ;;  %v7024_v3 = vld [vmem:[%s19677_s0 + $0x296] sm:$0xff] }
 0x3b8   :  { %14476 = vmatmul.mubr.msk.f32.gmra.mrb[70].mxu0 %vm187_vm0, %v7017_v23  ;;  %v7025_v23 = vld [vmem:[%s19677_s0 + $0x29e] sm:$0xff] }
 0x3b9   :  { %14478 = vmatprep.mubr.msk.f32.mxu0 %vm187_vm0, %v7018_v26  ;;  %v7026_v26 = vld [vmem:[%s19677_s0 + $0x2a6] sm:$0xff] }
 0x3bc   :  { %14479 = vmatmul.mubr.msk.f32.gmra.mrb[72].mxu0 %vm187_vm0, %v7019_v18  ;;  %v7027_v18 = vld [vmem:[%s19677_s0 + $0x2ae] sm:$0xff] }
 0x3bd   :  { %14481 = vmatprep.mubr.msk.f32.mxu0 %vm187_vm0, %v7020_v12 }
 0x3c0   :  { %14482 = vmatmul.mubr.msk.f32.gmra.mrb[74].mxu0 %vm187_vm0, %v7021_v31  ;;  %v19095_v31 = vld [vmem:[%s19679_s2] ss:$0 sm:$0xff] }
 0x3c1   :  { %14484 = vmatprep.mubr.msk.f32.mxu0 %vm187_vm0, %v7022_v28 }
 0x3c4   :  { %14485 = vmatmul.mubr.msk.f32.gmra.mrb[76].mxu0 %vm187_vm0, %v7023_v51 }
 0x3c5   :  { %14487 = vmatprep.mubr.msk.f32.mxu0 %vm187_vm0, %v7024_v3 }
 0x3c8   :  { %14488 = vmatmul.mubr.msk.f32.gmra.mrb[78].mxu0 %vm187_vm0, %v7025_v23 }
 0x3c9   :  { %14490 = vmatprep.mubr.msk.f32.mxu0 %vm187_vm0, %v7026_v26 }
 0x3cc   :  { %14491 = vmatmul.mubr.msk.f32.gmra.mrb[80].mxu0 %vm187_vm0, %v7027_v18 }
 0x3ff   :  { %v14372_v12 = vpop.f32.mrb[0].mxu0 }
 0x400   :  { %v14918_v28 = vadd.f32 %v14372_v12, %v18173_v33  ;;  %v7341_v51 = vpop.f32.mrb[1].mxu0 }
 0x401   :  { %v14919_v3 = vadd.f32 %v7341_v51, %v18175_v35 }
 0x402   :  { %v7840_v23 = vadd.f32 %v14918_v28, %v19095_v31 }
 0x403   :  { %v7839_v26 = vadd.f32 %v14919_v3, %v19095_v31  ;;  %v14375_v36 = vpop.f32.mrb[2].mxu0 }
 0x404   :  { %v7922_v21 = vmax.f32 %v7840_v23, 0.0  ;;  %v14920_v5 = vadd.f32 %v14375_v36, %v18181_v37  ;;  %v7351_v18 = vpop.f32.mrb[3].mxu0 }
 0x405   :  { %v7921_v20 = vmax.f32 %v7839_v26, 0.0  ;;  %v14921_v16 = vadd.f32 %v7351_v18, %v18183_v38 }
 0x406   :  { %8005 = vst.msk [vmem:[#allocation2 + $0x8] sm:$0xff] %vm8003_vm1, %v7922_v21  ;;  %v7842_v39 = vadd.f32 %v14920_v5, %v19095_v31 }
 0x407   :  { %8004 = vst.msk [vmem:[#allocation2] sm:$0xff] %vm8003_vm1, %v7921_v20  ;;  %v7841_v33 = vadd.f32 %v14921_v16, %v19095_v31  ;;  %v14378_v35 = vpop.f32.mrb[4].mxu0 }
 0x408   :  { %v7924_v12 = vmax.f32 %v7842_v39, 0.0  ;;  %v14922_v28 = vadd.f32 %v14378_v35, %v18189_v40  ;;  %v7361_v51 = vpop.f32.mrb[5].mxu0 }
 0x409   :  { %v7923_v3 = vmax.f32 %v7841_v33, 0.0  ;;  %v14923_v37 = vadd.f32 %v7361_v51, %v18191_v42 }
 0x40a   :  { %8007 = vst.msk [vmem:[#allocation2 + $0x18] sm:$0xff] %vm8003_vm1, %v7924_v12  ;;  %v7844_v38 = vadd.f32 %v14922_v28, %v19095_v31 }
 0x40b   :  { %8006 = vst.msk [vmem:[#allocation2 + $0x10] sm:$0xff] %vm8003_vm1, %v7923_v3  ;;  %v7843_v5 = vadd.f32 %v14923_v37, %v19095_v31  ;;  %v14381_v21 = vpop.f32.mrb[6].mxu0 }
 0x40c   :  { %v7926_v20 = vmax.f32 %v7844_v38, 0.0  ;;  %v14924_v16 = vadd.f32 %v14381_v21, %v18197_v44  ;;  %v7371_v36 = vpop.f32.mrb[7].mxu0 }
 0x40d   :  { %v7925_v39 = vmax.f32 %v7843_v5, 0.0  ;;  %v14925_v40 = vadd.f32 %v7371_v36, %v18199_v46 }
 0x40e   :  { %8009 = vst.msk [vmem:[#allocation2 + $0x28] sm:$0xff] %vm8003_vm1, %v7926_v20  ;;  %v7846_v42 = vadd.f32 %v14924_v16, %v19095_v31  ;;  %v8115_v28 = vld [vmem:[#allocation2] ss:$2 sm:$0xff]  ;;  %v8117_v51 = vld [vmem:[#allocation2 + $0x1] ss:$2 sm:$0xff] }
 0x40f   :  { %8008 = vst.msk [vmem:[#allocation2 + $0x20] sm:$0xff] %vm8003_vm1, %v7925_v39  ;;  %v7845_v23 = vadd.f32 %v14925_v40, %v19095_v31  ;;  %v14384_v26 = vpop.f32.mrb[8].mxu0 }
 0x410   :  { %v7928_v18 = vmax.f32 %v7846_v42, 0.0  ;;  %v14926_v33 = vadd.f32 %v14384_v26, %v18205_v48  ;;  %v7381_v35 = vpop.f32.mrb[9].mxu0  ;;  %v8118_v48 = vmax.f32 %v8115_v28, %v8117_v51 }
 0x411   :  { %v7927_v12 = vmax.f32 %v7845_v23, 0.0  ;;  %v14927_v44 = vadd.f32 %v7381_v35, %v18207_v50  ;;  %v8333_v23 = vld [vmem:[%s19680_s3 + $0x8] sm:$0xff] }
 0x412   :  { %8011 = vst.msk [vmem:[#allocation2 + $0x38] sm:$0xff] %vm8003_vm1, %v7928_v18  ;;  %v7848_v46 = vadd.f32 %v14926_v33, %v19095_v31 }
 0x413   :  { %8010 = vst.msk [vmem:[#allocation2 + $0x30] sm:$0xff] %vm8003_vm1, %v7927_v12  ;;  %v7847_v3 = vadd.f32 %v14927_v44, %v19095_v31  ;;  %v14387_v37 = vpop.f32.mrb[10].mxu0 }
 0x414   :  { %v7930_v38 = vmax.f32 %v7848_v46, 0.0  ;;  %v14928_v5 = vadd.f32 %v14387_v37, %v18213_v52  ;;  %v7391_v21 = vpop.f32.mrb[11].mxu0  ;;  %v8332_v52 = vld [vmem:[%s19680_s3] sm:$0xff] }
 0x415   :  { %v7929_v20 = vmax.f32 %v7847_v3, 0.0  ;;  %v14929_v16 = vadd.f32 %v7391_v21, %v18215_v54  ;;  %v14884_v35 = vpack.c.bf16 %v8333_v23, %v8332_v52 }
 0x416   :  { %v8120_v50 = vld [vmem:[#allocation2 + $0x12] ss:$2 sm:$0xff]  ;;  %8013 = vst.msk [vmem:[#allocation2 + $0x48] sm:$0xff] %vm8003_vm1, %v7930_v38  ;;  %v7850_v36 = vadd.f32 %v14928_v5, %v19095_v31  ;;  %v8123_v54 = vld [vmem:[#allocation2 + $0x13] ss:$2 sm:$0xff] }
 0x417   :  { %v8121_v39 = vmax.f32 %v8118_v48, %v8120_v50  ;;  %8012 = vst.msk [vmem:[#allocation2 + $0x40] sm:$0xff] %vm8003_vm1, %v7929_v20  ;;  %v7849_v40 = vadd.f32 %v14929_v16, %v19095_v31  ;;  %v14390_v42 = vpop.f32.mrb[12].mxu0  ;;  %14885 = vmatprep.subr.bf16.mxu1 %v14884_v35 }
 0x418   :  { %v7932_v26 = vmax.f32 %v7850_v36, 0.0  ;;  %v14930_v18 = vadd.f32 %v14390_v42, %v18221_v56  ;;  %v7401_v33 = vpop.f32.mrb[13].mxu0 }
 0x419   :  { %v8124_v12 = vmax.f32 %v8121_v39, %v8123_v54  ;;  %v7931_v44 = vmax.f32 %v7849_v40, 0.0  ;;  %v14931_v28 = vadd.f32 %v7401_v33, %v18223_v58 }
 0x41a   :  { %v8127_v51 = vld [vmem:[#allocation2 + $0x24] ss:$2 sm:$0xff]  ;;  %v8129_v46 = vld [vmem:[#allocation2 + $0x25] ss:$2 sm:$0xff]  ;;  %8015 = vst.msk [vmem:[#allocation2 + $0x58] sm:$0xff] %vm8003_vm1, %v7932_v26  ;;  %v7852_v3 = vadd.f32 %v14930_v18, %v19095_v31 }
 0x41b   :  { %8014 = vst.msk [vmem:[#allocation2 + $0x50] sm:$0xff] %vm8003_vm1, %v7931_v44  ;;  %v7851_v37 = vadd.f32 %v14931_v28, %v19095_v31  ;;  %v14393_v38 = vpop.f32.mrb[14].mxu0  ;;  %8125 = vst.msk [vmem:[#allocation3 + $0xb] sm:$0xff] %vm8003_vm1, %v8124_v12  ;;  %v8130_v48 = vmax.f32 %v8127_v51, %v8129_v46 }
 0x41c   :  { %v7934_v56 = vmax.f32 %v7852_v3, 0.0  ;;  %v14932_v5 = vadd.f32 %v14393_v38, %v18229_v60  ;;  %v7411_v21 = vpop.f32.mrb[15].mxu0 }
 0x41d   :  { %v7933_v58 = vmax.f32 %v7851_v37, 0.0  ;;  %v14933_v20 = vadd.f32 %v7411_v21, %v18231_v1 }
 0x41e   :  { %v8132_v16 = vld [vmem:[#allocation2 + $0x36] ss:$2 sm:$0xff]  ;;  %8017 = vst.msk [vmem:[#allocation2 + $0x68] sm:$0xff] %vm8003_vm1, %v7934_v56  ;;  %v7854_v50 = vadd.f32 %v14932_v5, %v19095_v31  ;;  %v8135_v42 = vld [vmem:[#allocation2 + $0x37] ss:$2 sm:$0xff] }
 0x41f   :  { %v8133_v36 = vmax.f32 %v8130_v48, %v8132_v16  ;;  %8016 = vst.msk [vmem:[#allocation2 + $0x60] sm:$0xff] %vm8003_vm1, %v7933_v58  ;;  %v7853_v39 = vadd.f32 %v14933_v20, %v19095_v31  ;;  %v14396_v40 = vpop.f32.mrb[16].mxu0 }
 0x420   :  { %v7936_v52 = vmax.f32 %v7854_v50, 0.0  ;;  %v14934_v60 = vadd.f32 %v14396_v40, %v18237_v11  ;;  %v7421_v23 = vpop.f32.mrb[17].mxu0 }
 0x421   :  { %v8136_v54 = vmax.f32 %v8133_v36, %v8135_v42  ;;  %v7935_v26 = vmax.f32 %v7853_v39, 0.0  ;;  %v14935_v1 = vadd.f32 %v7421_v23, %v18239_v14 }
 0x422   :  { %v8139_v18 = vld [vmem:[#allocation2 + $0x48] ss:$2 sm:$0xff]  ;;  %v8141_v33 = vld [vmem:[#allocation2 + $0x49] ss:$2 sm:$0xff]  ;;  %8019 = vst.msk [vmem:[#allocation2 + $0x78] sm:$0xff] %vm8003_vm1, %v7936_v52  ;;  %v7856_v12 = vadd.f32 %v14934_v60, %v19095_v31  ;;  %v8335_v44 = vld [vmem:[#allocation3 + $0x9] sm:$0xff] }
 0x423   :  { %8018 = vst.msk [vmem:[#allocation2 + $0x70] sm:$0xff] %vm8003_vm1, %v7935_v26  ;;  %v7855_v28 = vadd.f32 %v14935_v1, %v19095_v31  ;;  %v14399_v51 = vpop.f32.mrb[18].mxu0  ;;  %8137 = vst.msk [vmem:[#allocation3 + $0x15] sm:$0xff] %vm8003_vm1, %v8136_v54  ;;  %14498 = vmatmul.mubr.msk.f32.vlgmr.msra.gmra.mrb[82].mxu1 %vm8003_vm1, %v8335_v44  ;;  %v8142_v3 = vmax.f32 %v8139_v18, %v8141_v33 }
 0x424   :  { %v7938_v11 = vmax.f32 %v7856_v12, 0.0  ;;  %v14936_v46 = vadd.f32 %v14399_v51, %v18245_v27  ;;  %v7431_v14 = vpop.f32.mrb[19].mxu0  ;;  %14887 = vmatpush3.bf16.msra.mxu1 %v14884_v35 }
 0x425   :  { %v7937_v37 = vmax.f32 %v7855_v28, 0.0  ;;  %v14937_v38 = vadd.f32 %v7431_v14, %v18247_v30 }
 0x426   :  { %v8144_v56 = vld [vmem:[#allocation2 + $0x5a] ss:$2 sm:$0xff]  ;;  %8021 = vst.msk [vmem:[#allocation2 + $0x88] sm:$0xff] %vm8003_vm1, %v7938_v11  ;;  %v7858_v5 = vadd.f32 %v14936_v46, %v19095_v31  ;;  %v8147_v20 = vld [vmem:[#allocation2 + $0x5b] ss:$2 sm:$0xff] }
 0x427   :  { %v8145_v21 = vmax.f32 %v8142_v3, %v8144_v56  ;;  %8020 = vst.msk [vmem:[#allocation2 + $0x80] sm:$0xff] %vm8003_vm1, %v7937_v37  ;;  %v7857_v48 = vadd.f32 %v14937_v38, %v19095_v31  ;;  %v14402_v58 = vpop.f32.mrb[20].mxu0 }
 0x428   :  { %v7940_v16 = vmax.f32 %v7858_v5, 0.0  ;;  %v14938_v27 = vadd.f32 %v14402_v58, %v18253_v43  ;;  %v7441_v35 = vpop.f32.mrb[21].mxu0 }
 0x429   :  { %v8148_v50 = vmax.f32 %v8145_v21, %v8147_v20  ;;  %v7939_v36 = vmax.f32 %v7857_v48, 0.0  ;;  %v14939_v30 = vadd.f32 %v7441_v35, %v18255_v47 }
 0x42a   :  { %v8151_v39 = vld [vmem:[#allocation2 + $0x6c] ss:$2 sm:$0xff]  ;;  %v8153_v40 = vld [vmem:[#allocation2 + $0x6d] ss:$2 sm:$0xff]  ;;  %8023 = vst.msk [vmem:[#allocation2 + $0x98] sm:$0xff] %vm8003_vm1, %v7940_v16  ;;  %v7860_v42 = vadd.f32 %v14938_v27, %v19095_v31  ;;  %v8336_v52 = vld [vmem:[#allocation3 + $0x11] sm:$0xff] }
 0x42b   :  { %8149 = vst.msk [vmem:[#allocation3 + $0x1f] sm:$0xff] %vm8003_vm1, %v8148_v50  ;;  %8022 = vst.msk [vmem:[#allocation2 + $0x90] sm:$0xff] %vm8003_vm1, %v7939_v36  ;;  %v7859_v60 = vadd.f32 %v14939_v30, %v19095_v31  ;;  %v14405_v23 = vpop.f32.mrb[22].mxu0  ;;  %14500 = vmatprep.mubr.msk.f32.mxu1 %vm8003_vm1, %v8336_v52  ;;  %v8154_v26 = vmax.f32 %v8151_v39, %v8153_v40 }
 0x42c   :  { %v7942_v43 = vmax.f32 %v7860_v42, 0.0  ;;  %v14940_v54 = vadd.f32 %v14405_v23, %v18261_v59  ;;  %v7451_v47 = vpop.f32.mrb[23].mxu0 }
 0x42d   :  { %v7941_v1 = vmax.f32 %v7859_v60, 0.0  ;;  %v14941_v18 = vadd.f32 %v7451_v47, %v18263_v61 }
 0x42e   :  { %v8156_v33 = vld [vmem:[#allocation2 + $0x7e] ss:$2 sm:$0xff]  ;;  %8025 = vst.msk [vmem:[#allocation2 + $0xa8] sm:$0xff] %vm8003_vm1, %v7942_v43  ;;  %v7862_v12 = vadd.f32 %v14940_v54, %v19095_v31  ;;  %v8159_v11 = vld [vmem:[#allocation2 + $0x7f] ss:$2 sm:$0xff] }
 0x42f   :  { %v8157_v44 = vmax.f32 %v8154_v26, %v8156_v33  ;;  %8024 = vst.msk [vmem:[#allocation2 + $0xa0] sm:$0xff] %vm8003_vm1, %v7941_v1  ;;  %v7861_v28 = vadd.f32 %v14941_v18, %v19095_v31  ;;  %v14408_v51 = vpop.f32.mrb[24].mxu0 }
 0x430   :  { %v7944_v46 = vmax.f32 %v7862_v12, 0.0  ;;  %v14942_v59 = vadd.f32 %v14408_v51, %v18269_v24  ;;  %v7461_v14 = vpop.f32.mrb[25].mxu0 }
 0x431   :  { %v8160_v3 = vmax.f32 %v8157_v44, %v8159_v11  ;;  %v7943_v37 = vmax.f32 %v7861_v28, 0.0  ;;  %v14943_v61 = vadd.f32 %v7461_v14, %v18271_v32 }
 0x432   :  { %8027 = vst.msk [vmem:[#allocation2 + $0xb8] sm:$0xff] %vm8003_vm1, %v7944_v46  ;;  %v7864_v38 = vadd.f32 %v14942_v59, %v19095_v31  ;;  %v8337_v56 = vld [vmem:[#allocation3 + $0x19] sm:$0xff]  ;;  %v8338_v24 = vld [vmem:[#allocation3 + $0x21] sm:$0xff] }
 0x433   :  { %8161 = vst.msk [vmem:[#allocation3 + $0x29] sm:$0xff] %vm8003_vm1, %v8160_v3  ;;  %8026 = vst.msk [vmem:[#allocation2 + $0xb0] sm:$0xff] %vm8003_vm1, %v7943_v37  ;;  %v7863_v5 = vadd.f32 %v14943_v61, %v19095_v31  ;;  %v14411_v21 = vpop.f32.mrb[26].mxu0  ;;  %14501 = vmatmul.mubr.msk.f32.gmra.mrb[84].mxu1 %vm8003_vm1, %v8337_v56  ;;  %v8163_v27 = vld [vmem:[#allocation2 + $0x90] ss:$2 sm:$0xff] }
 0x434   :  { %v7946_v48 = vmax.f32 %v7864_v38, 0.0  ;;  %v14944_v58 = vadd.f32 %v14411_v21, %v18277_v57  ;;  %v7471_v20 = vpop.f32.mrb[27].mxu0  ;;  %14503 = vmatprep.mubr.msk.f32.mxu1 %vm8003_vm1, %v8338_v24  ;;  %v8165_v35 = vld [vmem:[#allocation2 + $0x91] ss:$2 sm:$0xff] }
 0x435   :  { %v7945_v32 = vmax.f32 %v7863_v5, 0.0  ;;  %v14945_v16 = vadd.f32 %v7471_v20, %v18279_v6  ;;  %v8166_v42 = vmax.f32 %v8163_v27, %v8165_v35 }
 0x436   :  { %8029 = vst.msk [vmem:[#allocation2 + $0xc8] sm:$0xff] %vm8003_vm1, %v7946_v48  ;;  %v7866_v50 = vadd.f32 %v14944_v58, %v19095_v31 }
 0x437   :  { %8028 = vst.msk [vmem:[#allocation2 + $0xc0] sm:$0xff] %vm8003_vm1, %v7945_v32  ;;  %v7865_v36 = vadd.f32 %v14945_v16, %v19095_v31  ;;  %v14414_v30 = vpop.f32.mrb[28].mxu0 }
 0x438   :  { %v7948_v39 = vmax.f32 %v7866_v50, 0.0  ;;  %v14946_v57 = vadd.f32 %v14414_v30, %v18285_v53  ;;  %v7481_v40 = vpop.f32.mrb[29].mxu0  ;;  %v8934_v53 = vld [vmem:[%s19680_s3 + $0x20] sm:$0xff] }
 0x439   :  { %v7947_v52 = vmax.f32 %v7865_v36, 0.0  ;;  %v14947_v60 = vadd.f32 %v7481_v40, %v18287_v63  ;;  %v8935_v63 = vld [vmem:[%s19680_s3 + $0x28] sm:$0xff] }
 0x43a   :  { %v8168_v6 = vld [vmem:[#allocation2 + $0xa2] ss:$2 sm:$0xff]  ;;  %8031 = vst.msk [vmem:[#allocation2 + $0xd8] sm:$0xff] %vm8003_vm1, %v7948_v39  ;;  %v7868_v23 = vadd.f32 %v14946_v57, %v19095_v31  ;;  %v8339_v43 = vld [vmem:[#allocation3 + $0x29] sm:$0xff]  ;;  %v8171_v1 = vld [vmem:[#allocation2 + $0xa3] ss:$2 sm:$0xff]  ;;  %v19207_v44 = vpack.c.bf16 %v8935_v63, %v8934_v53 }
 0x43b   :  { %v8169_v54 = vmax.f32 %v8166_v42, %v8168_v6  ;;  %8030 = vst.msk [vmem:[#allocation2 + $0xd0] sm:$0xff] %vm8003_vm1, %v7947_v52  ;;  %v7867_v47 = vadd.f32 %v14947_v60, %v19095_v31  ;;  %v14417_v26 = vpop.f32.mrb[30].mxu0  ;;  %14504 = vmatmul.mubr.msk.f32.gmra.mrb[86].mxu1 %vm8003_vm1, %v8339_v43 }
 0x43c   :  { %v7950_v18 = vmax.f32 %v7868_v23, 0.0  ;;  %v14948_v33 = vadd.f32 %v14417_v26, %v18293_v0  ;;  %v7491_v12 = vpop.f32.mrb[31].mxu0  ;;  %14889 = vmatprep.subr.bf16.mxu1 %v19207_v44 }
 0x43d   :  { %v8172_v28 = vmax.f32 %v8169_v54, %v8171_v1  ;;  %v7949_v51 = vmax.f32 %v7867_v47, 0.0  ;;  %v14949_v11 = vadd.f32 %v7491_v12, %v18295_v2 }
 0x43e   :  { %v8175_v46 = vld [vmem:[#allocation2 + $0xb4] ss:$2 sm:$0xff]  ;;  %v8177_v59 = vld [vmem:[#allocation2 + $0xb5] ss:$2 sm:$0xff]  ;;  %8033 = vst.msk [vmem:[#allocation2 + $0xe8] sm:$0xff] %vm8003_vm1, %v7950_v18  ;;  %v7870_v14 = vadd.f32 %v14948_v33, %v19095_v31 }
 0x43f   :  { %8173 = vst.msk [vmem:[#allocation3 + $0x33] sm:$0xff] %vm8003_vm1, %v8172_v28  ;;  %8032 = vst.msk [vmem:[#allocation2 + $0xe0] sm:$0xff] %vm8003_vm1, %v7949_v51  ;;  %v7869_v0 = vadd.f32 %v14949_v11, %v19095_v31  ;;  %v14420_v3 = vpop.f32.mrb[32].mxu0  ;;  %v8178_v2 = vmax.f32 %v8175_v46, %v8177_v59 }
 0x440   :  { %v7952_v37 = vmax.f32 %v7870_v14, 0.0  ;;  %v14950_v61 = vadd.f32 %v14420_v3, %v18301_v8  ;;  %v7501_v38 = vpop.f32.mrb[33].mxu0 }
 0x441   :  { %v7951_v56 = vmax.f32 %v7869_v0, 0.0  ;;  %v14951_v5 = vadd.f32 %v7501_v38, %v18303_v10 }
 0x442   :  { %v8180_v21 = vld [vmem:[#allocation2 + $0xc6] ss:$2 sm:$0xff]  ;;  %8035 = vst.msk [vmem:[#allocation2 + $0xf8] sm:$0xff] %vm8003_vm1, %v7952_v37  ;;  %v7872_v24 = vadd.f32 %v14950_v61, %v19095_v31  ;;  %v8183_v32 = vld [vmem:[#allocation2 + $0xc7] ss:$2 sm:$0xff] }
 0x443   :  { %v8181_v48 = vmax.f32 %v8178_v2, %v8180_v21  ;;  %8034 = vst.msk [vmem:[#allocation2 + $0xf0] sm:$0xff] %vm8003_vm1, %v7951_v56  ;;  %v7871_v58 = vadd.f32 %v14951_v5, %v19095_v31  ;;  %v14423_v20 = vpop.f32.mrb[34].mxu0 }
 0x444   :  { %v7954_v16 = vmax.f32 %v7872_v24, 0.0  ;;  %v14952_v8 = vadd.f32 %v14423_v20, %v18309_v17  ;;  %v7511_v27 = vpop.f32.mrb[35].mxu0 }
 0x445   :  { %v8184_v35 = vmax.f32 %v8181_v48, %v8183_v32  ;;  %v7953_v50 = vmax.f32 %v7871_v58, 0.0  ;;  %v14953_v10 = vadd.f32 %v7511_v27, %v18311_v19 }
 0x446   :  { %v8187_v36 = vld [vmem:[#allocation2 + $0xd8] ss:$2 sm:$0xff]  ;;  %v8189_v30 = vld [vmem:[#allocation2 + $0xd9] ss:$2 sm:$0xff]  ;;  %8037 = vst.msk [vmem:[#allocation2 + $0x108] sm:$0xff] %vm8003_vm1, %v7954_v16  ;;  %v7874_v39 = vadd.f32 %v14952_v8, %v19095_v31 }
 0x447   :  { %v8340_v57 = vld [vmem:[#allocation3 + $0x31] sm:$0xff]  ;;  %8185 = vst.msk [vmem:[#allocation3 + $0x3d] sm:$0xff] %vm8003_vm1, %v8184_v35  ;;  %8036 = vst.msk [vmem:[#allocation2 + $0x100] sm:$0xff] %vm8003_vm1, %v7953_v50  ;;  %v7873_v40 = vadd.f32 %v14953_v10, %v19095_v31  ;;  %v14426_v42 = vpop.f32.mrb[36].mxu0  ;;  %v8190_v60 = vmax.f32 %v8187_v36, %v8189_v30  ;;  %v8345_v10 = vld [vmem:[#allocation3 + $0x59] sm:$0xff] }
 0x448   :  { %14506 = vmatprep.mubr.msk.f32.mxu1 %vm8003_vm1, %v8340_v57  ;;  %v7956_v17 = vmax.f32 %v7874_v39, 0.0  ;;  %v7521_v52 = vpop.f32.mrb[37].mxu0  ;;  %v8346_v30 = vld [vmem:[#allocation3 + $0x61] sm:$0xff] }
 0x449   :  { %v7955_v19 = vmax.f32 %v7873_v40, 0.0  ;;  %v8347_v52 = vld [vmem:[#allocation3 + $0x69] sm:$0xff] }
 0x44a   :  { %v8192_v6 = vld [vmem:[#allocation2 + $0xea] ss:$2 sm:$0xff]  ;;  %8039 = vst.msk [vmem:[#allocation2 + $0x118] sm:$0xff] %vm8003_vm1, %v7956_v17  ;;  %v8195_v54 = vld [vmem:[#allocation2 + $0xeb] ss:$2 sm:$0xff] }
 0x44b   :  { %v8193_v23 = vmax.f32 %v8190_v60, %v8192_v6  ;;  %8038 = vst.msk [vmem:[#allocation2 + $0x110] sm:$0xff] %vm8003_vm1, %v7955_v19  ;;  %v14429_v43 = vpop.f32.mrb[38].mxu0 }
 0x44c   :  { %v7531_v47 = vpop.f32.mrb[39].mxu0 }
 0x44d   :  { %v8196_v26 = vmax.f32 %v8193_v23, %v8195_v54 }
 0x44e   :  { %v8199_v53 = vld [vmem:[#allocation2 + $0xfc] ss:$2 sm:$0xff]  ;;  %v8201_v63 = vld [vmem:[#allocation2 + $0xfd] ss:$2 sm:$0xff] }
 0x44f   :  { %v8341_v1 = vld [vmem:[#allocation3 + $0x39] sm:$0xff]  ;;  %8197 = vst.msk [vmem:[#allocation3 + $0x47] sm:$0xff] %vm8003_vm1, %v8196_v26  ;;  %v14432_v18 = vpop.f32.mrb[40].mxu0  ;;  %v8202_v28 = vmax.f32 %v8199_v53, %v8201_v63 }
 0x450   :  { %14507 = vmatmul.mubr.msk.f32.gmra.mrb[88].mxu1 %vm8003_vm1, %v8341_v1  ;;  %v14958_v33 = vadd.f32 %v14432_v18, %v18337_v22  ;;  %v7541_v12 = vpop.f32.mrb[41].mxu0 }
 0x452   :  { %v8204_v51 = vld [vmem:[#allocation2 + $0x10e] ss:$2 sm:$0xff]  ;;  %v7880_v11 = vadd.f32 %v14958_v33, %v19095_v31  ;;  %v8207_v14 = vld [vmem:[#allocation2 + $0x10f] ss:$2 sm:$0xff] }
 0x453   :  { %v8205_v46 = vmax.f32 %v8202_v28, %v8204_v51  ;;  %v14435_v59 = vpop.f32.mrb[42].mxu0 }
 0x454   :  { %v7962_v0 = vmax.f32 %v7880_v11, 0.0  ;;  %v14960_v3 = vadd.f32 %v14435_v59, %v18348_v55  ;;  %v7551_v37 = vpop.f32.mrb[43].mxu0 }
 0x455   :  { %v8208_v61 = vmax.f32 %v8205_v46, %v8207_v14  ;;  %v14961_v38 = vadd.f32 %v7551_v37, %v18350_v9 }
 0x456   :  { %8045 = vst.msk [vmem:[#allocation2 + $0x148] sm:$0xff] %vm8003_vm1, %v7962_v0  ;;  %v7882_v2 = vadd.f32 %v14960_v3, %v19095_v31  ;;  %v8342_v22 = vld [vmem:[#allocation3 + $0x41] sm:$0xff]  ;;  %v8343_v56 = vld [vmem:[#allocation3 + $0x49] sm:$0xff] }
 0x457   :  { %8209 = vst.msk [vmem:[#allocation3 + $0x51] sm:$0xff] %vm8003_vm1, %v8208_v61  ;;  %v7881_v5 = vadd.f32 %v14961_v38, %v19095_v31  ;;  %v14438_v21 = vpop.f32.mrb[44].mxu0  ;;  %14509 = vmatprep.mubr.msk.f32.mxu1 %vm8003_vm1, %v8342_v22 }
 0x458   :  { %v7964_v24 = vmax.f32 %v7882_v2, 0.0  ;;  %v14962_v55 = vadd.f32 %v14438_v21, %v18360_v41  ;;  %v7561_v48 = vpop.f32.mrb[45].mxu0  ;;  %14510 = vmatmul.mubr.msk.f32.gmra.mrb[90].mxu1 %vm8003_vm1, %v8343_v56 }
 0x459   :  { %v7963_v9 = vmax.f32 %v7881_v5, 0.0  ;;  %v14963_v58 = vadd.f32 %v7561_v48, %v18362_v49 }
 0x45a   :  { %8047 = vst.msk [vmem:[#allocation2 + $0x158] sm:$0xff] %vm8003_vm1, %v7964_v24  ;;  %v7884_v20 = vadd.f32 %v14962_v55, %v19095_v31 }
 0x45b   :  { %8046 = vst.msk [vmem:[#allocation2 + $0x150] sm:$0xff] %vm8003_vm1, %v7963_v9  ;;  %v7883_v32 = vadd.f32 %v14963_v58, %v19095_v31  ;;  %v14441_v16 = vpop.f32.mrb[46].mxu0 }
 0x45c   :  { %v7966_v8 = vmax.f32 %v7884_v20, 0.0  ;;  %v14964_v27 = vadd.f32 %v14441_v16, %v18372_v45  ;;  %v7571_v35 = vpop.f32.mrb[47].mxu0 }
 0x45d   :  { %v7965_v41 = vmax.f32 %v7883_v32, 0.0  ;;  %v14965_v50 = vadd.f32 %v7571_v35, %v18374_v62  ;;  %v19769_v32 = vld [vmem:[#allocation9_spill] sm:$0xff]  ;;  %v19770_v35 = vld [vmem:[#allocation10_spill] sm:$0xff] }
 0x45e   :  { %8049 = vst.msk [vmem:[#allocation2 + $0x168] sm:$0xff] %vm8003_vm1, %v7966_v8  ;;  %v7886_v49 = vadd.f32 %v14964_v27, %v19095_v31  ;;  %v8344_v36 = vld [vmem:[#allocation3 + $0x51] sm:$0xff] }
 0x45f   :  { %8048 = vst.msk [vmem:[#allocation2 + $0x160] sm:$0xff] %vm8003_vm1, %v7965_v41  ;;  %v7885_v39 = vadd.f32 %v14965_v50, %v19095_v31  ;;  %v14444_v57 = vpop.f32.mrb[48].mxu0  ;;  %14512 = vmatprep.mubr.msk.f32.mxu1 %vm8003_vm1, %v8344_v36 }
 0x460   :  { %v7968_v40 = vmax.f32 %v7886_v49, 0.0  ;;  %v14966_v45 = vadd.f32 %v14444_v57, %v18384_v13  ;;  %v7581_v42 = vpop.f32.mrb[49].mxu0  ;;  %14513 = vmatmul.mubr.msk.f32.gmra.mrb[92].mxu1 %vm8003_vm1, %v8345_v10 }
 0x461   :  { %v7967_v62 = vmax.f32 %v7885_v39, 0.0  ;;  %v14967_v17 = vadd.f32 %v7581_v42, %v18386_v15  ;;  %14515 = vmatprep.mubr.msk.f32.mxu1 %vm8003_vm1, %v8346_v30  ;;  %v19771_v39 = vld [vmem:[#allocation11_spill] sm:$0xff]  ;;  %v19772_v42 = vld [vmem:[#allocation12_spill] sm:$0xff] }
 0x462   :  { %v8211_v60 = vld [vmem:[#allocation2 + $0x148] ss:$2 sm:$0xff]  ;;  %v8213_v19 = vld [vmem:[#allocation2 + $0x149] ss:$2 sm:$0xff]  ;;  %8051 = vst.msk [vmem:[#allocation2 + $0x178] sm:$0xff] %vm8003_vm1, %v7968_v40  ;;  %v7888_v6 = vadd.f32 %v14966_v45, %v19095_v31 }
 0x463   :  { %8050 = vst.msk [vmem:[#allocation2 + $0x170] sm:$0xff] %vm8003_vm1, %v7967_v62  ;;  %v7887_v23 = vadd.f32 %v14967_v17, %v19095_v31  ;;  %v14447_v13 = vpop.f32.mrb[50].mxu0  ;;  %v8214_v15 = vmax.f32 %v8211_v60, %v8213_v19 }
 0x464   :  { %v7970_v43 = vmax.f32 %v7888_v6, 0.0  ;;  %v14968_v54 = vadd.f32 %v14447_v13, %v18396_v25  ;;  %v7591_v47 = vpop.f32.mrb[51].mxu0  ;;  %14516 = vmatmul.mubr.msk.f32.gmra.mrb[94].mxu1 %vm8003_vm1, %v8347_v52  ;;  %v19773_v13 = vld [vmem:[#allocation13_spill] sm:$0xff] }
 0x465   :  { %v7969_v26 = vmax.f32 %v7887_v23, 0.0  ;;  %v14969_v53 = vadd.f32 %v7591_v47, %v18398_v29 }
 0x466   :  { %v8216_v63 = vld [vmem:[#allocation2 + $0x15a] ss:$2 sm:$0xff]  ;;  %8053 = vst.msk [vmem:[#allocation2 + $0x188] sm:$0xff] %vm8003_vm1, %v7970_v43  ;;  %v7890_v1 = vadd.f32 %v14968_v54, %v19095_v31  ;;  %v8219_v28 = vld [vmem:[#allocation2 + $0x15b] ss:$2 sm:$0xff] }
 0x467   :  { %v8217_v18 = vmax.f32 %v8214_v15, %v8216_v63  ;;  %8052 = vst.msk [vmem:[#allocation2 + $0x180] sm:$0xff] %vm8003_vm1, %v7969_v26  ;;  %v7889_v33 = vadd.f32 %v14969_v53, %v19095_v31  ;;  %v14450_v12 = vpop.f32.mrb[52].mxu0  ;;  %v19774_v26 = vld [vmem:[#allocation14_spill] sm:$0xff] }
 0x468   :  { %v7972_v25 = vmax.f32 %v7890_v1, 0.0  ;;  %v14970_v51 = vadd.f32 %v14450_v12, %v18408_v4  ;;  %v7601_v11 = vpop.f32.mrb[53].mxu0 }
 0x469   :  { %v8220_v46 = vmax.f32 %v8217_v18, %v8219_v28  ;;  %v7971_v59 = vmax.f32 %v7889_v33, 0.0  ;;  %v14971_v29 = vadd.f32 %v7601_v11, %v18410_v7  ;;  %v19768_v7 = vld [vmem:[#allocation8_spill] sm:$0xff]  ;;  %v19775_v11 = vld [vmem:[#allocation15_spill] sm:$0xff] }
 0x46a   :  { %v8223_v14 = vld [vmem:[#allocation2 + $0x16c] ss:$2 sm:$0xff]  ;;  %v8225_v0 = vld [vmem:[#allocation2 + $0x16d] ss:$2 sm:$0xff]  ;;  %8055 = vst.msk [vmem:[#allocation2 + $0x198] sm:$0xff] %vm8003_vm1, %v7972_v25  ;;  %v7892_v3 = vadd.f32 %v14970_v51, %v19095_v31 }
 0x46b   :  { %8221 = vst.msk [vmem:[#allocation3 + $0x73] sm:$0xff] %vm8003_vm1, %v8220_v46  ;;  %8054 = vst.msk [vmem:[#allocation2 + $0x190] sm:$0xff] %vm8003_vm1, %v7971_v59  ;;  %v7891_v37 = vadd.f32 %v14971_v29, %v19095_v31  ;;  %v14453_v61 = vpop.f32.mrb[54].mxu0  ;;  %v8226_v22 = vmax.f32 %v8223_v14, %v8225_v0  ;;  %v19776_v0 = vld [vmem:[#allocation16_spill] sm:$0xff] }
 0x46c   :  { %v7974_v38 = vmax.f32 %v7892_v3, 0.0  ;;  %v14972_v4 = vadd.f32 %v14453_v61, %v18420_v34  ;;  %v7611_v2 = vpop.f32.mrb[55].mxu0 }
 0x46d   :  { %v7973_v56 = vmax.f32 %v7891_v37, 0.0  ;;  %v14973_v5 = vadd.f32 %v7611_v2, %v19768_v7 }
 0x46e   :  { %v8228_v21 = vld [vmem:[#allocation2 + $0x17e] ss:$2 sm:$0xff]  ;;  %8057 = vst.msk [vmem:[#allocation2 + $0x1a8] sm:$0xff] %vm8003_vm1, %v7974_v38  ;;  %v7894_v24 = vadd.f32 %v14972_v4, %v19095_v31  ;;  %v8231_v58 = vld [vmem:[#allocation2 + $0x17f] ss:$2 sm:$0xff] }
 0x46f   :  { %v8229_v55 = vmax.f32 %v8226_v22, %v8228_v21  ;;  %8056 = vst.msk [vmem:[#allocation2 + $0x1a0] sm:$0xff] %vm8003_vm1, %v7973_v56  ;;  %v7893_v48 = vadd.f32 %v14973_v5, %v19095_v31  ;;  %v14456_v9 = vpop.f32.mrb[56].mxu0  ;;  %v19777_v56 = vld [vmem:[#allocation17_spill] sm:$0xff] }
 0x470   :  { %v7976_v20 = vmax.f32 %v7894_v24, 0.0  ;;  %v14974_v34 = vadd.f32 %v14456_v9, %v19769_v32  ;;  %v7621_v16 = vpop.f32.mrb[57].mxu0 }
 0x471   :  { %v8232_v8 = vmax.f32 %v8229_v55, %v8231_v58  ;;  %v7975_v27 = vmax.f32 %v7893_v48, 0.0  ;;  %v14975_v41 = vadd.f32 %v7621_v16, %v19770_v35  ;;  %v19778_v55 = vld [vmem:[#allocation18_spill] sm:$0xff] }
 0x472   :  { %8059 = vst.msk [vmem:[#allocation2 + $0x1b8] sm:$0xff] %vm8003_vm1, %v7976_v20  ;;  %v7896_v50 = vadd.f32 %v14974_v34, %v19095_v31  ;;  %v8348_v10 = vld [vmem:[#allocation3 + $0x71] sm:$0xff]  ;;  %v8235_v17 = vld [vmem:[#allocation2 + $0x190] ss:$2 sm:$0xff]  ;;  %v8237_v52 = vld [vmem:[#allocation2 + $0x191] ss:$2 sm:$0xff] }
 0x473   :  { %8233 = vst.msk [vmem:[#allocation3 + $0x7d] sm:$0xff] %vm8003_vm1, %v8232_v8  ;;  %8058 = vst.msk [vmem:[#allocation2 + $0x1b0] sm:$0xff] %vm8003_vm1, %v7975_v27  ;;  %v7895_v49 = vadd.f32 %v14975_v41, %v19095_v31  ;;  %v14459_v36 = vpop.f32.mrb[58].mxu0  ;;  %14518 = vmatprep.mubr.msk.f32.mxu1 %vm8003_vm1, %v8348_v10  ;;  %v8238_v47 = vmax.f32 %v8235_v17, %v8237_v52  ;;  %v19779_v27 = vld [vmem:[#allocation19_spill] sm:$0xff]  ;;  %v19781_v52 = vld [vmem:[#allocation21_spill] sm:$0xff] }
 0x474   :  { %v7978_v30 = vmax.f32 %v7896_v50, 0.0  ;;  %v14976_v57 = vadd.f32 %v14459_v36, %v19771_v39  ;;  %v7631_v40 = vpop.f32.mrb[59].mxu0 }
 0x475   :  { %v7977_v45 = vmax.f32 %v7895_v49, 0.0  ;;  %v14977_v62 = vadd.f32 %v7631_v40, %v19772_v42  ;;  %v19780_v49 = vld [vmem:[#allocation20_spill] sm:$0xff] }
 0x476   :  { %8061 = vst.msk [vmem:[#allocation2 + $0x1c8] sm:$0xff] %vm8003_vm1, %v7978_v30  ;;  %v7898_v60 = vadd.f32 %v14976_v57, %v19095_v31 }
 0x477   :  { %8060 = vst.msk [vmem:[#allocation2 + $0x1c0] sm:$0xff] %vm8003_vm1, %v7977_v45  ;;  %v7897_v19 = vadd.f32 %v14977_v62, %v19095_v31  ;;  %v14462_v6 = vpop.f32.mrb[60].mxu0 }
 0x478   :  { %v7980_v23 = vmax.f32 %v7898_v60, 0.0  ;;  %v14978_v43 = vadd.f32 %v14462_v6, %v19773_v13  ;;  %v7641_v54 = vpop.f32.mrb[61].mxu0  ;;  %v19782_v13 = vld [vmem:[#allocation22_spill] sm:$0xff] }
 0x479   :  { %v7979_v15 = vmax.f32 %v7897_v19, 0.0  ;;  %v14979_v53 = vadd.f32 %v7641_v54, %v19774_v26 }
 0x47a   :  { %v8240_v63 = vld [vmem:[#allocation2 + $0x1a2] ss:$2 sm:$0xff]  ;;  %8063 = vst.msk [vmem:[#allocation2 + $0x1d8] sm:$0xff] %vm8003_vm1, %v7980_v23  ;;  %v7900_v1 = vadd.f32 %v14978_v43, %v19095_v31  ;;  %v8243_v25 = vld [vmem:[#allocation2 + $0x1a3] ss:$2 sm:$0xff] }
 0x47b   :  { %v8349_v18 = vld [vmem:[#allocation3 + $0x79] sm:$0xff]  ;;  %v8241_v33 = vmax.f32 %v8238_v47, %v8240_v63  ;;  %8062 = vst.msk [vmem:[#allocation2 + $0x1d0] sm:$0xff] %vm8003_vm1, %v7979_v15  ;;  %v7899_v12 = vadd.f32 %v14979_v53, %v19095_v31  ;;  %v14465_v28 = vpop.f32.mrb[62].mxu0 }
 0x47c   :  { %14519 = vmatmul.mubr.msk.f32.gmra.mrb[96].mxu1 %vm8003_vm1, %v8349_v18  ;;  %v7982_v51 = vmax.f32 %v7900_v1, 0.0  ;;  %v14980_v46 = vadd.f32 %v14465_v28, %v19775_v11  ;;  %v7651_v59 = vpop.f32.mrb[63].mxu0  ;;  %v19783_v18 = vld [vmem:[#allocation23_spill] sm:$0xff] }
 0x47d   :  { %v8244_v29 = vmax.f32 %v8241_v33, %v8243_v25  ;;  %v7981_v14 = vmax.f32 %v7899_v12, 0.0  ;;  %v14981_v3 = vadd.f32 %v7651_v59, %v19776_v0 }
 0x47e   :  { %v8247_v37 = vld [vmem:[#allocation2 + $0x1b4] ss:$2 sm:$0xff]  ;;  %v8249_v61 = vld [vmem:[#allocation2 + $0x1b5] ss:$2 sm:$0xff]  ;;  %8065 = vst.msk [vmem:[#allocation2 + $0x1e8] sm:$0xff] %vm8003_vm1, %v7982_v51  ;;  %v7902_v38 = vadd.f32 %v14980_v46, %v19095_v31  ;;  %v19784_v51 = vld [vmem:[#allocation24_spill] sm:$0xff] }
 0x47f   :  { %8245 = vst.msk [vmem:[#allocation3 + $0x87] sm:$0xff] %vm8003_vm1, %v8244_v29  ;;  %8064 = vst.msk [vmem:[#allocation2 + $0x1e0] sm:$0xff] %vm8003_vm1, %v7981_v14  ;;  %v7901_v4 = vadd.f32 %v14981_v3, %v19095_v31  ;;  %v14468_v2 = vpop.f32.mrb[64].mxu0  ;;  %v8250_v21 = vmax.f32 %v8247_v37, %v8249_v61  ;;  %v19785_v61 = vld [vmem:[#allocation25_spill] sm:$0xff] }
 0x480   :  { %v7984_v22 = vmax.f32 %v7902_v38, 0.0  ;;  %v14982_v7 = vadd.f32 %v14468_v2, %v19777_v56  ;;  %v7661_v5 = vpop.f32.mrb[65].mxu0  ;;  %v19786_v56 = vld [vmem:[#allocation26_spill] sm:$0xff] }
 0x481   :  { %v7983_v24 = vmax.f32 %v7901_v4, 0.0  ;;  %v14983_v48 = vadd.f32 %v7661_v5, %v19778_v55 }
 0x482   :  { %v8252_v9 = vld [vmem:[#allocation2 + $0x1c6] ss:$2 sm:$0xff]  ;;  %8067 = vst.msk [vmem:[#allocation2 + $0x1f8] sm:$0xff] %vm8003_vm1, %v7984_v22  ;;  %v7904_v58 = vadd.f32 %v14982_v7, %v19095_v31  ;;  %v8255_v16 = vld [vmem:[#allocation2 + $0x1c7] ss:$2 sm:$0xff] }
 0x483   :  { %v8253_v20 = vmax.f32 %v8250_v21, %v8252_v9  ;;  %8066 = vst.msk [vmem:[#allocation2 + $0x1f0] sm:$0xff] %vm8003_vm1, %v7983_v24  ;;  %v7903_v32 = vadd.f32 %v14983_v48, %v19095_v31  ;;  %v14471_v34 = vpop.f32.mrb[66].mxu0  ;;  %v15787_v21 = vld [vmem:[%s19679_s2] ss:$0 sm:$0xff] }
 0x484   :  { %v7986_v8 = vmax.f32 %v7904_v58, 0.0  ;;  %v14984_v35 = vadd.f32 %v14471_v34, %v19779_v27  ;;  %v7671_v41 = vpop.f32.mrb[67].mxu0  ;;  %v19788_v27 = vld [vmem:[#allocation28_spill] sm:$0xff] }
 0x485   :  { %v8256_v50 = vmax.f32 %v8253_v20, %v8255_v16  ;;  %v7985_v10 = vmax.f32 %v7903_v32, 0.0  ;;  %v14985_v36 = vadd.f32 %v7671_v41, %v19780_v49  ;;  %v19787_v20 = vld [vmem:[#allocation27_spill] sm:$0xff] }
 0x486   :  { %v8259_v30 = vld [vmem:[#allocation2 + $0x1d8] ss:$2 sm:$0xff]  ;;  %v8261_v39 = vld [vmem:[#allocation2 + $0x1d9] ss:$2 sm:$0xff]  ;;  %8069 = vst.msk [vmem:[#allocation2 + $0x208] sm:$0xff] %vm8003_vm1, %v7986_v8  ;;  %v7906_v57 = vadd.f32 %v14984_v35, %v19095_v31 }
 0x487   :  { %v8350_v40 = vld [vmem:[#allocation3 + $0x81] sm:$0xff]  ;;  %8257 = vst.msk [vmem:[#allocation3 + $0x91] sm:$0xff] %vm8003_vm1, %v8256_v50  ;;  %8068 = vst.msk [vmem:[#allocation2 + $0x200] sm:$0xff] %vm8003_vm1, %v7985_v10  ;;  %v7905_v45 = vadd.f32 %v14985_v36, %v19095_v31  ;;  %v14474_v42 = vpop.f32.mrb[68].mxu0  ;;  %v8351_v62 = vld [vmem:[#allocation3 + $0x89] sm:$0xff]  ;;  %v8262_v6 = vmax.f32 %v8259_v30, %v8261_v39 }
 0x488   :  { %14521 = vmatprep.mubr.msk.f32.mxu1 %vm8003_vm1, %v8350_v40  ;;  %v7988_v17 = vmax.f32 %v7906_v57, 0.0  ;;  %v14986_v60 = vadd.f32 %v14474_v42, %v19781_v52  ;;  %v7681_v19 = vpop.f32.mrb[69].mxu0  ;;  %v19789_v57 = vld [vmem:[#allocation29_spill] sm:$0xff] }
 0x489   :  { %14522 = vmatmul.mubr.msk.f32.gmra.mrb[98].mxu1 %vm8003_vm1, %v8351_v62  ;;  %v7987_v23 = vmax.f32 %v7905_v45, 0.0  ;;  %v14987_v43 = vadd.f32 %v7681_v19, %v19782_v13 }
 0x48a   :  { %v8264_v54 = vld [vmem:[#allocation2 + $0x1ea] ss:$2 sm:$0xff]  ;;  %8071 = vst.msk [vmem:[#allocation2 + $0x218] sm:$0xff] %vm8003_vm1, %v7988_v17  ;;  %v7908_v47 = vadd.f32 %v14986_v60, %v19095_v31  ;;  %v8267_v63 = vld [vmem:[#allocation2 + $0x1eb] ss:$2 sm:$0xff] }
 0x48b   :  { %v8265_v15 = vmax.f32 %v8262_v6, %v8264_v54  ;;  %8070 = vst.msk [vmem:[#allocation2 + $0x210] sm:$0xff] %vm8003_vm1, %v7987_v23  ;;  %v7907_v26 = vadd.f32 %v14987_v43, %v19095_v31  ;;  %v14477_v53 = vpop.f32.mrb[70].mxu0 }
 0x48c   :  { %v7990_v1 = vmax.f32 %v7908_v47, 0.0  ;;  %v14988_v33 = vadd.f32 %v14477_v53, %v19783_v18  ;;  %v7691_v12 = vpop.f32.mrb[71].mxu0 }
 0x48d   :  { %v8268_v28 = vmax.f32 %v8265_v15, %v8267_v63  ;;  %v7989_v25 = vmax.f32 %v7907_v26, 0.0  ;;  %v14989_v11 = vadd.f32 %v7691_v12, %v19784_v51  ;;  %v8358_v51 = vld [vmem:[#allocation3 + $0xc1] sm:$0xff] }
 0x48e   :  { %v8271_v46 = vld [vmem:[#allocation2 + $0x1fc] ss:$2 sm:$0xff]  ;;  %v8273_v59 = vld [vmem:[#allocation2 + $0x1fd] ss:$2 sm:$0xff]  ;;  %8073 = vst.msk [vmem:[#allocation2 + $0x228] sm:$0xff] %vm8003_vm1, %v7990_v1  ;;  %v7910_v29 = vadd.f32 %v14988_v33, %v19095_v31 }
 0x48f   :  { %v8352_v14 = vld [vmem:[#allocation3 + $0x91] sm:$0xff]  ;;  %8269 = vst.msk [vmem:[#allocation3 + $0x9b] sm:$0xff] %vm8003_vm1, %v8268_v28  ;;  %8072 = vst.msk [vmem:[#allocation2 + $0x220] sm:$0xff] %vm8003_vm1, %v7989_v25  ;;  %v7909_v0 = vadd.f32 %v14989_v11, %v19095_v31  ;;  %v14480_v3 = vpop.f32.mrb[72].mxu0  ;;  %v8274_v2 = vmax.f32 %v8271_v46, %v8273_v59  ;;  %v8359_v46 = vld [vmem:[#allocation3 + $0xc9] sm:$0xff] }
 0x490   :  { %14524 = vmatprep.mubr.msk.f32.mxu1 %vm8003_vm1, %v8352_v14  ;;  %v7992_v37 = vmax.f32 %v7910_v29, 0.0  ;;  %v14990_v38 = vadd.f32 %v14480_v3, %v19785_v61  ;;  %v7701_v4 = vpop.f32.mrb[73].mxu0  ;;  %v8306_v59 = vld [vmem:[#allocation3] sm:$0xff]  ;;  %v9262_v14 = vld [vmem:[%s19680_s3 + $0x38] sm:$0xff]  ;;  %v8309_v61 = vld [vmem:[#allocation3 + $0x18] sm:$0xff] }
 0x491   :  { %v7991_v22 = vmax.f32 %v7909_v0, 0.0  ;;  %v14991_v7 = vadd.f32 %v7701_v4, %v19786_v56  ;;  %v9261_v29 = vld [vmem:[%s19680_s3 + $0x30] sm:$0xff]  ;;  %v8307_v3 = vld [vmem:[#allocation3 + $0x8] sm:$0xff] }
 0x492   :  { %v8276_v5 = vld [vmem:[#allocation2 + $0x20e] ss:$2 sm:$0xff]  ;;  %8075 = vst.msk [vmem:[#allocation2 + $0x238] sm:$0xff] %vm8003_vm1, %v7992_v37  ;;  %v7912_v24 = vadd.f32 %v15787_v21, %v14990_v38  ;;  %v8279_v9 = vld [vmem:[#allocation2 + $0x20f] ss:$2 sm:$0xff]  ;;  %v14892_v0 = vpack.c.bf16 %v9262_v14, %v9261_v29  ;;  %v8308_v37 = vld [vmem:[#allocation3 + $0x10] sm:$0xff] }
 0x493   :  { %v8277_v31 = vmax.f32 %v8274_v2, %v8276_v5  ;;  %8074 = vst.msk [vmem:[#allocation2 + $0x230] sm:$0xff] %vm8003_vm1, %v7991_v22  ;;  %v7911_v55 = vadd.f32 %v15787_v21, %v14991_v7  ;;  %v14483_v48 = vpop.f32.mrb[74].mxu0  ;;  %v8310_v38 = vld [vmem:[#allocation3 + $0x20] sm:$0xff]  ;;  %v8311_v4 = vld [vmem:[#allocation3 + $0x28] sm:$0xff]  ;;  %v8312_v2 = vld [vmem:[#allocation3 + $0x30] sm:$0xff] }
 0x494   :  { %v7994_v58 = vmax.f32 %v7912_v24, 0.0  ;;  %v14992_v32 = vadd.f32 %v14483_v48, %v19787_v20  ;;  %v7711_v34 = vpop.f32.mrb[75].mxu0  ;;  %v8313_v22 = vld [vmem:[#allocation3 + $0x38] sm:$0xff]  ;;  %v8314_v56 = vld [vmem:[#allocation3 + $0x40] sm:$0xff]  ;;  %v8316_v7 = vld [vmem:[#allocation3 + $0x50] sm:$0xff] }
 0x495   :  { %v8280_v16 = vmax.f32 %v8277_v31, %v8279_v9  ;;  %v7993_v8 = vmax.f32 %v7911_v55, 0.0  ;;  %v14993_v35 = vadd.f32 %v7711_v34, %v19788_v27  ;;  %v8318_v5 = vld [vmem:[#allocation3 + $0x60] sm:$0xff]  ;;  %v8319_v24 = vld [vmem:[#allocation3 + $0x68] sm:$0xff]  ;;  %v8320_v31 = vld [vmem:[#allocation3 + $0x70] sm:$0xff] }
 0x496   :  { %8077 = vst.msk [vmem:[#allocation2 + $0x248] sm:$0xff] %vm8003_vm1, %v7994_v58  ;;  %v7914_v41 = vadd.f32 %v15787_v21, %v14992_v32  ;;  %v8353_v50 = vld [vmem:[#allocation3 + $0x99] sm:$0xff]  ;;  %v8323_v9 = vld [vmem:[#allocation3 + $0x88] sm:$0xff]  ;;  %v8324_v58 = vld [vmem:[#allocation3 + $0x90] sm:$0xff] }
 0x497   :  { %8281 = vst.msk [vmem:[#allocation3 + $0xa5] sm:$0xff] %vm8003_vm1, %v8280_v16  ;;  %8076 = vst.msk [vmem:[#allocation2 + $0x240] sm:$0xff] %vm8003_vm1, %v7993_v8  ;;  %v7913_v10 = vadd.f32 %v15787_v21, %v14993_v35  ;;  %v14486_v49 = vpop.f32.mrb[76].mxu0  ;;  %14525 = vmatmul.mubr.msk.f32.gmra.mrb[100].mxu1 %vm8003_vm1, %v8353_v50  ;;  %v8283_v45 = vld [vmem:[#allocation2 + $0x220] ss:$2 sm:$0xff]  ;;  %v8322_v48 = vld [vmem:[#allocation3 + $0x80] sm:$0xff] }
 0x498   :  { %v7996_v36 = vmax.f32 %v7914_v41, 0.0  ;;  %v7721_v30 = vpop.f32.mrb[77].mxu0  ;;  %v8285_v42 = vld [vmem:[#allocation2 + $0x221] ss:$2 sm:$0xff]  ;;  %v8331_v35 = vld [vmem:[#allocation3 + $0xc8] sm:$0xff] }
 0x499   :  { %v7995_v39 = vmax.f32 %v7913_v10, 0.0  ;;  %v14995_v40 = vadd.f32 %v7721_v30, %v19789_v57  ;;  %v8286_v60 = vmax.f32 %v8283_v45, %v8285_v42  ;;  %v8321_v55 = vld [vmem:[#allocation3 + $0x78] sm:$0xff]  ;;  %v8908_v41 = vld [vmem:[#allocation3 + $0x2] sm:$0xff]  ;;  %v9588_v50 = vld [vmem:[%s19680_s3 + $0x40] sm:$0xff] }
 0x49a   :  { %8079 = vst.msk [vmem:[#allocation2 + $0x258] sm:$0xff] %vm8003_vm1, %v7996_v36  ;;  %v8325_v20 = vld [vmem:[#allocation3 + $0x98] sm:$0xff]  ;;  %v8909_v36 = vld [vmem:[#allocation3 + $0xa] sm:$0xff]  ;;  %v8912_v57 = vld [vmem:[#allocation3 + $0x22] sm:$0xff] }
 0x49b   :  { %8078 = vst.msk [vmem:[#allocation2 + $0x250] sm:$0xff] %vm8003_vm1, %v7995_v39  ;;  %v7915_v62 = vadd.f32 %v15787_v21, %v14995_v40  ;;  %v14489_v17 = vpop.f32.mrb[78].mxu0  ;;  %v8317_v21 = vld [vmem:[#allocation3 + $0x58] sm:$0xff]  ;;  %v8913_v40 = vld [vmem:[#allocation3 + $0x2a] sm:$0xff] }
 0x49c   :  { %v7731_v52 = vpop.f32.mrb[79].mxu0  ;;  %v9589_v10 = vld [vmem:[%s19680_s3 + $0x48] sm:$0xff]  ;;  %v8917_v17 = vld [vmem:[#allocation3 + $0x4a] sm:$0xff] }
 0x49d   :  { %v7997_v19 = vmax.f32 %v7915_v62, 0.0  ;;  %v14896_v49 = vpack.c.bf16 %v9589_v10, %v9588_v50  ;;  %v8910_v30 = vld [vmem:[#allocation3 + $0x12] sm:$0xff]  ;;  %v8911_v39 = vld [vmem:[#allocation3 + $0x1a] sm:$0xff]  ;;  %v8916_v62 = vld [vmem:[#allocation3 + $0x42] sm:$0xff] }
 0x49e   :  { %v8288_v6 = vld [vmem:[#allocation2 + $0x232] ss:$2 sm:$0xff]  ;;  %v8291_v54 = vld [vmem:[#allocation2 + $0x233] ss:$2 sm:$0xff]  ;;  %v8914_v45 = vld [vmem:[#allocation3 + $0x32] sm:$0xff] }
 0x49f   :  { %v8354_v23 = vld [vmem:[#allocation3 + $0xa1] sm:$0xff]  ;;  %v8289_v13 = vmax.f32 %v8286_v60, %v8288_v6  ;;  %8080 = vst.msk [vmem:[#allocation2 + $0x260] sm:$0xff] %vm8003_vm1, %v7997_v19  ;;  %v14492_v43 = vpop.f32.mrb[80].mxu0  ;;  %v8918_v52 = vld [vmem:[#allocation3 + $0x52] sm:$0xff]  ;;  %v8921_v6 = vld [vmem:[#allocation3 + $0x6a] sm:$0xff] }
 0x4a0   :  { %14527 = vmatprep.mubr.msk.f32.mxu1 %vm8003_vm1, %v8354_v23  ;;  %v7741_v47 = vpop.f32.mrb[81].mxu0  ;;  %v8326_v32 = vld [vmem:[#allocation3 + $0xa0] sm:$0xff]  ;;  %v8922_v23 = vld [vmem:[#allocation3 + $0x72] sm:$0xff] }
 0x4a1   :  { %v8292_v15 = vmax.f32 %v8289_v13, %v8291_v54  ;;  %v8915_v42 = vld [vmem:[#allocation3 + $0x3a] sm:$0xff]  ;;  %v8920_v19 = vld [vmem:[#allocation3 + $0x62] sm:$0xff]  ;;  %v8925_v54 = vld [vmem:[#allocation3 + $0x8a] sm:$0xff] }
 0x4a2   :  { %v8295_v26 = vld [vmem:[#allocation2 + $0x244] ss:$2 sm:$0xff]  ;;  %v8297_v53 = vld [vmem:[#allocation2 + $0x245] ss:$2 sm:$0xff] }
 0x4a3   :  { %8293 = vst.msk [vmem:[#allocation3 + $0xaf] sm:$0xff] %vm8003_vm1, %v8292_v15  ;;  %v8298_v63 = vmax.f32 %v8295_v26, %v8297_v53  ;;  %v8919_v60 = vld [vmem:[#allocation3 + $0x5a] sm:$0xff]  ;;  %v8924_v43 = vld [vmem:[#allocation3 + $0x82] sm:$0xff]  ;;  %v8926_v47 = vld [vmem:[#allocation3 + $0x92] sm:$0xff] }
 0x4a4   :  { %v8923_v13 = vld [vmem:[#allocation3 + $0x7a] sm:$0xff]  ;;  %v8928_v26 = vld [vmem:[#allocation3 + $0xa2] sm:$0xff] }
 0x4a5   :  { %v8927_v15 = vld [vmem:[#allocation3 + $0x9a] sm:$0xff] }
 0x4a6   :  { %v8300_v1 = vld [vmem:[#allocation2 + $0x256] ss:$2 sm:$0xff]  ;;  %v8303_v33 = vld [vmem:[#allocation2 + $0x257] ss:$2 sm:$0xff] }
 0x4a7   :  { %v8301_v18 = vmax.f32 %v8298_v63, %v8300_v1  ;;  %v8932_v1 = vld [vmem:[#allocation3 + $0xc2] sm:$0xff]  ;;  %v9563_v14 = vld [vmem:[#allocation3 + $0x13] sm:$0xff] }
 0x4a8   :  { %v9890_v10 = vld [vmem:[#allocation3 + $0x14] sm:$0xff] }
 0x4a9   :  { %v8304_v12 = vmax.f32 %v8301_v18, %v8303_v33  ;;  %v8933_v33 = vld [vmem:[#allocation3 + $0xca] sm:$0xff] }
 0x4aa   :  { %v8355_v28 = vld [vmem:[#allocation3 + $0xa9] sm:$0xff]  ;;  %v8356_v25 = vld [vmem:[#allocation3 + $0xb1] sm:$0xff] }
 0x4ab   :  { %8305 = vst.msk [vmem:[#allocation3 + $0xb9] sm:$0xff] %vm8003_vm1, %v8304_v12  ;;  %14528 = vmatmul.mubr.msk.f32.gmra.mrb[102].mxu1 %vm8003_vm1, %v8355_v28  ;;  %v8327_v34 = vld [vmem:[#allocation3 + $0xa8] sm:$0xff]  ;;  %v8328_v16 = vld [vmem:[#allocation3 + $0xb0] sm:$0xff]  ;;  %v9915_v12 = vld [vmem:[%s19680_s3 + $0x50] sm:$0xff] }
 0x4ac   :  { %14530 = vmatprep.mubr.msk.f32.mxu1 %vm8003_vm1, %v8356_v25  ;;  %v8929_v53 = vld [vmem:[#allocation3 + $0xaa] sm:$0xff] }
 0x4ad   :  { %v9916_v28 = vld [vmem:[%s19680_s3 + $0x58] sm:$0xff] }
 0x4ae   :  { %v14900_v25 = vpack.c.bf16 %v9916_v28, %v9915_v12  ;;  %v10241_v28 = vld [vmem:[#allocation3 + $0xdc] sm:$0xff] }
 0x4b2   :  { %v8357_v11 = vld [vmem:[#allocation3 + $0xb9] sm:$0xff] }
 0x4b3   :  { %14531 = vmatmul.mubr.msk.f32.gmra.mrb[104].mxu1 %vm8003_vm1, %v8357_v11  ;;  %v8329_v8 = vld [vmem:[#allocation3 + $0xb8] sm:$0xff]  ;;  %v8330_v27 = vld [vmem:[#allocation3 + $0xc0] sm:$0xff]  ;;  %v10242_v11 = vld [vmem:[%s19680_s3 + $0x60] sm:$0xff] }
 0x4b4   :  { %14533 = vmatprep.mubr.msk.f32.mxu1 %vm8003_vm1, %v8358_v51  ;;  %v8930_v63 = vld [vmem:[#allocation3 + $0xb2] sm:$0xff]  ;;  %v8931_v18 = vld [vmem:[#allocation3 + $0xba] sm:$0xff] }
 0x4b5   :  { %v9260_v51 = vld [vmem:[#allocation3 + $0xd2] sm:$0xff] }
 0x4b7   :  { %14534 = vmatmul.mubr.msk.f32.gmra.mrb[106].mxu1 %vm8003_vm1, %v8359_v46  ;;  %v10243_v46 = vld [vmem:[%s19680_s3 + $0x68] sm:$0xff] }
 0x4b8   :  { %14540 = vmatprep.mubr.msk.f32.mxu1 %vm8003_vm1, %v8306_v59  ;;  %v9562_v59 = vld [vmem:[#allocation3 + $0xb] sm:$0xff]  ;;  %v14904_v29 = vpack.c.bf16 %v10243_v46, %v10242_v11 }
 0x4b9   :  { %v10545_v11 = vld [vmem:[#allocation3 + $0x25] sm:$0xff]  ;;  %v10546_v46 = vld [vmem:[#allocation3 + $0x2d] sm:$0xff] }
 0x4bb   :  { %14541 = vmatmul.mubr.msk.f32.vlgmr.msra.gmra.mrb[82].mxu1 %vm8003_vm1, %v8307_v3  ;;  %v9565_v3 = vld [vmem:[#allocation3 + $0x23] sm:$0xff] }
 0x4bc   :  { %14543 = vmatprep.mubr.msk.f32.mxu1 %vm8003_vm1, %v8308_v37  ;;  %14891 = vmatpush3.bf16.msra.mxu1 %v19207_v44  ;;  %v8315_v44 = vld [vmem:[#allocation3 + $0x48] sm:$0xff] }
 0x4bd   :  { %14893 = vmatprep.subr.bf16.mxu1 %v14892_v0  ;;  %v9566_v37 = vld [vmem:[#allocation3 + $0x2b] sm:$0xff] }
 0x4bf   :  { %14544 = vmatmul.mubr.msk.f32.gmra.mrb[84].mxu1 %vm8003_vm1, %v8309_v61  ;;  %v9567_v61 = vld [vmem:[#allocation3 + $0x33] sm:$0xff] }
 0x4c0   :  { %14546 = vmatprep.mubr.msk.f32.mxu1 %vm8003_vm1, %v8310_v38  ;;  %v9568_v38 = vld [vmem:[#allocation3 + $0x3b] sm:$0xff] }
 0x4c3   :  { %14547 = vmatmul.mubr.msk.f32.gmra.mrb[86].mxu1 %vm8003_vm1, %v8311_v4  ;;  %v9569_v4 = vld [vmem:[#allocation3 + $0x43] sm:$0xff] }
 0x4c4   :  { %14549 = vmatprep.mubr.msk.f32.mxu1 %vm8003_vm1, %v8312_v2  ;;  %v9570_v2 = vld [vmem:[#allocation3 + $0x4b] sm:$0xff] }
 0x4c7   :  { %14550 = vmatmul.mubr.msk.f32.gmra.mrb[88].mxu1 %vm8003_vm1, %v8313_v22  ;;  %v9572_v22 = vld [vmem:[#allocation3 + $0x5b] sm:$0xff] }
 0x4c8   :  { %14552 = vmatprep.mubr.msk.f32.mxu1 %vm8003_vm1, %v8314_v56  ;;  %v9571_v56 = vld [vmem:[#allocation3 + $0x53] sm:$0xff] }
 0x4cb   :  { %14553 = vmatmul.mubr.msk.f32.gmra.mrb[90].mxu1 %vm8003_vm1, %v8315_v44  ;;  %v9573_v44 = vld [vmem:[#allocation3 + $0x63] sm:$0xff] }
 0x4cc   :  { %14555 = vmatprep.mubr.msk.f32.mxu1 %vm8003_vm1, %v8316_v7  ;;  %v9574_v7 = vld [vmem:[#allocation3 + $0x6b] sm:$0xff] }
 0x4cf   :  { %14556 = vmatmul.mubr.msk.f32.gmra.mrb[92].mxu1 %vm8003_vm1, %v8317_v21  ;;  %v9576_v21 = vld [vmem:[#allocation3 + $0x7b] sm:$0xff] }
 0x4d0   :  { %14558 = vmatprep.mubr.msk.f32.mxu1 %vm8003_vm1, %v8318_v5  ;;  %v9575_v5 = vld [vmem:[#allocation3 + $0x73] sm:$0xff] }
 0x4d3   :  { %14559 = vmatmul.mubr.msk.f32.gmra.mrb[94].mxu1 %vm8003_vm1, %v8319_v24  ;;  %v9577_v24 = vld [vmem:[#allocation3 + $0x83] sm:$0xff] }
 0x4d4   :  { %14561 = vmatprep.mubr.msk.f32.mxu1 %vm8003_vm1, %v8320_v31  ;;  %v9578_v31 = vld [vmem:[#allocation3 + $0x8b] sm:$0xff] }
 0x4d7   :  { %14562 = vmatmul.mubr.msk.f32.gmra.mrb[96].mxu1 %vm8003_vm1, %v8321_v55  ;;  %v9579_v55 = vld [vmem:[#allocation3 + $0x93] sm:$0xff] }
 0x4d8   :  { %14564 = vmatprep.mubr.msk.f32.mxu1 %vm8003_vm1, %v8322_v48  ;;  %v9580_v48 = vld [vmem:[#allocation3 + $0x9b] sm:$0xff] }
 0x4db   :  { %14565 = vmatmul.mubr.msk.f32.gmra.mrb[98].mxu1 %vm8003_vm1, %v8323_v9  ;;  %v9581_v9 = vld [vmem:[#allocation3 + $0xa3] sm:$0xff] }
 0x4dc   :  { %14567 = vmatprep.mubr.msk.f32.mxu1 %vm8003_vm1, %v8324_v58  ;;  %v9582_v58 = vld [vmem:[#allocation3 + $0xab] sm:$0xff] }
 0x4df   :  { %14568 = vmatmul.mubr.msk.f32.gmra.mrb[100].mxu1 %vm8003_vm1, %v8325_v20  ;;  %v9583_v20 = vld [vmem:[#allocation3 + $0xb3] sm:$0xff] }
 0x4e0   :  { %14570 = vmatprep.mubr.msk.f32.mxu1 %vm8003_vm1, %v8326_v32  ;;  %v9584_v32 = vld [vmem:[#allocation3 + $0xbb] sm:$0xff] }
 0x4e3   :  { %14571 = vmatmul.mubr.msk.f32.gmra.mrb[102].mxu1 %vm8003_vm1, %v8327_v34  ;;  %v9585_v34 = vld [vmem:[#allocation3 + $0xc3] sm:$0xff] }
 0x4e4   :  { %14573 = vmatprep.mubr.msk.f32.mxu1 %vm8003_vm1, %v8328_v16  ;;  %v9586_v16 = vld [vmem:[#allocation3 + $0xcb] sm:$0xff] }
 0x4e7   :  { %14574 = vmatmul.mubr.msk.f32.gmra.mrb[104].mxu1 %vm8003_vm1, %v8329_v8  ;;  %v9587_v8 = vld [vmem:[#allocation3 + $0xd3] sm:$0xff] }
 0x4e8   :  { %14576 = vmatprep.mubr.msk.f32.mxu1 %vm8003_vm1, %v8330_v27  ;;  %v10569_v27 = vld [vmem:[%s19680_s3 + $0x70] sm:$0xff] }
 0x4eb   :  { %14577 = vmatmul.mubr.msk.f32.gmra.mrb[106].mxu1 %vm8003_vm1, %v8331_v35  ;;  %v10570_v35 = vld [vmem:[%s19680_s3 + $0x78] sm:$0xff] }
 0x4ec   :  { %14583 = vmatprep.mubr.msk.f32.mxu1 %vm8003_vm1, %v8908_v41  ;;  %v9889_v41 = vld [vmem:[#allocation3 + $0xc] sm:$0xff]  ;;  %v14908_v50 = vpack.c.bf16 %v10570_v35, %v10569_v27  ;;  %v10875_v27 = vld [vmem:[#allocation3 + $0x3e] sm:$0xff] }
 0x4ed   :  { %v10876_v35 = vld [vmem:[#allocation3 + $0x46] sm:$0xff] }
 0x4ef   :  { %14584 = vmatmul.mubr.msk.f32.vlgmr.msra.gmra.mrb[82].mxu1 %vm8003_vm1, %v8909_v36 }
 0x4f0   :  { %14586 = vmatprep.mubr.msk.f32.mxu1 %vm8003_vm1, %v8910_v30  ;;  %14895 = vmatpush3.bf16.msra.mxu1 %v14892_v0  ;;  %v9564_v0 = vld [vmem:[#allocation3 + $0x1b] sm:$0xff] }
 0x4f1   :  { %14897 = vmatprep.subr.bf16.mxu1 %v14896_v49 }
 0x4f3   :  { %14587 = vmatmul.mubr.msk.f32.gmra.mrb[84].mxu1 %vm8003_vm1, %v8911_v39 }
 0x4f4   :  { %14589 = vmatprep.mubr.msk.f32.mxu1 %vm8003_vm1, %v8912_v57 }
 0x4f7   :  { %14590 = vmatmul.mubr.msk.f32.gmra.mrb[86].mxu1 %vm8003_vm1, %v8913_v40 }
 0x4f8   :  { %14592 = vmatprep.mubr.msk.f32.mxu1 %vm8003_vm1, %v8914_v45 }
 0x4fb   :  { %14593 = vmatmul.mubr.msk.f32.gmra.mrb[88].mxu1 %vm8003_vm1, %v8915_v42 }
 0x4fc   :  { %14595 = vmatprep.mubr.msk.f32.mxu1 %vm8003_vm1, %v8916_v62 }
 0x4ff   :  { %14596 = vmatmul.mubr.msk.f32.gmra.mrb[90].mxu1 %vm8003_vm1, %v8917_v17 }
 0x500   :  { %14598 = vmatprep.mubr.msk.f32.mxu1 %vm8003_vm1, %v8918_v52 }
 0x503   :  { %14599 = vmatmul.mubr.msk.f32.gmra.mrb[92].mxu1 %vm8003_vm1, %v8919_v60 }
 0x504   :  { %14601 = vmatprep.mubr.msk.f32.mxu1 %vm8003_vm1, %v8920_v19 }
 0x507   :  { %14602 = vmatmul.mubr.msk.f32.gmra.mrb[94].mxu1 %vm8003_vm1, %v8921_v6 }
 0x508   :  { %14604 = vmatprep.mubr.msk.f32.mxu1 %vm8003_vm1, %v8922_v23 }
 0x50b   :  { %14605 = vmatmul.mubr.msk.f32.gmra.mrb[96].mxu1 %vm8003_vm1, %v8923_v13 }
 0x50c   :  { %14607 = vmatprep.mubr.msk.f32.mxu1 %vm8003_vm1, %v8924_v43 }
 0x50f   :  { %14608 = vmatmul.mubr.msk.f32.gmra.mrb[98].mxu1 %vm8003_vm1, %v8925_v54 }
 0x510   :  { %14610 = vmatprep.mubr.msk.f32.mxu1 %vm8003_vm1, %v8926_v47 }
 0x513   :  { %14611 = vmatmul.mubr.msk.f32.gmra.mrb[100].mxu1 %vm8003_vm1, %v8927_v15 }
 0x514   :  { %14613 = vmatprep.mubr.msk.f32.mxu1 %vm8003_vm1, %v8928_v26 }
 0x517   :  { %14614 = vmatmul.mubr.msk.f32.gmra.mrb[102].mxu1 %vm8003_vm1, %v8929_v53 }
 0x518   :  { %14616 = vmatprep.mubr.msk.f32.mxu1 %vm8003_vm1, %v8930_v63 }
 0x51b   :  { %14617 = vmatmul.mubr.msk.f32.gmra.mrb[104].mxu1 %vm8003_vm1, %v8931_v18 }
 0x51c   :  { %14619 = vmatprep.mubr.msk.f32.mxu1 %vm8003_vm1, %v8932_v1 }
 0x51f   :  { %14620 = vmatmul.mubr.msk.f32.gmra.mrb[106].mxu1 %vm8003_vm1, %v8933_v33 }
 0x520   :  { %14626 = vmatprep.mubr.msk.f32.mxu1 %vm8003_vm1, %v8909_v36  ;;  %v9892_v36 = vld [vmem:[#allocation3 + $0x24] sm:$0xff] }
 0x523   :  { %14627 = vmatmul.mubr.msk.f32.vlgmr.msra.gmra.mrb[82].mxu1 %vm8003_vm1, %v8910_v30  ;;  %v9893_v30 = vld [vmem:[#allocation3 + $0x2c] sm:$0xff] }
 0x524   :  { %14629 = vmatprep.mubr.msk.f32.mxu1 %vm8003_vm1, %v8911_v39  ;;  %14899 = vmatpush3.bf16.msra.mxu1 %v14896_v49  ;;  %v9891_v49 = vld [vmem:[#allocation3 + $0x1c] sm:$0xff]  ;;  %v9894_v39 = vld [vmem:[#allocation3 + $0x34] sm:$0xff] }
 0x525   :  { %14901 = vmatprep.subr.bf16.mxu1 %v14900_v25 }
 0x527   :  { %14630 = vmatmul.mubr.msk.f32.gmra.mrb[84].mxu1 %vm8003_vm1, %v8912_v57  ;;  %v9895_v57 = vld [vmem:[#allocation3 + $0x3c] sm:$0xff] }
 0x528   :  { %14632 = vmatprep.mubr.msk.f32.mxu1 %vm8003_vm1, %v8913_v40  ;;  %v9896_v40 = vld [vmem:[#allocation3 + $0x44] sm:$0xff] }
 0x52b   :  { %14633 = vmatmul.mubr.msk.f32.gmra.mrb[86].mxu1 %vm8003_vm1, %v8914_v45  ;;  %v9897_v45 = vld [vmem:[#allocation3 + $0x4c] sm:$0xff] }
 0x52c   :  { %14635 = vmatprep.mubr.msk.f32.mxu1 %vm8003_vm1, %v8915_v42  ;;  %v9899_v42 = vld [vmem:[#allocation3 + $0x5c] sm:$0xff] }
 0x52f   :  { %14636 = vmatmul.mubr.msk.f32.gmra.mrb[88].mxu1 %vm8003_vm1, %v8916_v62  ;;  %v9898_v62 = vld [vmem:[#allocation3 + $0x54] sm:$0xff] }
 0x530   :  { %14638 = vmatprep.mubr.msk.f32.mxu1 %vm8003_vm1, %v8917_v17  ;;  %v9900_v17 = vld [vmem:[#allocation3 + $0x64] sm:$0xff] }
 0x533   :  { %14639 = vmatmul.mubr.msk.f32.gmra.mrb[90].mxu1 %vm8003_vm1, %v8918_v52  ;;  %v9901_v52 = vld [vmem:[#allocation3 + $0x6c] sm:$0xff] }
 0x534   :  { %14641 = vmatprep.mubr.msk.f32.mxu1 %vm8003_vm1, %v8919_v60  ;;  %v9902_v60 = vld [vmem:[#allocation3 + $0x74] sm:$0xff] }
 0x537   :  { %14642 = vmatmul.mubr.msk.f32.gmra.mrb[92].mxu1 %vm8003_vm1, %v8920_v19  ;;  %v9903_v19 = vld [vmem:[#allocation3 + $0x7c] sm:$0xff] }
 0x538   :  { %14644 = vmatprep.mubr.msk.f32.mxu1 %vm8003_vm1, %v8921_v6  ;;  %v9904_v6 = vld [vmem:[#allocation3 + $0x84] sm:$0xff] }
 0x53b   :  { %14645 = vmatmul.mubr.msk.f32.gmra.mrb[94].mxu1 %vm8003_vm1, %v8922_v23  ;;  %v9905_v23 = vld [vmem:[#allocation3 + $0x8c] sm:$0xff] }
 0x53c   :  { %14647 = vmatprep.mubr.msk.f32.mxu1 %vm8003_vm1, %v8923_v13  ;;  %v9906_v13 = vld [vmem:[#allocation3 + $0x94] sm:$0xff] }
 0x53f   :  { %14648 = vmatmul.mubr.msk.f32.gmra.mrb[96].mxu1 %vm8003_vm1, %v8924_v43  ;;  %v9907_v43 = vld [vmem:[#allocation3 + $0x9c] sm:$0xff] }
 0x540   :  { %14650 = vmatprep.mubr.msk.f32.mxu1 %vm8003_vm1, %v8925_v54  ;;  %v9908_v54 = vld [vmem:[#allocation3 + $0xa4] sm:$0xff] }
 0x543   :  { %14651 = vmatmul.mubr.msk.f32.gmra.mrb[98].mxu1 %vm8003_vm1, %v8926_v47  ;;  %v9909_v47 = vld [vmem:[#allocation3 + $0xac] sm:$0xff] }
 0x544   :  { %14653 = vmatprep.mubr.msk.f32.mxu1 %vm8003_vm1, %v8927_v15  ;;  %v9910_v15 = vld [vmem:[#allocation3 + $0xb4] sm:$0xff] }
 0x547   :  { %14654 = vmatmul.mubr.msk.f32.gmra.mrb[100].mxu1 %vm8003_vm1, %v8928_v26  ;;  %v9911_v26 = vld [vmem:[#allocation3 + $0xbc] sm:$0xff] }
 0x548   :  { %14656 = vmatprep.mubr.msk.f32.mxu1 %vm8003_vm1, %v8929_v53  ;;  %v9912_v53 = vld [vmem:[#allocation3 + $0xc4] sm:$0xff] }
 0x54b   :  { %14657 = vmatmul.mubr.msk.f32.gmra.mrb[102].mxu1 %vm8003_vm1, %v8930_v63  ;;  %v9913_v63 = vld [vmem:[#allocation3 + $0xcc] sm:$0xff] }
 0x54c   :  { %14659 = vmatprep.mubr.msk.f32.mxu1 %vm8003_vm1, %v8931_v18  ;;  %v10896_v18 = vld [vmem:[%s19680_s3 + $0x80] sm:$0xff] }
 0x54f   :  { %14660 = vmatmul.mubr.msk.f32.gmra.mrb[104].mxu1 %vm8003_vm1, %v8932_v1  ;;  %v9914_v1 = vld [vmem:[#allocation3 + $0xd4] sm:$0xff] }
 0x550   :  { %14662 = vmatprep.mubr.msk.f32.mxu1 %vm8003_vm1, %v8933_v33  ;;  %v10897_v33 = vld [vmem:[%s19680_s3 + $0x88] sm:$0xff] }
 0x551   :  { %v14912_v12 = vpack.c.bf16 %v10897_v33, %v10896_v18 }
 0x553   :  { %14663 = vmatmul.mubr.msk.f32.gmra.mrb[106].mxu1 %vm8003_vm1, %v9260_v51  ;;  %v10544_v51 = vld [vmem:[#allocation3 + $0x1d] sm:$0xff] }
 0x554   :  { %14669 = vmatprep.mubr.msk.f32.mxu1 %vm8003_vm1, %v9562_v59  ;;  %v10547_v59 = vld [vmem:[#allocation3 + $0x35] sm:$0xff] }
 0x557   :  { %14670 = vmatmul.mubr.msk.f32.vlgmr.msra.gmra.mrb[82].mxu1 %vm8003_vm1, %v9563_v14  ;;  %v10549_v14 = vld [vmem:[#allocation3 + $0x45] sm:$0xff] }
 0x558   :  { %14672 = vmatprep.mubr.msk.f32.mxu1 %vm8003_vm1, %v9564_v0  ;;  %14903 = vmatpush3.bf16.msra.mxu1 %v14900_v25  ;;  %v10543_v25 = vld [vmem:[#allocation3 + $0x15] sm:$0xff]  ;;  %v10550_v0 = vld [vmem:[#allocation3 + $0x4d] sm:$0xff] }
 0x559   :  { %14905 = vmatprep.subr.bf16.mxu1 %v14904_v29 }
 0x55b   :  { %14673 = vmatmul.mubr.msk.f32.gmra.mrb[84].mxu1 %vm8003_vm1, %v9565_v3  ;;  %v10551_v3 = vld [vmem:[#allocation3 + $0x55] sm:$0xff] }
 0x55c   :  { %14675 = vmatprep.mubr.msk.f32.mxu1 %vm8003_vm1, %v9566_v37  ;;  %v10552_v37 = vld [vmem:[#allocation3 + $0x5d] sm:$0xff] }
 0x55f   :  { %14676 = vmatmul.mubr.msk.f32.gmra.mrb[86].mxu1 %vm8003_vm1, %v9567_v61  ;;  %v10553_v61 = vld [vmem:[#allocation3 + $0x65] sm:$0xff] }
 0x560   :  { %14678 = vmatprep.mubr.msk.f32.mxu1 %vm8003_vm1, %v9568_v38  ;;  %v10554_v38 = vld [vmem:[#allocation3 + $0x6d] sm:$0xff] }
 0x563   :  { %14679 = vmatmul.mubr.msk.f32.gmra.mrb[88].mxu1 %vm8003_vm1, %v9569_v4  ;;  %v10555_v4 = vld [vmem:[#allocation3 + $0x75] sm:$0xff] }
 0x564   :  { %14681 = vmatprep.mubr.msk.f32.mxu1 %vm8003_vm1, %v9570_v2  ;;  %v10556_v2 = vld [vmem:[#allocation3 + $0x7d] sm:$0xff] }
 0x567   :  { %14682 = vmatmul.mubr.msk.f32.gmra.mrb[90].mxu1 %vm8003_vm1, %v9571_v56  ;;  %v10558_v56 = vld [vmem:[#allocation3 + $0x8d] sm:$0xff] }
 0x568   :  { %14684 = vmatprep.mubr.msk.f32.mxu1 %vm8003_vm1, %v9572_v22  ;;  %v10557_v22 = vld [vmem:[#allocation3 + $0x85] sm:$0xff] }
 0x56b   :  { %14685 = vmatmul.mubr.msk.f32.gmra.mrb[92].mxu1 %vm8003_vm1, %v9573_v44  ;;  %v10559_v44 = vld [vmem:[#allocation3 + $0x95] sm:$0xff] }
 0x56c   :  { %14687 = vmatprep.mubr.msk.f32.mxu1 %vm8003_vm1, %v9574_v7  ;;  %v10560_v7 = vld [vmem:[#allocation3 + $0x9d] sm:$0xff] }
 0x56f   :  { %14688 = vmatmul.mubr.msk.f32.gmra.mrb[94].mxu1 %vm8003_vm1, %v9575_v5  ;;  %v10561_v5 = vld [vmem:[#allocation3 + $0xa5] sm:$0xff] }
 0x570   :  { %14690 = vmatprep.mubr.msk.f32.mxu1 %vm8003_vm1, %v9576_v21  ;;  %v10562_v21 = vld [vmem:[#allocation3 + $0xad] sm:$0xff] }
 0x573   :  { %14691 = vmatmul.mubr.msk.f32.gmra.mrb[96].mxu1 %vm8003_vm1, %v9577_v24  ;;  %v10563_v24 = vld [vmem:[#allocation3 + $0xb5] sm:$0xff] }
 0x574   :  { %14693 = vmatprep.mubr.msk.f32.mxu1 %vm8003_vm1, %v9578_v31  ;;  %v10565_v31 = vld [vmem:[#allocation3 + $0xc5] sm:$0xff] }
 0x577   :  { %14694 = vmatmul.mubr.msk.f32.gmra.mrb[98].mxu1 %vm8003_vm1, %v9579_v55  ;;  %v10564_v55 = vld [vmem:[#allocation3 + $0xbd] sm:$0xff] }
 0x578   :  { %14696 = vmatprep.mubr.msk.f32.mxu1 %vm8003_vm1, %v9580_v48  ;;  %v10566_v48 = vld [vmem:[#allocation3 + $0xcd] sm:$0xff] }
 0x57b   :  { %14697 = vmatmul.mubr.msk.f32.gmra.mrb[100].mxu1 %vm8003_vm1, %v9581_v9  ;;  %v10567_v9 = vld [vmem:[#allocation3 + $0xd5] sm:$0xff] }
 0x57c   :  { %14699 = vmatprep.mubr.msk.f32.mxu1 %vm8003_vm1, %v9582_v58  ;;  %v10568_v58 = vld [vmem:[#allocation3 + $0xdd] sm:$0xff] }
 0x57f   :  { %14700 = vmatmul.mubr.msk.f32.gmra.mrb[102].mxu1 %vm8003_vm1, %v9583_v20  ;;  %v10870_v20 = vld [vmem:[#allocation3 + $0x16] sm:$0xff] }
 0x580   :  { %14702 = vmatprep.mubr.msk.f32.mxu1 %vm8003_vm1, %v9584_v32  ;;  %v10871_v32 = vld [vmem:[#allocation3 + $0x1e] sm:$0xff] }
 0x583   :  { %14703 = vmatmul.mubr.msk.f32.gmra.mrb[104].mxu1 %vm8003_vm1, %v9585_v34  ;;  %v10872_v34 = vld [vmem:[#allocation3 + $0x26] sm:$0xff] }
 0x584   :  { %14705 = vmatprep.mubr.msk.f32.mxu1 %vm8003_vm1, %v9586_v16  ;;  %v10873_v16 = vld [vmem:[#allocation3 + $0x2e] sm:$0xff] }
 0x587   :  { %14706 = vmatmul.mubr.msk.f32.gmra.mrb[106].mxu1 %vm8003_vm1, %v9587_v8  ;;  %v10874_v8 = vld [vmem:[#allocation3 + $0x36] sm:$0xff] }
 0x588   :  { %14712 = vmatprep.mubr.msk.f32.mxu1 %vm8003_vm1, %v9889_v41  ;;  %v10877_v41 = vld [vmem:[#allocation3 + $0x4e] sm:$0xff] }
 0x58b   :  { %14713 = vmatmul.mubr.msk.f32.vlgmr.msra.gmra.mrb[82].mxu1 %vm8003_vm1, %v9890_v10 }
 0x58c   :  { %14715 = vmatprep.mubr.msk.f32.mxu1 %vm8003_vm1, %v9891_v49  ;;  %14907 = vmatpush3.bf16.msra.mxu1 %v14904_v29  ;;  %v10548_v29 = vld [vmem:[#allocation3 + $0x3d] sm:$0xff] }
 0x58d   :  { %14909 = vmatprep.subr.bf16.mxu1 %v14908_v50 }
 0x58f   :  { %14716 = vmatmul.mubr.msk.f32.gmra.mrb[84].mxu1 %vm8003_vm1, %v9892_v36 }
 0x590   :  { %14718 = vmatprep.mubr.msk.f32.mxu1 %vm8003_vm1, %v9893_v30 }
 0x593   :  { %14719 = vmatmul.mubr.msk.f32.gmra.mrb[86].mxu1 %vm8003_vm1, %v9894_v39 }
 0x594   :  { %14721 = vmatprep.mubr.msk.f32.mxu1 %vm8003_vm1, %v9895_v57 }
 0x597   :  { %14722 = vmatmul.mubr.msk.f32.gmra.mrb[88].mxu1 %vm8003_vm1, %v9896_v40 }
 0x598   :  { %14724 = vmatprep.mubr.msk.f32.mxu1 %vm8003_vm1, %v9897_v45 }
 0x59b   :  { %14725 = vmatmul.mubr.msk.f32.gmra.mrb[90].mxu1 %vm8003_vm1, %v9898_v62 }
 0x59c   :  { %14727 = vmatprep.mubr.msk.f32.mxu1 %vm8003_vm1, %v9899_v42 }
 0x59f   :  { %14728 = vmatmul.mubr.msk.f32.gmra.mrb[92].mxu1 %vm8003_vm1, %v9900_v17 }
 0x5a0   :  { %14730 = vmatprep.mubr.msk.f32.mxu1 %vm8003_vm1, %v9901_v52 }
 0x5a3   :  { %14731 = vmatmul.mubr.msk.f32.gmra.mrb[94].mxu1 %vm8003_vm1, %v9902_v60 }
 0x5a4   :  { %14733 = vmatprep.mubr.msk.f32.mxu1 %vm8003_vm1, %v9903_v19 }
 0x5a7   :  { %14734 = vmatmul.mubr.msk.f32.gmra.mrb[96].mxu1 %vm8003_vm1, %v9904_v6 }
 0x5a8   :  { %14736 = vmatprep.mubr.msk.f32.mxu1 %vm8003_vm1, %v9905_v23 }
 0x5ab   :  { %14737 = vmatmul.mubr.msk.f32.gmra.mrb[98].mxu1 %vm8003_vm1, %v9906_v13 }
 0x5ac   :  { %14739 = vmatprep.mubr.msk.f32.mxu1 %vm8003_vm1, %v9907_v43 }
 0x5af   :  { %14740 = vmatmul.mubr.msk.f32.gmra.mrb[100].mxu1 %vm8003_vm1, %v9908_v54 }
 0x5b0   :  { %14742 = vmatprep.mubr.msk.f32.mxu1 %vm8003_vm1, %v9909_v47 }
 0x5b3   :  { %14743 = vmatmul.mubr.msk.f32.gmra.mrb[102].mxu1 %vm8003_vm1, %v9910_v15 }
 0x5b4   :  { %14745 = vmatprep.mubr.msk.f32.mxu1 %vm8003_vm1, %v9911_v26 }
 0x5b7   :  { %14746 = vmatmul.mubr.msk.f32.gmra.mrb[104].mxu1 %vm8003_vm1, %v9912_v53 }
 0x5b8   :  { %14748 = vmatprep.mubr.msk.f32.mxu1 %vm8003_vm1, %v9913_v63 }
 0x5bb   :  { %14749 = vmatmul.mubr.msk.f32.gmra.mrb[106].mxu1 %vm8003_vm1, %v9914_v1 }
 0x5bc   :  { %14755 = vmatprep.mubr.msk.f32.mxu1 %vm8003_vm1, %v9890_v10  ;;  %v10879_v10 = vld [vmem:[#allocation3 + $0x5e] sm:$0xff] }
 0x5bf   :  { %14756 = vmatmul.mubr.msk.f32.vlgmr.msra.gmra.mrb[82].mxu1 %vm8003_vm1, %v9891_v49  ;;  %v10880_v49 = vld [vmem:[#allocation3 + $0x66] sm:$0xff] }
 0x5c0   :  { %14758 = vmatprep.mubr.msk.f32.mxu1 %vm8003_vm1, %v9892_v36  ;;  %14911 = vmatpush3.bf16.msra.mxu1 %v14908_v50  ;;  %v10878_v50 = vld [vmem:[#allocation3 + $0x56] sm:$0xff]  ;;  %v10881_v36 = vld [vmem:[#allocation3 + $0x6e] sm:$0xff] }
 0x5c1   :  { %14913 = vmatprep.subr.bf16.mxu1 %v14912_v12 }
 0x5c3   :  { %14759 = vmatmul.mubr.msk.f32.gmra.mrb[84].mxu1 %vm8003_vm1, %v9893_v30  ;;  %v10882_v30 = vld [vmem:[#allocation3 + $0x76] sm:$0xff] }
 0x5c4   :  { %14761 = vmatprep.mubr.msk.f32.mxu1 %vm8003_vm1, %v9894_v39  ;;  %v10883_v39 = vld [vmem:[#allocation3 + $0x7e] sm:$0xff] }
 0x5c7   :  { %14762 = vmatmul.mubr.msk.f32.gmra.mrb[86].mxu1 %vm8003_vm1, %v9895_v57  ;;  %v10884_v57 = vld [vmem:[#allocation3 + $0x86] sm:$0xff] }
 0x5c8   :  { %14764 = vmatprep.mubr.msk.f32.mxu1 %vm8003_vm1, %v9896_v40  ;;  %v10885_v40 = vld [vmem:[#allocation3 + $0x8e] sm:$0xff] }
 0x5cb   :  { %14765 = vmatmul.mubr.msk.f32.gmra.mrb[88].mxu1 %vm8003_vm1, %v9897_v45  ;;  %v10886_v45 = vld [vmem:[#allocation3 + $0x96] sm:$0xff] }
 0x5cc   :  { %14767 = vmatprep.mubr.msk.f32.mxu1 %vm8003_vm1, %v9898_v62  ;;  %v10888_v62 = vld [vmem:[#allocation3 + $0xa6] sm:$0xff] }
 0x5cf   :  { %14768 = vmatmul.mubr.msk.f32.gmra.mrb[90].mxu1 %vm8003_vm1, %v9899_v42  ;;  %v10887_v42 = vld [vmem:[#allocation3 + $0x9e] sm:$0xff] }
 0x5d0   :  { %14770 = vmatprep.mubr.msk.f32.mxu1 %vm8003_vm1, %v9900_v17  ;;  %v10889_v17 = vld [vmem:[#allocation3 + $0xae] sm:$0xff] }
 0x5d3   :  { %14771 = vmatmul.mubr.msk.f32.gmra.mrb[92].mxu1 %vm8003_vm1, %v9901_v52  ;;  %v10890_v52 = vld [vmem:[#allocation3 + $0xb6] sm:$0xff] }
 0x5d4   :  { %14773 = vmatprep.mubr.msk.f32.mxu1 %vm8003_vm1, %v9902_v60  ;;  %v10892_v60 = vld [vmem:[#allocation3 + $0xc6] sm:$0xff] }
 0x5d7   :  { %14774 = vmatmul.mubr.msk.f32.gmra.mrb[94].mxu1 %vm8003_vm1, %v9903_v19  ;;  %v10891_v19 = vld [vmem:[#allocation3 + $0xbe] sm:$0xff] }
 0x5d8   :  { %14776 = vmatprep.mubr.msk.f32.mxu1 %vm8003_vm1, %v9904_v6  ;;  %v10893_v6 = vld [vmem:[#allocation3 + $0xce] sm:$0xff] }
 0x5db   :  { %14777 = vmatmul.mubr.msk.f32.gmra.mrb[96].mxu1 %vm8003_vm1, %v9905_v23  ;;  %v10894_v23 = vld [vmem:[#allocation3 + $0xd6] sm:$0xff] }
 0x5dc   :  { %14779 = vmatprep.mubr.msk.f32.mxu1 %vm8003_vm1, %v9906_v13  ;;  %v10895_v13 = vld [vmem:[#allocation3 + $0xde] sm:$0xff] }
 0x5df   :  { %14780 = vmatmul.mubr.msk.f32.gmra.mrb[98].mxu1 %vm8003_vm1, %v9907_v43  ;;  %v19615_v43 = vld [vmem:[%s19681_s4] ss:$0 sm:$0xff]  ;;  %s15813_s4 = smov [#allocation5]  }
 0x5e0   :  { %14782 = vmatprep.mubr.msk.f32.mxu1 %vm8003_vm1, %v9908_v54  ;;  %s11384_s19 = sshll.u32 %s15813_s4, 4  ;;  %s11385_s19 = int_to_ptr.vmem [resolvable:$true] %s11384_s19 }
 0x5e1   :  { %s15788_s20 = scalar_lea.vmem %s11385_s19, 512  ;;  %p15793_p1 = scmp.lt.s32.totalorder %s11385_s19, %s11385_s19 }
 0x5e2   :  { %p15789_p0 = scmp.ne.s32.totalorder %s11385_s19, %s15788_s20  ;;  %p15794_p2 = scmp.lt.s32.totalorder %s15788_s20, %s15788_s20 }
 0x5e3   :  { %14783 = vmatmul.mubr.msk.f32.gmra.mrb[100].mxu1 %vm8003_vm1, %v9909_v47 }
 0x5e4   :  { %14785 = vmatprep.mubr.msk.f32.mxu1 %vm8003_vm1, %v9910_v15  ;;  %p15795_p3 = por %p15794_p2, %p15793_p1 }
 0x5e6   :  { %p15796_p4 = pnand %p15795_p3, %p15789_p0 }
 0x5e7   :  { %14786 = vmatmul.mubr.msk.f32.gmra.mrb[102].mxu1 %vm8003_vm1, %v9911_v26 }
 0x5e8   :  { %14788 = vmatprep.mubr.msk.f32.mxu1 %vm8003_vm1, %v9912_v53 }
 0x5eb   :  { %14789 = vmatmul.mubr.msk.f32.gmra.mrb[104].mxu1 %vm8003_vm1, %v9913_v63 }
 0x5ec   :  { %14791 = vmatprep.mubr.msk.f32.mxu1 %vm8003_vm1, %v9914_v1 }
 0x5ef   :  { %14792 = vmatmul.mubr.msk.f32.gmra.mrb[106].mxu1 %vm8003_vm1, %v10241_v28 }
 0x5f0   :  { %14798 = vmatprep.mubr.msk.f32.mxu1 %vm8003_vm1, %v10543_v25 }
 0x5f3   :  { %14799 = vmatmul.mubr.msk.f32.vlgmr.msra.gmra.mrb[82].mxu1 %vm8003_vm1, %v10544_v51 }
 0x5f4   :  { %14801 = vmatprep.mubr.msk.f32.mxu1 %vm8003_vm1, %v10545_v11  ;;  %14915 = vmatpush3.bf16.msra.mxu1 %v14912_v12 }
 0x5f7   :  { %14802 = vmatmul.mubr.msk.f32.gmra.mrb[84].mxu1 %vm8003_vm1, %v10546_v46 }
 0x5f8   :  { %14804 = vmatprep.mubr.msk.f32.mxu1 %vm8003_vm1, %v10547_v59 }
 0x5fb   :  { %14805 = vmatmul.mubr.msk.f32.gmra.mrb[86].mxu1 %vm8003_vm1, %v10548_v29 }
 0x5fc   :  { %14807 = vmatprep.mubr.msk.f32.mxu1 %vm8003_vm1, %v10549_v14 }
 0x5ff   :  { %14808 = vmatmul.mubr.msk.f32.gmra.mrb[88].mxu1 %vm8003_vm1, %v10550_v0 }
 0x600   :  { %14810 = vmatprep.mubr.msk.f32.mxu1 %vm8003_vm1, %v10551_v3 }
 0x603   :  { %14811 = vmatmul.mubr.msk.f32.gmra.mrb[90].mxu1 %vm8003_vm1, %v10552_v37 }
 0x604   :  { %14813 = vmatprep.mubr.msk.f32.mxu1 %vm8003_vm1, %v10553_v61 }
 0x607   :  { %14814 = vmatmul.mubr.msk.f32.gmra.mrb[92].mxu1 %vm8003_vm1, %v10554_v38 }
 0x608   :  { %14816 = vmatprep.mubr.msk.f32.mxu1 %vm8003_vm1, %v10555_v4 }
 0x60b   :  { %14817 = vmatmul.mubr.msk.f32.gmra.mrb[94].mxu1 %vm8003_vm1, %v10556_v2 }
 0x60c   :  { %14819 = vmatprep.mubr.msk.f32.mxu1 %vm8003_vm1, %v10557_v22 }
 0x60f   :  { %14820 = vmatmul.mubr.msk.f32.gmra.mrb[96].mxu1 %vm8003_vm1, %v10558_v56 }
 0x610   :  { %14822 = vmatprep.mubr.msk.f32.mxu1 %vm8003_vm1, %v10559_v44 }
 0x613   :  { %14823 = vmatmul.mubr.msk.f32.gmra.mrb[98].mxu1 %vm8003_vm1, %v10560_v7 }
 0x614   :  { %14825 = vmatprep.mubr.msk.f32.mxu1 %vm8003_vm1, %v10561_v5 }
 0x617   :  { %14826 = vmatmul.mubr.msk.f32.gmra.mrb[100].mxu1 %vm8003_vm1, %v10562_v21 }
 0x618   :  { %14828 = vmatprep.mubr.msk.f32.mxu1 %vm8003_vm1, %v10563_v24 }
 0x61b   :  { %14829 = vmatmul.mubr.msk.f32.gmra.mrb[102].mxu1 %vm8003_vm1, %v10564_v55 }
 0x61c   :  { %14831 = vmatprep.mubr.msk.f32.mxu1 %vm8003_vm1, %v10565_v31 }
 0x61f   :  { %14832 = vmatmul.mubr.msk.f32.gmra.mrb[104].mxu1 %vm8003_vm1, %v10566_v48 }
 0x620   :  { %14834 = vmatprep.mubr.msk.f32.mxu1 %vm8003_vm1, %v10567_v9 }
 0x623   :  { %14835 = vmatmul.mubr.msk.f32.gmra.mrb[106].mxu1 %vm8003_vm1, %v10568_v58 }
 0x624   :  { %14841 = vmatprep.mubr.msk.f32.mxu1 %vm8003_vm1, %v10870_v20 }
 0x627   :  { %14842 = vmatmul.mubr.msk.f32.vlgmr.msra.gmra.mrb[82].mxu1 %vm8003_vm1, %v10871_v32 }
 0x628   :  { %14844 = vmatprep.mubr.msk.f32.mxu1 %vm8003_vm1, %v10872_v34 }
 0x62b   :  { %14845 = vmatmul.mubr.msk.f32.gmra.mrb[84].mxu1 %vm8003_vm1, %v10873_v16 }
 0x62c   :  { %14847 = vmatprep.mubr.msk.f32.mxu1 %vm8003_vm1, %v10874_v8 }
 0x62f   :  { %14848 = vmatmul.mubr.msk.f32.gmra.mrb[86].mxu1 %vm8003_vm1, %v10875_v27 }
 0x630   :  { %14850 = vmatprep.mubr.msk.f32.mxu1 %vm8003_vm1, %v10876_v35 }
 0x633   :  { %14851 = vmatmul.mubr.msk.f32.gmra.mrb[88].mxu1 %vm8003_vm1, %v10877_v41 }
 0x634   :  { %14853 = vmatprep.mubr.msk.f32.mxu1 %vm8003_vm1, %v10878_v50 }
 0x637   :  { %14854 = vmatmul.mubr.msk.f32.gmra.mrb[90].mxu1 %vm8003_vm1, %v10879_v10 }
 0x638   :  { %14856 = vmatprep.mubr.msk.f32.mxu1 %vm8003_vm1, %v10880_v49 }
 0x63b   :  { %14857 = vmatmul.mubr.msk.f32.gmra.mrb[92].mxu1 %vm8003_vm1, %v10881_v36 }
 0x63c   :  { %14859 = vmatprep.mubr.msk.f32.mxu1 %vm8003_vm1, %v10882_v30 }
 0x63f   :  { %14860 = vmatmul.mubr.msk.f32.gmra.mrb[94].mxu1 %vm8003_vm1, %v10883_v39 }
 0x640   :  { %14862 = vmatprep.mubr.msk.f32.mxu1 %vm8003_vm1, %v10884_v57 }
 0x643   :  { %14863 = vmatmul.mubr.msk.f32.gmra.mrb[96].mxu1 %vm8003_vm1, %v10885_v40 }
 0x644   :  { %14865 = vmatprep.mubr.msk.f32.mxu1 %vm8003_vm1, %v10886_v45 }
 0x647   :  { %14866 = vmatmul.mubr.msk.f32.gmra.mrb[98].mxu1 %vm8003_vm1, %v10887_v42 }
 0x648   :  { %14868 = vmatprep.mubr.msk.f32.mxu1 %vm8003_vm1, %v10888_v62 }
 0x64b   :  { %14869 = vmatmul.mubr.msk.f32.gmra.mrb[100].mxu1 %vm8003_vm1, %v10889_v17 }
 0x64c   :  { %14871 = vmatprep.mubr.msk.f32.mxu1 %vm8003_vm1, %v10890_v52 }
 0x64f   :  { %14872 = vmatmul.mubr.msk.f32.gmra.mrb[102].mxu1 %vm8003_vm1, %v10891_v19 }
 0x650   :  { %14874 = vmatprep.mubr.msk.f32.mxu1 %vm8003_vm1, %v10892_v60 }
 0x653   :  { %14875 = vmatmul.mubr.msk.f32.gmra.mrb[104].mxu1 %vm8003_vm1, %v10893_v6 }
 0x654   :  { %14877 = vmatprep.mubr.msk.f32.mxu1 %vm8003_vm1, %v10894_v23 }
 0x657   :  { %14878 = vmatmul.mubr.msk.f32.gmra.mrb[106].mxu1 %vm8003_vm1, %v10895_v13 }
 0x6fa   :  { %v14843_v54 = vpop.f32.mrb[82].mxu1 }
 0x6fb   :  { %v11205_v47 = vadd.f32 %v14843_v54, %v19615_v43  ;;  %v11042_v15 = vpop.f32.mrb[83].mxu1 }
 0x6fc   :  { %v11204_v26 = vadd.f32 %v19615_v43, %v11042_v15 }
 0x6fd   :  { %v11231_v53 = vmax.f32 %v11205_v47, 0.0 }
 0x6fe   :  { %v11230_v63 = vmax.f32 %v11204_v26, 0.0  ;;  %v14846_v1 = vpop.f32.mrb[84].mxu1 }
 0x6ff   :  { %11258 = vst.msk [vmem:[#allocation4 + $0x8] sm:$0xff] %vm11256_vm2, %v11231_v53  ;;  %v11207_v18 = vadd.f32 %v14846_v1, %v19615_v43  ;;  %v11052_v33 = vpop.f32.mrb[85].mxu1 }
 0x700   :  { %11257 = vst.msk [vmem:[#allocation4] sm:$0xff] %vm11256_vm2, %v11230_v63  ;;  %v11206_v12 = vadd.f32 %v19615_v43, %v11052_v33 }
 0x701   :  { %v11233_v28 = vmax.f32 %v11207_v18, 0.0 }
 0x702   :  { %v11232_v25 = vmax.f32 %v11206_v12, 0.0  ;;  %v14849_v51 = vpop.f32.mrb[86].mxu1 }
 0x703   :  { %11260 = vst.msk [vmem:[#allocation4 + $0x18] sm:$0xff] %vm11256_vm2, %v11233_v28  ;;  %v11209_v11 = vadd.f32 %v14849_v51, %v19615_v43  ;;  %v11062_v46 = vpop.f32.mrb[87].mxu1 }
 0x704   :  { %11259 = vst.msk [vmem:[#allocation4 + $0x10] sm:$0xff] %vm11256_vm2, %v11232_v25  ;;  %v11208_v59 = vadd.f32 %v19615_v43, %v11062_v46 }
 0x705   :  { %v11235_v29 = vmax.f32 %v11209_v11, 0.0 }
 0x706   :  { %v11234_v14 = vmax.f32 %v11208_v59, 0.0  ;;  %v14852_v0 = vpop.f32.mrb[88].mxu1 }
 0x707   :  { %v11283_v3 = vld [vmem:[#allocation4] ss:$2 sm:$0xf]  ;;  %v11285_v37 = vld [vmem:[#allocation4 + $0x1] ss:$2 sm:$0xf]  ;;  %v11211_v61 = vadd.f32 %v14852_v0, %v19615_v43 }
 0x708   :  { %11262 = vst.msk [vmem:[#allocation4 + $0x28] sm:$0xff] %vm11256_vm2, %v11235_v29  ;;  %11261 = vst.msk [vmem:[#allocation4 + $0x20] sm:$0xff] %vm11256_vm2, %v11234_v14  ;;  %v11072_v38 = vpop.f32.mrb[89].mxu1  ;;  %v11286_v22 = vmax.f32 %v11283_v3, %v11285_v37 }
 0x709   :  { %v11237_v4 = vmax.f32 %v11211_v61, 0.0  ;;  %v11210_v2 = vadd.f32 %v19615_v43, %v11072_v38 }
 0x70a   :  { %v14855_v56 = vpop.f32.mrb[90].mxu1 }
 0x70b   :  { %v11288_v44 = vld [vmem:[#allocation4 + $0xa] ss:$2 sm:$0xf]  ;;  %11264 = vst.msk [vmem:[#allocation4 + $0x38] sm:$0xff] %vm11256_vm2, %v11237_v4  ;;  %v11213_v7 = vadd.f32 %v14855_v56, %v19615_v43  ;;  %v11236_v55 = vmax.f32 %v11210_v2, 0.0  ;;  %v11082_v9 = vpop.f32.mrb[91].mxu1 }
 0x70c   :  { %v11289_v5 = vmax.f32 %v11286_v22, %v11288_v44  ;;  %v11296_v21 = vld [vmem:[#allocation4 + $0x14] ss:$2 sm:$0xf]  ;;  %v11298_v24 = vld [vmem:[#allocation4 + $0x15] ss:$2 sm:$0xf]  ;;  %v11212_v32 = vadd.f32 %v19615_v43, %v11082_v9 }
 0x70d   :  { %v11291_v31 = vld [vmem:[#allocation4 + $0xb] ss:$2 sm:$0xf]  ;;  %v11239_v48 = vmax.f32 %v11213_v7, 0.0  ;;  %v11299_v20 = vmax.f32 %v11296_v21, %v11298_v24  ;;  %11263 = vst.msk [vmem:[#allocation4 + $0x30] sm:$0xff] %vm11256_vm2, %v11236_v55 }
 0x70e   :  { %v11292_v58 = vmax.f32 %v11289_v5, %v11291_v31  ;;  %v11238_v27 = vmax.f32 %v11212_v32, 0.0  ;;  %v14858_v35 = vpop.f32.mrb[92].mxu1 }
 0x70f   :  { %v11301_v34 = vld [vmem:[#allocation4 + $0x1e] ss:$2 sm:$0xf]  ;;  %11266 = vst.msk [vmem:[#allocation4 + $0x48] sm:$0xff] %vm11256_vm2, %v11239_v48  ;;  %v11092_v50 = vpop.f32.mrb[93].mxu1 }
 0x710   :  { %v11308_v16 = vld [vmem:[#allocation4 + $0x28] ss:$2 sm:$0xf]  ;;  %v11302_v8 = vmax.f32 %v11299_v20, %v11301_v34  ;;  %11294 = vst.msk [vmem:[#allocation5] sm:$0xf] %vm11293_vm3, %v11292_v58 }
 0x711   :  { %v11304_v41 = vld [vmem:[#allocation4 + $0x1f] ss:$2 sm:$0xf]  ;;  %v11310_v10 = vld [vmem:[#allocation4 + $0x29] ss:$2 sm:$0xf] }
 0x712   :  { %v11305_v49 = vmax.f32 %v11302_v8, %v11304_v41  ;;  %11265 = vst.msk [vmem:[#allocation4 + $0x40] sm:$0xff] %vm11256_vm2, %v11238_v27  ;;  %v14861_v36 = vpop.f32.mrb[94].mxu1  ;;  %v11311_v57 = vmax.f32 %v11308_v16, %v11310_v10 }
 0x713   :  { %v11217_v30 = vadd.f32 %v14861_v36, %v19615_v43  ;;  %v11102_v39 = vpop.f32.mrb[95].mxu1 }
 0x714   :  { %11306 = vst.msk [vmem:[#allocation5 + $0x4] sm:$0xf] %vm11293_vm3, %v11305_v49  ;;  %v11313_v45 = vld [vmem:[#allocation4 + $0x32] ss:$2 sm:$0xf] }
 0x715   :  { %v11243_v40 = vmax.f32 %v11217_v30, 0.0  ;;  %v11314_v42 = vmax.f32 %v11311_v57, %v11313_v45  ;;  %v11316_v17 = vld [vmem:[#allocation4 + $0x33] ss:$2 sm:$0xf] }
 0x716   :  { %v14864_v62 = vpop.f32.mrb[96].mxu1 }
 0x717   :  { %11270 = vst.msk [vmem:[#allocation4 + $0x68] sm:$0xff] %vm11256_vm2, %v11243_v40  ;;  %v11219_v52 = vadd.f32 %v14864_v62, %v19615_v43  ;;  %v11112_v60 = vpop.f32.mrb[97].mxu1  ;;  %v11317_v19 = vmax.f32 %v11314_v42, %v11316_v17 }
 0x718   :  { %v11218_v13 = vadd.f32 %v19615_v43, %v11112_v60 }
 0x719   :  { %v11320_v6 = vld [vmem:[#allocation4 + $0x3c] ss:$2 sm:$0xf]  ;;  %v11322_v23 = vld [vmem:[#allocation4 + $0x3d] ss:$2 sm:$0xf] }
 0x71a   :  { %v11323_v54 = vmax.f32 %v11320_v6, %v11322_v23  ;;  %v11325_v47 = vld [vmem:[#allocation4 + $0x46] ss:$2 sm:$0xf]  ;;  %v11245_v15 = vmax.f32 %v11219_v52, 0.0  ;;  %v11244_v26 = vmax.f32 %v11218_v13, 0.0  ;;  %v14867_v53 = vpop.f32.mrb[98].mxu1 }
 0x71b   :  { %11318 = vst.msk [vmem:[#allocation5 + $0x8] sm:$0xf] %vm11293_vm3, %v11317_v19  ;;  %v11221_v1 = vadd.f32 %v14867_v53, %v19615_v43  ;;  %v11122_v18 = vpop.f32.mrb[99].mxu1  ;;  %v11328_v33 = vld [vmem:[#allocation4 + $0x47] ss:$2 sm:$0xf] }
 0x71c   :  { %v11326_v63 = vmax.f32 %v11323_v54, %v11325_v47  ;;  %11272 = vst.msk [vmem:[#allocation4 + $0x78] sm:$0xff] %vm11256_vm2, %v11245_v15  ;;  %11271 = vst.msk [vmem:[#allocation4 + $0x70] sm:$0xff] %vm11256_vm2, %v11244_v26  ;;  %v11220_v12 = vadd.f32 %v19615_v43, %v11122_v18 }
 0x71d   :  { %v11247_v51 = vmax.f32 %v11221_v1, 0.0 }
 0x71e   :  { %v11329_v28 = vmax.f32 %v11326_v63, %v11328_v33  ;;  %v11332_v25 = vld [vmem:[#allocation4 + $0x68] ss:$2 sm:$0xf]  ;;  %v11246_v11 = vmax.f32 %v11220_v12, 0.0  ;;  %v14870_v46 = vpop.f32.mrb[100].mxu1 }
 0x71f   :  { %v11334_v59 = vld [vmem:[#allocation4 + $0x69] ss:$2 sm:$0xf]  ;;  %v11223_v29 = vadd.f32 %v14870_v46, %v19615_v43  ;;  %v11132_v14 = vpop.f32.mrb[101].mxu1  ;;  %11274 = vst.msk [vmem:[#allocation4 + $0x88] sm:$0xff] %vm11256_vm2, %v11247_v51 }
 0x720   :  { %11330 = vst.msk [vmem:[#allocation5 + $0xc] sm:$0xf] %vm11293_vm3, %v11329_v28  ;;  %v11222_v0 = vadd.f32 %v19615_v43, %v11132_v14  ;;  %v11335_v61 = vmax.f32 %v11332_v25, %v11334_v59 }
 0x721   :  { %11273 = vst.msk [vmem:[#allocation4 + $0x80] sm:$0xff] %vm11256_vm2, %v11246_v11  ;;  %v11249_v3 = vmax.f32 %v11223_v29, 0.0 }
 0x722   :  { %v14873_v37 = vpop.f32.mrb[102].mxu1  ;;  %v11248_v38 = vmax.f32 %v11222_v0, 0.0 }
 0x723   :  { %v11225_v4 = vadd.f32 %v14873_v37, %v19615_v43  ;;  %v11142_v2 = vpop.f32.mrb[103].mxu1  ;;  %v11337_v22 = vld [vmem:[#allocation4 + $0x72] ss:$2 sm:$0xf]  ;;  %11276 = vst.msk [vmem:[#allocation4 + $0x98] sm:$0xff] %vm11256_vm2, %v11249_v3 }
 0x724   :  { %v11224_v56 = vadd.f32 %v19615_v43, %v11142_v2  ;;  %v11338_v44 = vmax.f32 %v11335_v61, %v11337_v22  ;;  %11275 = vst.msk [vmem:[#allocation4 + $0x90] sm:$0xff] %vm11256_vm2, %v11248_v38  ;;  %v11340_v5 = vld [vmem:[#allocation4 + $0x73] ss:$2 sm:$0xf] }
 0x725   :  { %v11251_v7 = vmax.f32 %v11225_v4, 0.0 }
 0x726   :  { %v11250_v21 = vmax.f32 %v11224_v56, 0.0  ;;  %v14876_v24 = vpop.f32.mrb[104].mxu1  ;;  %v11341_v31 = vmax.f32 %v11338_v44, %v11340_v5 }
 0x727   :  { %11278 = vst.msk [vmem:[#allocation4 + $0xa8] sm:$0xff] %vm11256_vm2, %v11251_v7  ;;  %v11152_v55 = vpop.f32.mrb[105].mxu1 }
 0x728   :  { %v11344_v48 = vld [vmem:[#allocation4 + $0x7c] ss:$2 sm:$0xf]  ;;  %v11346_v9 = vld [vmem:[#allocation4 + $0x7d] ss:$2 sm:$0xf]  ;;  %v11226_v58 = vadd.f32 %v19615_v43, %v11152_v55 }
 0x729   :  { %11277 = vst.msk [vmem:[#allocation4 + $0xa0] sm:$0xff] %vm11256_vm2, %v11250_v21  ;;  %v11347_v20 = vmax.f32 %v11344_v48, %v11346_v9  ;;  %v11349_v32 = vld [vmem:[#allocation4 + $0x86] ss:$2 sm:$0xf] }
 0x72a   :  { %11342 = vst.msk [vmem:[#allocation5 + $0x10] sm:$0xf] %vm11293_vm3, %v11341_v31  ;;  %v11252_v34 = vmax.f32 %v11226_v58, 0.0  ;;  %v14879_v16 = vpop.f32.mrb[106].mxu1 }
 0x72b   :  { %v11350_v8 = vmax.f32 %v11347_v20, %v11349_v32  ;;  %v11352_v27 = vld [vmem:[#allocation4 + $0x87] ss:$2 sm:$0xf]  ;;  %v11162_v35 = vpop.f32.mrb[107].mxu1 }
 0x72c   :  { %v11356_v41 = vld [vmem:[#allocation4 + $0x90] ss:$2 sm:$0xf]  ;;  %v11358_v50 = vld [vmem:[#allocation4 + $0x91] ss:$2 sm:$0xf] }
 0x72d   :  { %11279 = vst.msk [vmem:[#allocation4 + $0xb0] sm:$0xff] %vm11256_vm2, %v11252_v34  ;;  %v11353_v10 = vmax.f32 %v11350_v8, %v11352_v27  ;;  %v11359_v49 = vmax.f32 %v11356_v41, %v11358_v50 }
 0x72f   :  { %11354 = vst.msk [vmem:[#allocation5 + $0x14] sm:$0xf] %vm11293_vm3, %v11353_v10 }
 0x730   :  { %v11361_v36 = vld [vmem:[#allocation4 + $0x9a] ss:$2 sm:$0xf]  ;;  %v11368_v43 = vld [vmem:[#allocation4 + $0xa4] ss:$2 sm:$0xf] }
 0x731   :  { %v11362_v30 = vmax.f32 %v11359_v49, %v11361_v36  ;;  %v11370_v39 = vld [vmem:[#allocation4 + $0xa5] ss:$2 sm:$0xf]  ;;  %v11364_v57 = vld [vmem:[#allocation4 + $0x9b] ss:$2 sm:$0xf] }
 0x732   :  { %v11371_v45 = vmax.f32 %v11368_v43, %v11370_v39 }
 0x733   :  { %v11365_v40 = vmax.f32 %v11362_v30, %v11364_v57 }
 0x734   :  { %v11373_v42 = vld [vmem:[#allocation4 + $0xae] ss:$2 sm:$0xf]  ;;  %v11376_v17 = vld [vmem:[#allocation4 + $0xaf] ss:$2 sm:$0xf] }
 0x735   :  { %v11374_v62 = vmax.f32 %v11371_v45, %v11373_v42  ;;  %11366 = vst.msk [vmem:[#allocation5 + $0x18] sm:$0xf] %vm11293_vm3, %v11365_v40 }
 0x737   :  { %v11377_v52 = vmax.f32 %v11374_v62, %v11376_v17 }
 0x739   :  { %11378 = vst.msk [vmem:[#allocation5 + $0x1c] sm:$0xf] %vm11293_vm3, %v11377_v52 }
 0x73a   :  { %15799 = shalt.err (!%p15796_p4)
}
 0x73b   :  { %s15800_s22 = scalar_lea.hbm %s19682_s5, 512 }
 0x73c   :  { %p15801_p5 = scmp.ne.s32.totalorder %s19682_s5, %s15800_s22  ;;  %p15804_p6 = scmp.lt.u32.totalorder %s15800_s22, %s19682_s5 }
 0x73e   :  { %p15806_p7 = pnand %p15804_p6, %p15801_p5 }
 0x740   :  { %15809 = shalt.err (!%p15806_p7)
}
 0x741   :  { %s15814_s27 = smov 128   ;;  %s15815_s28 = smov 8  }
 0x742   :  { %11390 = dma.vmem_to_hbm [thread:$0]  %s11385_s19, 512, %s19682_s5, [#allocation6], %s15814_s27, %s15814_s27, %s15815_s28  }
 0x743   :  { %15810 = dma.done.wait [#allocation6], 512  }
 0x744   :  { %15811 = vsyncadd [#allocation6], 4294966784 }
 0x745   :  { %11394 = vsyncpa [#allocation6], 1 }

</bundles_post_ra>
